<compile_context>
chip_gen: v5e
topology: v5e:2x2
jax: 0.10.0
libtpu: 0.0.40
codegen_flags: <defaults>
</compile_context>

<pallas_src>
import jax
import jax.numpy as jnp
from jax.experimental import pallas as pl
from jax.experimental.pallas import tpu as pltpu

LRELU_SLOPE = 0.2
BN_EPS = 1e-5
K = 4          # kernel size used by every conv in the module
STRIDE = 2
TM_MAX = 512                      # row tile (safe/near-roofline on v5e..v7x)
VMEM_LIMIT = 32 * 1024 * 1024     # explicit scoped-VMEM cap (fits v7x too)


def _round_up(x, m):
    return (x + m - 1) // m * m


# ----------------------------- Pallas kernels ------------------------------

def conv_bias_lrelu_kernel(p_ref, w_ref, b_ref, o_ref):
    # (TM, Kdim)bf16 @ (Kdim, Cout)bf16 -> f32 ; + bias ; LeakyReLU(0.2)
    y = jnp.dot(p_ref[...], w_ref[...], preferred_element_type=jnp.float32)
    y = y + b_ref[...]
    o_ref[...] = jnp.where(y > 0, y, LRELU_SLOPE * y)


def matmul_stats_kernel(p_ref, w_ref, y_ref, s_ref, q_ref):
    # BN layers, pass 1: y = patches @ W (bias-free), plus per-channel running
    # sum / sum-of-squares accumulated across the whole M grid (so statistics
    # are over all N*Ho*Wo rows, never per tile).
    @pl.when(pl.program_id(0) == 0)
    def _init():
        s_ref[...] = jnp.zeros_like(s_ref)
        q_ref[...] = jnp.zeros_like(q_ref)

    y = jnp.dot(p_ref[...], w_ref[...], preferred_element_type=jnp.float32)
    y_ref[...] = y
    s_ref[...] += jnp.sum(y, axis=0, keepdims=True)
    q_ref[...] += jnp.sum(y * y, axis=0, keepdims=True)


def scale_shift_lrelu_kernel(y_ref, s_ref, t_ref, o_ref):
    # BN layers, pass 2: z = y*scale + shift ; LeakyReLU(0.2)   (all f32)
    z = y_ref[...] * s_ref[...] + t_ref[...]
    o_ref[...] = jnp.where(z > 0, z, LRELU_SLOPE * z)


def rowdot_bias_kernel(p_ref, w_ref, b_ref, o_ref):
    # Final conv (Cout=1): VPU multiply + cross-lane reduce, no MXU.
    y = jnp.sum(p_ref[...] * w_ref[...], axis=-1, keepdims=True)
    o_ref[...] = y + b_ref[...]


# ------------------------------- JAX glue ----------------------------------

def _im2col_nhwc(x, k, stride, pad, out_dtype):
    """x: (N, H, W, C) -> patches (N*Ho*Wo, k*k*C), column order (kh, kw, c)."""
    n, h, w, c = x.shape
    x = x.astype(out_dtype)
    if pad:
        x = jnp.pad(x, ((0, 0), (pad, pad), (pad, pad), (0, 0)))
    ho = (h + 2 * pad - k) // stride + 1
    wo = (w + 2 * pad - k) // stride + 1
    taps = []
    for i in range(k):
        for j in range(k):
            taps.append(x[:, i:i + stride * (ho - 1) + 1:stride,
                            j:j + stride * (wo - 1) + 1:stride, :])
    p = jnp.stack(taps, axis=3)                  # (N, Ho, Wo, k*k, C)
    p = p.reshape(n * ho * wo, k * k * c)
    return p, ho, wo


def _w2d(w, dtype):
    """PyTorch (Cout, Cin, kh, kw) -> (kh*kw*Cin, Cout), matching im2col cols."""
    cout = w.shape[0]
    return w.transpose(2, 3, 1, 0).reshape(-1, cout).astype(dtype)


def _pad_rows(a, rows):
    if rows != a.shape[0]:
        a = jnp.pad(a, ((0, rows - a.shape[0]), (0, 0)))
    return a


def _matmul_bias_lrelu(patches, w2d, bias, tm):
    mp, kdim = patches.shape
    cout = w2d.shape[1]
    return pl.pallas_call(
        conv_bias_lrelu_kernel,
        out_shape=jax.ShapeDtypeStruct((mp, cout), jnp.float32),
        grid=(mp // tm,),
        in_specs=[pl.BlockSpec((tm, kdim), lambda i: (i, 0)),
                  pl.BlockSpec((kdim, cout), lambda i: (0, 0)),
                  pl.BlockSpec((1, cout), lambda i: (0, 0))],
        out_specs=pl.BlockSpec((tm, cout), lambda i: (i, 0)),
        compiler_params=pltpu.CompilerParams(
            dimension_semantics=("parallel",),
            vmem_limit_bytes=VMEM_LIMIT),
    )(patches, w2d, bias)


def _matmul_stats(patches, w2d, tm):
    mp, kdim = patches.shape
    cout = w2d.shape[1]
    return pl.pallas_call(
        matmul_stats_kernel,
        out_shape=(jax.ShapeDtypeStruct((mp, cout), jnp.float32),
                   jax.ShapeDtypeStruct((1, cout), jnp.float32),
                   jax.ShapeDtypeStruct((1, cout), jnp.float32)),
        grid=(mp // tm,),
        in_specs=[pl.BlockSpec((tm, kdim), lambda i: (i, 0)),
                  pl.BlockSpec((kdim, cout), lambda i: (0, 0))],
        out_specs=(pl.BlockSpec((tm, cout), lambda i: (i, 0)),
                   pl.BlockSpec((1, cout), lambda i: (0, 0)),
                   pl.BlockSpec((1, cout), lambda i: (0, 0))),
        compiler_params=pltpu.CompilerParams(
            dimension_semantics=("arbitrary",),   # stats accumulate across M
            vmem_limit_bytes=VMEM_LIMIT),
    )(patches, w2d)


def _scale_shift_lrelu(y, scale, shift, m_true):
    """y: (Mp, Cout) f32 pre-BN matmul output. Returns (m_true, Cout) f32."""
    mp, cout = y.shape
    if 128 % cout == 0 and (mp * cout) % 128 == 0:
        # lane-dense view: pack channels of several rows onto the 128-lane axis
        reps = 128 // cout
        r = (mp * cout) // 128
        y2 = y.reshape(r, 128)
        s2 = jnp.tile(scale, reps).reshape(1, 128)
        t2 = jnp.tile(shift, reps).reshape(1, 128)
    else:
        r = mp
        y2 = y
        s2 = scale.reshape(1, cout)
        t2 = shift.reshape(1, cout)
    lanes = y2.shape[1]
    tr = min(TM_MAX, _round_up(r, 8))
    rp = _round_up(r, tr)
    y2 = _pad_rows(y2, rp)
    out = pl.pallas_call(
        scale_shift_lrelu_kernel,
        out_shape=jax.ShapeDtypeStruct((rp, lanes), jnp.float32),
        grid=(rp // tr,),
        in_specs=[pl.BlockSpec((tr, lanes), lambda i: (i, 0)),
                  pl.BlockSpec((1, lanes), lambda i: (0, 0)),
                  pl.BlockSpec((1, lanes), lambda i: (0, 0))],
        out_specs=pl.BlockSpec((tr, lanes), lambda i: (i, 0)),
        compiler_params=pltpu.CompilerParams(
            dimension_semantics=("parallel",),
            vmem_limit_bytes=VMEM_LIMIT),
    )(y2, s2, t2)
    return out[:r].reshape(mp, cout)[:m_true]


# ------------------------------ layer wrappers ------------------------------

def _conv_bias_lrelu_layer(x, w, b, pad):
    n = x.shape[0]
    cout = w.shape[0]
    patches, ho, wo = _im2col_nhwc(x, K, STRIDE, pad, jnp.bfloat16)
    m = patches.shape[0]
    tm = min(TM_MAX, _round_up(m, 8))
    patches = _pad_rows(patches, _round_up(m, tm))
    out = _matmul_bias_lrelu(patches, _w2d(w, jnp.bfloat16),
                             b.reshape(1, cout).astype(jnp.float32), tm)
    return out[:m].reshape(n, ho, wo, cout)


def _conv_bn_lrelu_layer(x, w, gamma, beta, pad):
    n = x.shape[0]
    cout = w.shape[0]
    patches, ho, wo = _im2col_nhwc(x, K, STRIDE, pad, jnp.bfloat16)
    m = patches.shape[0]
    tm = min(TM_MAX, _round_up(m, 8))
    patches = _pad_rows(patches, _round_up(m, tm))
    y, s, q = _matmul_stats(patches, _w2d(w, jnp.bfloat16), tm)
    # Fold train-mode BN (biased variance over all N*Ho*Wo rows, eps=1e-5)
    # into a per-channel scale/shift (tiny (Cout,) computation).
    mean = s[0] / m
    var = jnp.maximum(q[0] / m - mean * mean, 0.0)
    scale = gamma * jax.lax.rsqrt(var + BN_EPS)
    shift = beta - mean * scale
    z = _scale_shift_lrelu(y, scale, shift, m)
    return z.reshape(n, ho, wo, cout)


def _final_conv_layer(x, w, b):
    # Conv(8fd -> 1, 4, 2, 0): output 1x1, Cout=1 -> VPU row reduction.
    n = x.shape[0]
    patches, ho, wo = _im2col_nhwc(x, K, STRIDE, 0, jnp.float32)
    kdim = patches.shape[1]
    w_row = w.transpose(2, 3, 1, 0).reshape(1, kdim).astype(jnp.float32)
    b2d = b.reshape(1, 1).astype(jnp.float32)
    vmem = pl.BlockSpec(memory_space=pltpu.MemorySpace.VMEM)
    out = pl.pallas_call(
        rowdot_bias_kernel,
        out_shape=jax.ShapeDtypeStruct((patches.shape[0], 1), jnp.float32),
        in_specs=[vmem, vmem, vmem],
        out_specs=vmem,
    )(patches, w_row, b2d)
    return out.reshape(n, ho, wo, 1)


def discriminator_forward(x, p):
    x = x.transpose(0, 2, 3, 1)                       # NCHW -> NHWC (once)
    x = _conv_bias_lrelu_layer(x, p["w1"], p["b1"], pad=1)
    x = _conv_bn_lrelu_layer(x, p["w2"], p["g2"], p["be2"], pad=1)
    x = _conv_bn_lrelu_layer(x, p["w3"], p["g3"], p["be3"], pad=1)
    x = _conv_bn_lrelu_layer(x, p["w4"], p["g4"], p["be4"], pad=1)
    x = _final_conv_layer(x, p["w5"], p["b5"])
    return x.transpose(0, 3, 1, 2)                    # (N, 1, 1, 1) NCHW


def init_params(key, channels_img, features_d):
    """Deterministic PyTorch-default-style init (uniform +-1/sqrt(fan_in))."""
    fd = features_d
    keys = jax.random.split(key, 12)

    def conv_w(k, cout, cin):
        bound = 1.0 / (cin * K * K) ** 0.5
        return jax.random.uniform(k, (cout, cin, K, K), jnp.float32,
                                  -bound, bound)

    def conv_b(k, cout, cin):
        bound = 1.0 / (cin * K * K) ** 0.5
        return jax.random.uniform(k, (cout,), jnp.float32, -bound, bound)

    p = {
        "w1": conv_w(keys[0], fd, channels_img),
        "b1": conv_b(keys[1], fd, channels_img),
        "w2": conv_w(keys[2], 2 * fd, fd),
        "g2": jnp.ones((2 * fd,), jnp.float32),
        "be2": jnp.zeros((2 * fd,), jnp.float32),
        "w3": conv_w(keys[3], 4 * fd, 2 * fd),
        "g3": jnp.ones((4 * fd,), jnp.float32),
        "be3": jnp.zeros((4 * fd,), jnp.float32),
        "w4": conv_w(keys[4], 8 * fd, 4 * fd),
        "g4": jnp.ones((8 * fd,), jnp.float32),
        "be4": jnp.zeros((8 * fd,), jnp.float32),
        "w5": conv_w(keys[5], 1, 8 * fd),
        "b5": conv_b(keys[6], 1, 8 * fd),
    }
    return p


if __name__ == "__main__":
    channels_img, features_d = 3, 8
    key = jax.random.PRNGKey(0)
    kx, kp = jax.random.split(key)
    # 64x64 input is what the architecture implies (ends at 1x1 after 5 convs)
    x = jax.random.normal(kx, (2, channels_img, 64, 64), jnp.float32)
    params = init_params(kp, channels_img, features_d)

    out = jax.jit(discriminator_forward)(x, params)
    jax.block_until_ready(out)
    assert out.shape == (2, 1, 1, 1), out.shape
    assert out.dtype == jnp.float32
    print("KERNEL_OK")
</pallas_src>

<mosaic_0001>
module attributes {stable_mosaic.version = 11 : i64} {
  func.func @conv_bias_lrelu_kernel(%arg0: i32, %arg1: memref<512x48xbf16, #tpu.memory_space<vmem>>, %arg2: memref<48x8xbf16, #tpu.memory_space<vmem>>, %arg3: memref<1x8xf32, #tpu.memory_space<vmem>>, %arg4: memref<512x8xf32, #tpu.memory_space<vmem>>) attributes {dimension_semantics = [#tpu.dimension_semantics<parallel>], iteration_bounds = array<i64: 4>, scalar_prefetch = 0 : i64, scratch_operands = 0 : i64, tpu.core_type = #tpu.core_type<tc>, window_params = [{transform_indices = @transform_0, window_bounds = array<i64: 512, 48>}, {pipeline_mode = #tpu.pipeline_mode<synchronous>, transform_indices = @transform_1, window_bounds = array<i64: 48, 8>}, {pipeline_mode = #tpu.pipeline_mode<synchronous>, transform_indices = @transform_2, window_bounds = array<i64: 1, 8>}, {transform_indices = @transform_3, window_bounds = array<i64: 512, 8>}]} {
    %c0 = arith.constant 0 : index
    %c0_0 = arith.constant 0 : index
    %0 = vector.load %arg1[%c0, %c0_0] : memref<512x48xbf16, #tpu.memory_space<vmem>>, vector<512x48xbf16>
    %c0_1 = arith.constant 0 : index
    %c0_2 = arith.constant 0 : index
    %1 = vector.load %arg2[%c0_1, %c0_2] : memref<48x8xbf16, #tpu.memory_space<vmem>>, vector<48x8xbf16>
    %cst = arith.constant dense<0.000000e+00> : vector<512x8xf32>
    %2 = tpu.matmul %0, %1, %cst {dimension_numbers = #tpu.dot_dimension_numbers<[1], [0], [0], [1], [0, 0, 1, 1], [], []>} : vector<512x48xbf16>, vector<48x8xbf16>, vector<512x8xf32> -> vector<512x8xf32>
    %c0_3 = arith.constant 0 : index
    %c0_4 = arith.constant 0 : index
    %3 = vector.load %arg3[%c0_3, %c0_4] : memref<1x8xf32, #tpu.memory_space<vmem>>, vector<1x8xf32>
    %4 = vector.broadcast %3 : vector<1x8xf32> to vector<512x8xf32>
    %5 = arith.addf %2, %4 : vector<512x8xf32>
    %cst_5 = arith.constant 0.000000e+00 : f32
    %6 = vector.broadcast %cst_5 : f32 to vector<512x8xf32>
    %7 = arith.cmpf ogt, %5, %6 : vector<512x8xf32>
    %cst_6 = arith.constant 2.000000e-01 : f32
    %8 = vector.broadcast %cst_6 : f32 to vector<512x8xf32>
    %9 = arith.mulf %8, %5 : vector<512x8xf32>
    %10 = arith.select %7, %5, %9 : vector<512x8xi1>, vector<512x8xf32>
    %c0_7 = arith.constant 0 : index
    %c0_8 = arith.constant 0 : index
    %11 = vector.load %arg4[%c0_7, %c0_8] : memref<512x8xf32, #tpu.memory_space<vmem>>, vector<512x8xf32>
    tpu.vector_store %arg4[%c0_7, %c0_8], %10 {strides = array<i32>} : memref<512x8xf32, #tpu.memory_space<vmem>>, vector<512x8xf32>,
    return
  }
  func.func @transform_0(%arg0: i32) -> (i32, i32) {
    %c0_i32 = arith.constant 0 : i32
    %c0_i32_0 = arith.constant 0 : i32
    return %arg0, %c0_i32 : i32, i32
  }
  func.func @transform_1(%arg0: i32) -> (i32, i32) {
    %c0_i32 = arith.constant 0 : i32
    %c0_i32_0 = arith.constant 0 : i32
    %c0_i32_1 = arith.constant 0 : i32
    return %c0_i32, %c0_i32_0 : i32, i32
  }
  func.func @transform_2(%arg0: i32) -> (i32, i32) {
    %c0_i32 = arith.constant 0 : i32
    %c0_i32_0 = arith.constant 0 : i32
    %c0_i32_1 = arith.constant 0 : i32
    return %c0_i32, %c0_i32_0 : i32, i32
  }
  func.func @transform_3(%arg0: i32) -> (i32, i32) {
    %c0_i32 = arith.constant 0 : i32
    %c0_i32_0 = arith.constant 0 : i32
    return %arg0, %c0_i32 : i32, i32
  }
}

module attributes {stable_mosaic.version = 11 : i64} {
  func.func @matmul_stats_kernel(%arg0: i32, %arg1: memref<512x128xbf16, #tpu.memory_space<vmem>>, %arg2: memref<128x16xbf16, #tpu.memory_space<vmem>>, %arg3: memref<512x16xf32, #tpu.memory_space<vmem>>, %arg4: memref<1x16xf32, #tpu.memory_space<vmem>>, %arg5: memref<1x16xf32, #tpu.memory_space<vmem>>) attributes {dimension_semantics = [#tpu.dimension_semantics<arbitrary>], iteration_bounds = array<i64: 1>, scalar_prefetch = 0 : i64, scratch_operands = 0 : i64, tpu.core_type = #tpu.core_type<tc>, window_params = [{transform_indices = @transform_0, window_bounds = array<i64: 512, 128>}, {pipeline_mode = #tpu.pipeline_mode<synchronous>, transform_indices = @transform_1, window_bounds = array<i64: 128, 16>}, {transform_indices = @transform_2, window_bounds = array<i64: 512, 16>}, {pipeline_mode = #tpu.pipeline_mode<synchronous>, transform_indices = @transform_3, window_bounds = array<i64: 1, 16>}, {pipeline_mode = #tpu.pipeline_mode<synchronous>, transform_indices = @transform_4, window_bounds = array<i64: 1, 16>}]} {
    %c0_i32 = arith.constant 0 : i32
    %0 = arith.cmpi eq, %arg0, %c0_i32 : i32
    %1 = arith.extui %0 : i1 to i32
    %c0_i32_0 = arith.constant 0 : i32
    %2 = arith.cmpi ne, %1, %c0_i32_0 : i32
    scf.if %2 {
      %cst_16 = arith.constant 0.000000e+00 : f32
      %18 = vector.broadcast %cst_16 : f32 to vector<1x16xf32>
      %c0_17 = arith.constant 0 : index
      %c0_18 = arith.constant 0 : index
      %19 = vector.load %arg4[%c0_17, %c0_18] : memref<1x16xf32, #tpu.memory_space<vmem>>, vector<1x16xf32>
      tpu.vector_store %arg4[%c0_17, %c0_18], %18 {strides = array<i32>} : memref<1x16xf32, #tpu.memory_space<vmem>>, vector<1x16xf32>,
      %cst_19 = arith.constant 0.000000e+00 : f32
      %20 = vector.broadcast %cst_19 : f32 to vector<1x16xf32>
      %c0_20 = arith.constant 0 : index
      %c0_21 = arith.constant 0 : index
      %21 = vector.load %arg5[%c0_20, %c0_21] : memref<1x16xf32, #tpu.memory_space<vmem>>, vector<1x16xf32>
      tpu.vector_store %arg5[%c0_20, %c0_21], %20 {strides = array<i32>} : memref<1x16xf32, #tpu.memory_space<vmem>>, vector<1x16xf32>,
    } else {
    }
    %c0 = arith.constant 0 : index
    %c0_1 = arith.constant 0 : index
    %3 = vector.load %arg1[%c0, %c0_1] : memref<512x128xbf16, #tpu.memory_space<vmem>>, vector<512x128xbf16>
    %c0_2 = arith.constant 0 : index
    %c0_3 = arith.constant 0 : index
    %4 = vector.load %arg2[%c0_2, %c0_3] : memref<128x16xbf16, #tpu.memory_space<vmem>>, vector<128x16xbf16>
    %cst = arith.constant dense<0.000000e+00> : vector<512x16xf32>
    %5 = tpu.matmul %3, %4, %cst {dimension_numbers = #tpu.dot_dimension_numbers<[1], [0], [0], [1], [0, 0, 1, 1], [], []>} : vector<512x128xbf16>, vector<128x16xbf16>, vector<512x16xf32> -> vector<512x16xf32>
    %c0_4 = arith.constant 0 : index
    %c0_5 = arith.constant 0 : index
    %6 = vector.load %arg3[%c0_4, %c0_5] : memref<512x16xf32, #tpu.memory_space<vmem>>, vector<512x16xf32>
    tpu.vector_store %arg3[%c0_4, %c0_5], %5 {strides = array<i32>} : memref<512x16xf32, #tpu.memory_space<vmem>>, vector<512x16xf32>,
    %c0_6 = arith.constant 0 : index
    %c0_7 = arith.constant 0 : index
    %7 = vector.load %arg4[%c0_6, %c0_7] : memref<1x16xf32, #tpu.memory_space<vmem>>, vector<1x16xf32>
    %cst_8 = arith.constant dense<0.000000e+00> : vector<16xf32>
    %8 = vector.multi_reduction <add>, %5, %cst_8 [0] : vector<512x16xf32> to vector<16xf32>
    %9 = vector.shape_cast %8 : vector<16xf32> to vector<1x16xf32>
    %10 = arith.addf %7, %9 : vector<1x16xf32>
    %c0_9 = arith.constant 0 : index
    %c0_10 = arith.constant 0 : index
    %11 = vector.load %arg4[%c0_9, %c0_10] : memref<1x16xf32, #tpu.memory_space<vmem>>, vector<1x16xf32>
    tpu.vector_store %arg4[%c0_9, %c0_10], %10 {strides = array<i32>} : memref<1x16xf32, #tpu.memory_space<vmem>>, vector<1x16xf32>,
    %c0_11 = arith.constant 0 : index
    %c0_12 = arith.constant 0 : index
    %12 = vector.load %arg5[%c0_11, %c0_12] : memref<1x16xf32, #tpu.memory_space<vmem>>, vector<1x16xf32>
    %13 = arith.mulf %5, %5 : vector<512x16xf32>
    %cst_13 = arith.constant dense<0.000000e+00> : vector<16xf32>
    %14 = vector.multi_reduction <add>, %13, %cst_13 [0] : vector<512x16xf32> to vector<16xf32>
    %15 = vector.shape_cast %14 : vector<16xf32> to vector<1x16xf32>
    %16 = arith.addf %12, %15 : vector<1x16xf32>
    %c0_14 = arith.constant 0 : index
    %c0_15 = arith.constant 0 : index
    %17 = vector.load %arg5[%c0_14, %c0_15] : memref<1x16xf32, #tpu.memory_space<vmem>>, vector<1x16xf32>
    tpu.vector_store %arg5[%c0_14, %c0_15], %16 {strides = array<i32>} : memref<1x16xf32, #tpu.memory_space<vmem>>, vector<1x16xf32>,
    return
  }
  func.func @transform_0(%arg0: i32) -> (i32, i32) {
    %c0_i32 = arith.constant 0 : i32
    %c0_i32_0 = arith.constant 0 : i32
    return %arg0, %c0_i32 : i32, i32
  }
  func.func @transform_1(%arg0: i32) -> (i32, i32) {
    %c0_i32 = arith.constant 0 : i32
    %c0_i32_0 = arith.constant 0 : i32
    %c0_i32_1 = arith.constant 0 : i32
    return %c0_i32, %c0_i32_0 : i32, i32
  }
  func.func @transform_2(%arg0: i32) -> (i32, i32) {
    %c0_i32 = arith.constant 0 : i32
    %c0_i32_0 = arith.constant 0 : i32
    return %arg0, %c0_i32 : i32, i32
  }
  func.func @transform_3(%arg0: i32) -> (i32, i32) {
    %c0_i32 = arith.constant 0 : i32
    %c0_i32_0 = arith.constant 0 : i32
    %c0_i32_1 = arith.constant 0 : i32
    return %c0_i32, %c0_i32_0 : i32, i32
  }
  func.func @transform_4(%arg0: i32) -> (i32, i32) {
    %c0_i32 = arith.constant 0 : i32
    %c0_i32_0 = arith.constant 0 : i32
    %c0_i32_1 = arith.constant 0 : i32
    return %c0_i32, %c0_i32_0 : i32, i32
  }
}

module attributes {stable_mosaic.version = 11 : i64} {
  func.func @scale_shift_lrelu_kernel(%arg0: i32, %arg1: memref<64x128xf32, #tpu.memory_space<vmem>>, %arg2: memref<1x128xf32, #tpu.memory_space<vmem>>, %arg3: memref<1x128xf32, #tpu.memory_space<vmem>>, %arg4: memref<64x128xf32, #tpu.memory_space<vmem>>) attributes {dimension_semantics = [#tpu.dimension_semantics<parallel>], iteration_bounds = array<i64: 1>, scalar_prefetch = 0 : i64, scratch_operands = 0 : i64, tpu.core_type = #tpu.core_type<tc>, window_params = [{transform_indices = @transform_0, window_bounds = array<i64: 64, 128>}, {pipeline_mode = #tpu.pipeline_mode<synchronous>, transform_indices = @transform_1, window_bounds = array<i64: 1, 128>}, {pipeline_mode = #tpu.pipeline_mode<synchronous>, transform_indices = @transform_2, window_bounds = array<i64: 1, 128>}, {transform_indices = @transform_3, window_bounds = array<i64: 64, 128>}]} {
    %c0 = arith.constant 0 : index
    %c0_0 = arith.constant 0 : index
    %0 = vector.load %arg1[%c0, %c0_0] : memref<64x128xf32, #tpu.memory_space<vmem>>, vector<64x128xf32>
    %c0_1 = arith.constant 0 : index
    %c0_2 = arith.constant 0 : index
    %1 = vector.load %arg2[%c0_1, %c0_2] : memref<1x128xf32, #tpu.memory_space<vmem>>, vector<1x128xf32>
    %2 = vector.broadcast %1 : vector<1x128xf32> to vector<64x128xf32>
    %3 = arith.mulf %0, %2 : vector<64x128xf32>
    %c0_3 = arith.constant 0 : index
    %c0_4 = arith.constant 0 : index
    %4 = vector.load %arg3[%c0_3, %c0_4] : memref<1x128xf32, #tpu.memory_space<vmem>>, vector<1x128xf32>
    %5 = vector.broadcast %4 : vector<1x128xf32> to vector<64x128xf32>
    %6 = arith.addf %3, %5 : vector<64x128xf32>
    %cst = arith.constant 0.000000e+00 : f32
    %7 = vector.broadcast %cst : f32 to vector<64x128xf32>
    %8 = arith.cmpf ogt, %6, %7 : vector<64x128xf32>
    %cst_5 = arith.constant 2.000000e-01 : f32
    %9 = vector.broadcast %cst_5 : f32 to vector<64x128xf32>
    %10 = arith.mulf %9, %6 : vector<64x128xf32>
    %11 = arith.select %8, %6, %10 : vector<64x128xi1>, vector<64x128xf32>
    %c0_6 = arith.constant 0 : index
    %c0_7 = arith.constant 0 : index
    %12 = vector.load %arg4[%c0_6, %c0_7] : memref<64x128xf32, #tpu.memory_space<vmem>>, vector<64x128xf32>
    tpu.vector_store %arg4[%c0_6, %c0_7], %11 {strides = array<i32>} : memref<64x128xf32, #tpu.memory_space<vmem>>, vector<64x128xf32>,
    return
  }
  func.func @transform_0(%arg0: i32) -> (i32, i32) {
    %c0_i32 = arith.constant 0 : i32
    %c0_i32_0 = arith.constant 0 : i32
    return %arg0, %c0_i32 : i32, i32
  }
  func.func @transform_1(%arg0: i32) -> (i32, i32) {
    %c0_i32 = arith.constant 0 : i32
    %c0_i32_0 = arith.constant 0 : i32
    %c0_i32_1 = arith.constant 0 : i32
    return %c0_i32, %c0_i32_0 : i32, i32
  }
  func.func @transform_2(%arg0: i32) -> (i32, i32) {
    %c0_i32 = arith.constant 0 : i32
    %c0_i32_0 = arith.constant 0 : i32
    %c0_i32_1 = arith.constant 0 : i32
    return %c0_i32, %c0_i32_0 : i32, i32
  }
  func.func @transform_3(%arg0: i32) -> (i32, i32) {
    %c0_i32 = arith.constant 0 : i32
    %c0_i32_0 = arith.constant 0 : i32
    return %arg0, %c0_i32 : i32, i32
  }
}

module attributes {stable_mosaic.version = 11 : i64} {
  func.func @matmul_stats_kernel(%arg0: i32, %arg1: memref<128x256xbf16, #tpu.memory_space<vmem>>, %arg2: memref<256x32xbf16, #tpu.memory_space<vmem>>, %arg3: memref<128x32xf32, #tpu.memory_space<vmem>>, %arg4: memref<1x32xf32, #tpu.memory_space<vmem>>, %arg5: memref<1x32xf32, #tpu.memory_space<vmem>>) attributes {dimension_semantics = [#tpu.dimension_semantics<arbitrary>], iteration_bounds = array<i64: 1>, scalar_prefetch = 0 : i64, scratch_operands = 0 : i64, tpu.core_type = #tpu.core_type<tc>, window_params = [{transform_indices = @transform_0, window_bounds = array<i64: 128, 256>}, {pipeline_mode = #tpu.pipeline_mode<synchronous>, transform_indices = @transform_1, window_bounds = array<i64: 256, 32>}, {transform_indices = @transform_2, window_bounds = array<i64: 128, 32>}, {pipeline_mode = #tpu.pipeline_mode<synchronous>, transform_indices = @transform_3, window_bounds = array<i64: 1, 32>}, {pipeline_mode = #tpu.pipeline_mode<synchronous>, transform_indices = @transform_4, window_bounds = array<i64: 1, 32>}]} {
    %c0_i32 = arith.constant 0 : i32
    %0 = arith.cmpi eq, %arg0, %c0_i32 : i32
    %1 = arith.extui %0 : i1 to i32
    %c0_i32_0 = arith.constant 0 : i32
    %2 = arith.cmpi ne, %1, %c0_i32_0 : i32
    scf.if %2 {
      %cst_16 = arith.constant 0.000000e+00 : f32
      %18 = vector.broadcast %cst_16 : f32 to vector<1x32xf32>
      %c0_17 = arith.constant 0 : index
      %c0_18 = arith.constant 0 : index
      %19 = vector.load %arg4[%c0_17, %c0_18] : memref<1x32xf32, #tpu.memory_space<vmem>>, vector<1x32xf32>
      tpu.vector_store %arg4[%c0_17, %c0_18], %18 {strides = array<i32>} : memref<1x32xf32, #tpu.memory_space<vmem>>, vector<1x32xf32>,
      %cst_19 = arith.constant 0.000000e+00 : f32
      %20 = vector.broadcast %cst_19 : f32 to vector<1x32xf32>
      %c0_20 = arith.constant 0 : index
      %c0_21 = arith.constant 0 : index
      %21 = vector.load %arg5[%c0_20, %c0_21] : memref<1x32xf32, #tpu.memory_space<vmem>>, vector<1x32xf32>
      tpu.vector_store %arg5[%c0_20, %c0_21], %20 {strides = array<i32>} : memref<1x32xf32, #tpu.memory_space<vmem>>, vector<1x32xf32>,
    } else {
    }
    %c0 = arith.constant 0 : index
    %c0_1 = arith.constant 0 : index
    %3 = vector.load %arg1[%c0, %c0_1] : memref<128x256xbf16, #tpu.memory_space<vmem>>, vector<128x256xbf16>
    %c0_2 = arith.constant 0 : index
    %c0_3 = arith.constant 0 : index
    %4 = vector.load %arg2[%c0_2, %c0_3] : memref<256x32xbf16, #tpu.memory_space<vmem>>, vector<256x32xbf16>
    %cst = arith.constant dense<0.000000e+00> : vector<128x32xf32>
    %5 = tpu.matmul %3, %4, %cst {dimension_numbers = #tpu.dot_dimension_numbers<[1], [0], [0], [1], [0, 0, 1, 1], [], []>} : vector<128x256xbf16>, vector<256x32xbf16>, vector<128x32xf32> -> vector<128x32xf32>
    %c0_4 = arith.constant 0 : index
    %c0_5 = arith.constant 0 : index
    %6 = vector.load %arg3[%c0_4, %c0_5] : memref<128x32xf32, #tpu.memory_space<vmem>>, vector<128x32xf32>
    tpu.vector_store %arg3[%c0_4, %c0_5], %5 {strides = array<i32>} : memref<128x32xf32, #tpu.memory_space<vmem>>, vector<128x32xf32>,
    %c0_6 = arith.constant 0 : index
    %c0_7 = arith.constant 0 : index
    %7 = vector.load %arg4[%c0_6, %c0_7] : memref<1x32xf32, #tpu.memory_space<vmem>>, vector<1x32xf32>
    %cst_8 = arith.constant dense<0.000000e+00> : vector<32xf32>
    %8 = vector.multi_reduction <add>, %5, %cst_8 [0] : vector<128x32xf32> to vector<32xf32>
    %9 = vector.shape_cast %8 : vector<32xf32> to vector<1x32xf32>
    %10 = arith.addf %7, %9 : vector<1x32xf32>
    %c0_9 = arith.constant 0 : index
    %c0_10 = arith.constant 0 : index
    %11 = vector.load %arg4[%c0_9, %c0_10] : memref<1x32xf32, #tpu.memory_space<vmem>>, vector<1x32xf32>
    tpu.vector_store %arg4[%c0_9, %c0_10], %10 {strides = array<i32>} : memref<1x32xf32, #tpu.memory_space<vmem>>, vector<1x32xf32>,
    %c0_11 = arith.constant 0 : index
    %c0_12 = arith.constant 0 : index
    %12 = vector.load %arg5[%c0_11, %c0_12] : memref<1x32xf32, #tpu.memory_space<vmem>>, vector<1x32xf32>
    %13 = arith.mulf %5, %5 : vector<128x32xf32>
    %cst_13 = arith.constant dense<0.000000e+00> : vector<32xf32>
    %14 = vector.multi_reduction <add>, %13, %cst_13 [0] : vector<128x32xf32> to vector<32xf32>
    %15 = vector.shape_cast %14 : vector<32xf32> to vector<1x32xf32>
    %16 = arith.addf %12, %15 : vector<1x32xf32>
    %c0_14 = arith.constant 0 : index
    %c0_15 = arith.constant 0 : index
    %17 = vector.load %arg5[%c0_14, %c0_15] : memref<1x32xf32, #tpu.memory_space<vmem>>, vector<1x32xf32>
    tpu.vector_store %arg5[%c0_14, %c0_15], %16 {strides = array<i32>} : memref<1x32xf32, #tpu.memory_space<vmem>>, vector<1x32xf32>,
    return
  }
  func.func @transform_0(%arg0: i32) -> (i32, i32) {
    %c0_i32 = arith.constant 0 : i32
    %c0_i32_0 = arith.constant 0 : i32
    return %arg0, %c0_i32 : i32, i32
  }
  func.func @transform_1(%arg0: i32) -> (i32, i32) {
    %c0_i32 = arith.constant 0 : i32
    %c0_i32_0 = arith.constant 0 : i32
    %c0_i32_1 = arith.constant 0 : i32
    return %c0_i32, %c0_i32_0 : i32, i32
  }
  func.func @transform_2(%arg0: i32) -> (i32, i32) {
    %c0_i32 = arith.constant 0 : i32
    %c0_i32_0 = arith.constant 0 : i32
    return %arg0, %c0_i32 : i32, i32
  }
  func.func @transform_3(%arg0: i32) -> (i32, i32) {
    %c0_i32 = arith.constant 0 : i32
    %c0_i32_0 = arith.constant 0 : i32
    %c0_i32_1 = arith.constant 0 : i32
    return %c0_i32, %c0_i32_0 : i32, i32
  }
  func.func @transform_4(%arg0: i32) -> (i32, i32) {
    %c0_i32 = arith.constant 0 : i32
    %c0_i32_0 = arith.constant 0 : i32
    %c0_i32_1 = arith.constant 0 : i32
    return %c0_i32, %c0_i32_0 : i32, i32
  }
}

module attributes {stable_mosaic.version = 11 : i64} {
  func.func @scale_shift_lrelu_kernel(%arg0: i32, %arg1: memref<32x128xf32, #tpu.memory_space<vmem>>, %arg2: memref<1x128xf32, #tpu.memory_space<vmem>>, %arg3: memref<1x128xf32, #tpu.memory_space<vmem>>, %arg4: memref<32x128xf32, #tpu.memory_space<vmem>>) attributes {dimension_semantics = [#tpu.dimension_semantics<parallel>], iteration_bounds = array<i64: 1>, scalar_prefetch = 0 : i64, scratch_operands = 0 : i64, tpu.core_type = #tpu.core_type<tc>, window_params = [{transform_indices = @transform_0, window_bounds = array<i64: 32, 128>}, {pipeline_mode = #tpu.pipeline_mode<synchronous>, transform_indices = @transform_1, window_bounds = array<i64: 1, 128>}, {pipeline_mode = #tpu.pipeline_mode<synchronous>, transform_indices = @transform_2, window_bounds = array<i64: 1, 128>}, {transform_indices = @transform_3, window_bounds = array<i64: 32, 128>}]} {
    %c0 = arith.constant 0 : index
    %c0_0 = arith.constant 0 : index
    %0 = vector.load %arg1[%c0, %c0_0] : memref<32x128xf32, #tpu.memory_space<vmem>>, vector<32x128xf32>
    %c0_1 = arith.constant 0 : index
    %c0_2 = arith.constant 0 : index
    %1 = vector.load %arg2[%c0_1, %c0_2] : memref<1x128xf32, #tpu.memory_space<vmem>>, vector<1x128xf32>
    %2 = vector.broadcast %1 : vector<1x128xf32> to vector<32x128xf32>
    %3 = arith.mulf %0, %2 : vector<32x128xf32>
    %c0_3 = arith.constant 0 : index
    %c0_4 = arith.constant 0 : index
    %4 = vector.load %arg3[%c0_3, %c0_4] : memref<1x128xf32, #tpu.memory_space<vmem>>, vector<1x128xf32>
    %5 = vector.broadcast %4 : vector<1x128xf32> to vector<32x128xf32>
    %6 = arith.addf %3, %5 : vector<32x128xf32>
    %cst = arith.constant 0.000000e+00 : f32
    %7 = vector.broadcast %cst : f32 to vector<32x128xf32>
    %8 = arith.cmpf ogt, %6, %7 : vector<32x128xf32>
    %cst_5 = arith.constant 2.000000e-01 : f32
    %9 = vector.broadcast %cst_5 : f32 to vector<32x128xf32>
    %10 = arith.mulf %9, %6 : vector<32x128xf32>
    %11 = arith.select %8, %6, %10 : vector<32x128xi1>, vector<32x128xf32>
    %c0_6 = arith.constant 0 : index
    %c0_7 = arith.constant 0 : index
    %12 = vector.load %arg4[%c0_6, %c0_7] : memref<32x128xf32, #tpu.memory_space<vmem>>, vector<32x128xf32>
    tpu.vector_store %arg4[%c0_6, %c0_7], %11 {strides = array<i32>} : memref<32x128xf32, #tpu.memory_space<vmem>>, vector<32x128xf32>,
    return
  }
  func.func @transform_0(%arg0: i32) -> (i32, i32) {
    %c0_i32 = arith.constant 0 : i32
    %c0_i32_0 = arith.constant 0 : i32
    return %arg0, %c0_i32 : i32, i32
  }
  func.func @transform_1(%arg0: i32) -> (i32, i32) {
    %c0_i32 = arith.constant 0 : i32
    %c0_i32_0 = arith.constant 0 : i32
    %c0_i32_1 = arith.constant 0 : i32
    return %c0_i32, %c0_i32_0 : i32, i32
  }
  func.func @transform_2(%arg0: i32) -> (i32, i32) {
    %c0_i32 = arith.constant 0 : i32
    %c0_i32_0 = arith.constant 0 : i32
    %c0_i32_1 = arith.constant 0 : i32
    return %c0_i32, %c0_i32_0 : i32, i32
  }
  func.func @transform_3(%arg0: i32) -> (i32, i32) {
    %c0_i32 = arith.constant 0 : i32
    %c0_i32_0 = arith.constant 0 : i32
    return %arg0, %c0_i32 : i32, i32
  }
}

module attributes {stable_mosaic.version = 11 : i64} {
  func.func @matmul_stats_kernel(%arg0: i32, %arg1: memref<32x512xbf16, #tpu.memory_space<vmem>>, %arg2: memref<512x64xbf16, #tpu.memory_space<vmem>>, %arg3: memref<32x64xf32, #tpu.memory_space<vmem>>, %arg4: memref<1x64xf32, #tpu.memory_space<vmem>>, %arg5: memref<1x64xf32, #tpu.memory_space<vmem>>) attributes {dimension_semantics = [#tpu.dimension_semantics<arbitrary>], iteration_bounds = array<i64: 1>, scalar_prefetch = 0 : i64, scratch_operands = 0 : i64, tpu.core_type = #tpu.core_type<tc>, window_params = [{transform_indices = @transform_0, window_bounds = array<i64: 32, 512>}, {pipeline_mode = #tpu.pipeline_mode<synchronous>, transform_indices = @transform_1, window_bounds = array<i64: 512, 64>}, {transform_indices = @transform_2, window_bounds = array<i64: 32, 64>}, {pipeline_mode = #tpu.pipeline_mode<synchronous>, transform_indices = @transform_3, window_bounds = array<i64: 1, 64>}, {pipeline_mode = #tpu.pipeline_mode<synchronous>, transform_indices = @transform_4, window_bounds = array<i64: 1, 64>}]} {
    %c0_i32 = arith.constant 0 : i32
    %0 = arith.cmpi eq, %arg0, %c0_i32 : i32
    %1 = arith.extui %0 : i1 to i32
    %c0_i32_0 = arith.constant 0 : i32
    %2 = arith.cmpi ne, %1, %c0_i32_0 : i32
    scf.if %2 {
      %cst_16 = arith.constant 0.000000e+00 : f32
      %18 = vector.broadcast %cst_16 : f32 to vector<1x64xf32>
      %c0_17 = arith.constant 0 : index
      %c0_18 = arith.constant 0 : index
      %19 = vector.load %arg4[%c0_17, %c0_18] : memref<1x64xf32, #tpu.memory_space<vmem>>, vector<1x64xf32>
      tpu.vector_store %arg4[%c0_17, %c0_18], %18 {strides = array<i32>} : memref<1x64xf32, #tpu.memory_space<vmem>>, vector<1x64xf32>,
      %cst_19 = arith.constant 0.000000e+00 : f32
      %20 = vector.broadcast %cst_19 : f32 to vector<1x64xf32>
      %c0_20 = arith.constant 0 : index
      %c0_21 = arith.constant 0 : index
      %21 = vector.load %arg5[%c0_20, %c0_21] : memref<1x64xf32, #tpu.memory_space<vmem>>, vector<1x64xf32>
      tpu.vector_store %arg5[%c0_20, %c0_21], %20 {strides = array<i32>} : memref<1x64xf32, #tpu.memory_space<vmem>>, vector<1x64xf32>,
    } else {
    }
    %c0 = arith.constant 0 : index
    %c0_1 = arith.constant 0 : index
    %3 = vector.load %arg1[%c0, %c0_1] : memref<32x512xbf16, #tpu.memory_space<vmem>>, vector<32x512xbf16>
    %c0_2 = arith.constant 0 : index
    %c0_3 = arith.constant 0 : index
    %4 = vector.load %arg2[%c0_2, %c0_3] : memref<512x64xbf16, #tpu.memory_space<vmem>>, vector<512x64xbf16>
    %cst = arith.constant dense<0.000000e+00> : vector<32x64xf32>
    %5 = tpu.matmul %3, %4, %cst {dimension_numbers = #tpu.dot_dimension_numbers<[1], [0], [0], [1], [0, 0, 1, 1], [], []>} : vector<32x512xbf16>, vector<512x64xbf16>, vector<32x64xf32> -> vector<32x64xf32>
    %c0_4 = arith.constant 0 : index
    %c0_5 = arith.constant 0 : index
    %6 = vector.load %arg3[%c0_4, %c0_5] : memref<32x64xf32, #tpu.memory_space<vmem>>, vector<32x64xf32>
    tpu.vector_store %arg3[%c0_4, %c0_5], %5 {strides = array<i32>} : memref<32x64xf32, #tpu.memory_space<vmem>>, vector<32x64xf32>,
    %c0_6 = arith.constant 0 : index
    %c0_7 = arith.constant 0 : index
    %7 = vector.load %arg4[%c0_6, %c0_7] : memref<1x64xf32, #tpu.memory_space<vmem>>, vector<1x64xf32>
    %cst_8 = arith.constant dense<0.000000e+00> : vector<64xf32>
    %8 = vector.multi_reduction <add>, %5, %cst_8 [0] : vector<32x64xf32> to vector<64xf32>
    %9 = vector.shape_cast %8 : vector<64xf32> to vector<1x64xf32>
    %10 = arith.addf %7, %9 : vector<1x64xf32>
    %c0_9 = arith.constant 0 : index
    %c0_10 = arith.constant 0 : index
    %11 = vector.load %arg4[%c0_9, %c0_10] : memref<1x64xf32, #tpu.memory_space<vmem>>, vector<1x64xf32>
    tpu.vector_store %arg4[%c0_9, %c0_10], %10 {strides = array<i32>} : memref<1x64xf32, #tpu.memory_space<vmem>>, vector<1x64xf32>,
    %c0_11 = arith.constant 0 : index
    %c0_12 = arith.constant 0 : index
    %12 = vector.load %arg5[%c0_11, %c0_12] : memref<1x64xf32, #tpu.memory_space<vmem>>, vector<1x64xf32>
    %13 = arith.mulf %5, %5 : vector<32x64xf32>
    %cst_13 = arith.constant dense<0.000000e+00> : vector<64xf32>
    %14 = vector.multi_reduction <add>, %13, %cst_13 [0] : vector<32x64xf32> to vector<64xf32>
    %15 = vector.shape_cast %14 : vector<64xf32> to vector<1x64xf32>
    %16 = arith.addf %12, %15 : vector<1x64xf32>
    %c0_14 = arith.constant 0 : index
    %c0_15 = arith.constant 0 : index
    %17 = vector.load %arg5[%c0_14, %c0_15] : memref<1x64xf32, #tpu.memory_space<vmem>>, vector<1x64xf32>
    tpu.vector_store %arg5[%c0_14, %c0_15], %16 {strides = array<i32>} : memref<1x64xf32, #tpu.memory_space<vmem>>, vector<1x64xf32>,
    return
  }
  func.func @transform_0(%arg0: i32) -> (i32, i32) {
    %c0_i32 = arith.constant 0 : i32
    %c0_i32_0 = arith.constant 0 : i32
    return %arg0, %c0_i32 : i32, i32
  }
  func.func @transform_1(%arg0: i32) -> (i32, i32) {
    %c0_i32 = arith.constant 0 : i32
    %c0_i32_0 = arith.constant 0 : i32
    %c0_i32_1 = arith.constant 0 : i32
    return %c0_i32, %c0_i32_0 : i32, i32
  }
  func.func @transform_2(%arg0: i32) -> (i32, i32) {
    %c0_i32 = arith.constant 0 : i32
    %c0_i32_0 = arith.constant 0 : i32
    return %arg0, %c0_i32 : i32, i32
  }
  func.func @transform_3(%arg0: i32) -> (i32, i32) {
    %c0_i32 = arith.constant 0 : i32
    %c0_i32_0 = arith.constant 0 : i32
    %c0_i32_1 = arith.constant 0 : i32
    return %c0_i32, %c0_i32_0 : i32, i32
  }
  func.func @transform_4(%arg0: i32) -> (i32, i32) {
    %c0_i32 = arith.constant 0 : i32
    %c0_i32_0 = arith.constant 0 : i32
    %c0_i32_1 = arith.constant 0 : i32
    return %c0_i32, %c0_i32_0 : i32, i32
  }
}

module attributes {stable_mosaic.version = 11 : i64} {
  func.func @scale_shift_lrelu_kernel(%arg0: i32, %arg1: memref<16x128xf32, #tpu.memory_space<vmem>>, %arg2: memref<1x128xf32, #tpu.memory_space<vmem>>, %arg3: memref<1x128xf32, #tpu.memory_space<vmem>>, %arg4: memref<16x128xf32, #tpu.memory_space<vmem>>) attributes {dimension_semantics = [#tpu.dimension_semantics<parallel>], iteration_bounds = array<i64: 1>, scalar_prefetch = 0 : i64, scratch_operands = 0 : i64, tpu.core_type = #tpu.core_type<tc>, window_params = [{transform_indices = @transform_0, window_bounds = array<i64: 16, 128>}, {pipeline_mode = #tpu.pipeline_mode<synchronous>, transform_indices = @transform_1, window_bounds = array<i64: 1, 128>}, {pipeline_mode = #tpu.pipeline_mode<synchronous>, transform_indices = @transform_2, window_bounds = array<i64: 1, 128>}, {transform_indices = @transform_3, window_bounds = array<i64: 16, 128>}]} {
    %c0 = arith.constant 0 : index
    %c0_0 = arith.constant 0 : index
    %0 = vector.load %arg1[%c0, %c0_0] : memref<16x128xf32, #tpu.memory_space<vmem>>, vector<16x128xf32>
    %c0_1 = arith.constant 0 : index
    %c0_2 = arith.constant 0 : index
    %1 = vector.load %arg2[%c0_1, %c0_2] : memref<1x128xf32, #tpu.memory_space<vmem>>, vector<1x128xf32>
    %2 = vector.broadcast %1 : vector<1x128xf32> to vector<16x128xf32>
    %3 = arith.mulf %0, %2 : vector<16x128xf32>
    %c0_3 = arith.constant 0 : index
    %c0_4 = arith.constant 0 : index
    %4 = vector.load %arg3[%c0_3, %c0_4] : memref<1x128xf32, #tpu.memory_space<vmem>>, vector<1x128xf32>
    %5 = vector.broadcast %4 : vector<1x128xf32> to vector<16x128xf32>
    %6 = arith.addf %3, %5 : vector<16x128xf32>
    %cst = arith.constant 0.000000e+00 : f32
    %7 = vector.broadcast %cst : f32 to vector<16x128xf32>
    %8 = arith.cmpf ogt, %6, %7 : vector<16x128xf32>
    %cst_5 = arith.constant 2.000000e-01 : f32
    %9 = vector.broadcast %cst_5 : f32 to vector<16x128xf32>
    %10 = arith.mulf %9, %6 : vector<16x128xf32>
    %11 = arith.select %8, %6, %10 : vector<16x128xi1>, vector<16x128xf32>
    %c0_6 = arith.constant 0 : index
    %c0_7 = arith.constant 0 : index
    %12 = vector.load %arg4[%c0_6, %c0_7] : memref<16x128xf32, #tpu.memory_space<vmem>>, vector<16x128xf32>
    tpu.vector_store %arg4[%c0_6, %c0_7], %11 {strides = array<i32>} : memref<16x128xf32, #tpu.memory_space<vmem>>, vector<16x128xf32>,
    return
  }
  func.func @transform_0(%arg0: i32) -> (i32, i32) {
    %c0_i32 = arith.constant 0 : i32
    %c0_i32_0 = arith.constant 0 : i32
    return %arg0, %c0_i32 : i32, i32
  }
  func.func @transform_1(%arg0: i32) -> (i32, i32) {
    %c0_i32 = arith.constant 0 : i32
    %c0_i32_0 = arith.constant 0 : i32
    %c0_i32_1 = arith.constant 0 : i32
    return %c0_i32, %c0_i32_0 : i32, i32
  }
  func.func @transform_2(%arg0: i32) -> (i32, i32) {
    %c0_i32 = arith.constant 0 : i32
    %c0_i32_0 = arith.constant 0 : i32
    %c0_i32_1 = arith.constant 0 : i32
    return %c0_i32, %c0_i32_0 : i32, i32
  }
  func.func @transform_3(%arg0: i32) -> (i32, i32) {
    %c0_i32 = arith.constant 0 : i32
    %c0_i32_0 = arith.constant 0 : i32
    return %arg0, %c0_i32 : i32, i32
  }
}

module attributes {stable_mosaic.version = 11 : i64} {
  func.func @rowdot_bias_kernel(%arg0: memref<2x1024xf32, #tpu.memory_space<vmem>>, %arg1: memref<1x1024xf32, #tpu.memory_space<vmem>>, %arg2: memref<1x1xf32, #tpu.memory_space<vmem>>, %arg3: memref<2x1xf32, #tpu.memory_space<vmem>>) attributes {dimension_semantics = [], scalar_prefetch = 0 : i64, scratch_operands = 0 : i64, tpu.core_type = #tpu.core_type<tc>} {
    %c0 = arith.constant 0 : index
    %c0_0 = arith.constant 0 : index
    %0 = vector.load %arg0[%c0, %c0_0] : memref<2x1024xf32, #tpu.memory_space<vmem>>, vector<2x1024xf32>
    %c0_1 = arith.constant 0 : index
    %c0_2 = arith.constant 0 : index
    %1 = vector.load %arg1[%c0_1, %c0_2] : memref<1x1024xf32, #tpu.memory_space<vmem>>, vector<1x1024xf32>
    %2 = vector.broadcast %1 : vector<1x1024xf32> to vector<2x1024xf32>
    %3 = arith.mulf %0, %2 : vector<2x1024xf32>
    %cst = arith.constant dense<0.000000e+00> : vector<2xf32>
    %4 = vector.multi_reduction <add>, %3, %cst [1] : vector<2x1024xf32> to vector<2xf32>
    %5 = vector.shape_cast %4 : vector<2xf32> to vector<2x1xf32>
    %c0_3 = arith.constant 0 : index
    %c0_4 = arith.constant 0 : index
    %6 = vector.load %arg2[%c0_3, %c0_4] : memref<1x1xf32, #tpu.memory_space<vmem>>, vector<1x1xf32>
    %7 = vector.broadcast %6 : vector<1x1xf32> to vector<2x1xf32>
    %8 = arith.addf %5, %7 : vector<2x1xf32>
    %c0_5 = arith.constant 0 : index
    %c0_6 = arith.constant 0 : index
    %9 = vector.load %arg3[%c0_5, %c0_6] : memref<2x1xf32, #tpu.memory_space<vmem>>, vector<2x1xf32>
    tpu.vector_store %arg3[%c0_5, %c0_6], %8 {strides = array<i32>} : memref<2x1xf32, #tpu.memory_space<vmem>>, vector<2x1xf32>,
    return
  }
}

</mosaic_0001>

<bundles_post_ra>
// kernel: discriminator_forward.8
= control target key start
LH: loop header
LB: loop body
LE: loop exit
PB: predicated region body
PF: predicated region fallthrough
CT: control target
= control target key end

     0   :  { %s1270_s12 = smov 0   ;;  %s1565_s0 = inlined_call_operand.vmem [shape: bf16[2048,48], index: 0, kind: input, shape index: {}]   ;;  %s1566_s1 = inlined_call_operand.vmem [shape: bf16[48,8], index: 1, kind: input, shape index: {}]   ;;  %s1567_s2 = inlined_call_operand.vmem [shape: f32[1,8], index: 2, kind: input, shape index: {}]   ;;  %s1568_s3 = inlined_call_operand.vmem [shape: f32[2048,8], index: 3, kind: output, shape index: {}]  }
   0x1 LB: > { %s1006_s13 = sadd.s32 4294967295, %s1248_s12   ;;  %p1010_p0 = scmp.ge.s32.totalorder %s1248_s12, 1  ;;  %s1248_s12 = sphi %s1270_s12, %s13_s12  }
   0x2   : > { %p138_p1 = scmp.lt.s32.totalorder %s1248_s12, 5 }
   0x4   : > { %p139_p2 = pnand %p1010_p0, %p138_p1 }
   0x5   : > { %s1011_s16 = sshll.u32 (!%p139_p2), %s1006_s13, 6 }
   0x6   : > { %142 = sbr.rel (%p139_p2) target bundleno = 283 (0x11b), region = 32  ;;  %p163_p3 = scmp.lt.s32.totalorder (!%p139_p2), %s1011_s16, 255 }
   0xb   : > { %v1223_v0 = vld [vmem:[%s1566_s1 + $0x10] sm:$0xff]  ;;  %v1222_v1 = vld [vmem:[%s1566_s1 + $0x8] sm:$0xff]  ;;  %s1570_s16 = smov (!%p163_p3, %s1011_s16), 255  ;;  %v1221_v2 = vld [vmem:[%s1566_s1] sm:$0xff]  ;;  %vm427_vm0 = vcmask 392192   ;;  %vm885_vm1 = vcmask 64512  }
   0xc   : > { %529 = vmatpush.bf16.msra.mxu0 %v1223_v0  ;;  %1224 = vmatpush.bf16.msra.mxu1 %v1223_v0  ;;  %s1012_s19 = sshll.u32 %s1570_s16, 2  ;;  %v1362_v35 = vld [vmem:[%s1567_s2] ss:$0 sm:$0xff]  ;;  %s1014_s27 = sshll.u32 %s1570_s16, 3 }
   0xd   : > { %1225 = vmatpush.bf16.msra.mxu2 %v1223_v0  ;;  %1226 = vmatpush.bf16.msra.mxu3 %v1223_v0  ;;  %s1293_s24 = scalar_lea.vmem %s1565_s0, %s1012_s19  ;;  %s1370_s30 = scalar_lea.vmem %s1568_s3, %s1014_s27 }
   0xe   : > { %v1189_v3 = vld [vmem:[%s1293_s24] sm:$0xff]  ;;  %v1190_v7 = vld [vmem:[%s1293_s24 + $0x8] sm:$0xff]  ;;  %v1191_v11 = vld [vmem:[%s1293_s24 + $0x10] sm:$0xff] }
   0xf   : > { %v1197_v4 = vld [vmem:[%s1293_s24 + $0x40] sm:$0xff]  ;;  %v1198_v8 = vld [vmem:[%s1293_s24 + $0x48] sm:$0xff]  ;;  %v1199_v12 = vld [vmem:[%s1293_s24 + $0x50] sm:$0xff] }
  0x10   : > { %530 = vmatpush.bf16.msra.mxu0 %v1222_v1  ;;  %1227 = vmatpush.bf16.msra.mxu1 %v1222_v1  ;;  %v1205_v5 = vld [vmem:[%s1293_s24 + $0x80] sm:$0xff]  ;;  %v1206_v9 = vld [vmem:[%s1293_s24 + $0x88] sm:$0xff]  ;;  %v1207_v13 = vld [vmem:[%s1293_s24 + $0x90] sm:$0xff] }
  0x11   : > { %1228 = vmatpush.bf16.msra.mxu2 %v1222_v1  ;;  %1229 = vmatpush.bf16.msra.mxu3 %v1222_v1  ;;  %v1213_v6 = vld [vmem:[%s1293_s24 + $0xc0] sm:$0xff]  ;;  %v1214_v10 = vld [vmem:[%s1293_s24 + $0xc8] sm:$0xff]  ;;  %v1215_v14 = vld [vmem:[%s1293_s24 + $0xd0] sm:$0xff] }
  0x12   : > { %v1192_v15 = vld [vmem:[%s1293_s24 + $0x18] sm:$0xff]  ;;  %v1193_v19 = vld [vmem:[%s1293_s24 + $0x20] sm:$0xff]  ;;  %v1194_v23 = vld [vmem:[%s1293_s24 + $0x28] sm:$0xff] }
  0x13   : > { %v1200_v16 = vld [vmem:[%s1293_s24 + $0x58] sm:$0xff]  ;;  %v1201_v20 = vld [vmem:[%s1293_s24 + $0x60] sm:$0xff]  ;;  %v1202_v24 = vld [vmem:[%s1293_s24 + $0x68] sm:$0xff] }
  0x14   : > { %531 = vmatpush.bf16.msra.mxu0 %v1221_v2  ;;  %1230 = vmatpush.bf16.msra.mxu1 %v1221_v2  ;;  %v1208_v17 = vld [vmem:[%s1293_s24 + $0x98] sm:$0xff]  ;;  %v1209_v21 = vld [vmem:[%s1293_s24 + $0xa0] sm:$0xff]  ;;  %v1210_v25 = vld [vmem:[%s1293_s24 + $0xa8] sm:$0xff] }
  0x15   : > { %1231 = vmatpush.bf16.msra.mxu2 %v1221_v2  ;;  %1232 = vmatpush.bf16.msra.mxu3 %v1221_v2  ;;  %v1216_v18 = vld [vmem:[%s1293_s24 + $0xd8] sm:$0xff]  ;;  %v1217_v22 = vld [vmem:[%s1293_s24 + $0xe0] sm:$0xff]  ;;  %v1218_v26 = vld [vmem:[%s1293_s24 + $0xe8] sm:$0xff] }
  0x16   : > { %v1195_v27 = vld [vmem:[%s1293_s24 + $0x30] sm:$0xff]  ;;  %v1196_v31 = vld [vmem:[%s1293_s24 + $0x38] sm:$0xff] }
  0x17   : > { %1155 = vmatmul.msk.bf16.vlgmr.msra.gmra.mxu0 %vm427_vm0, %v1189_v3  ;;  %1163 = vmatmul.msk.bf16.vlgmr.msra.gmra.mxu1 %vm427_vm0, %v1197_v4  ;;  %v1203_v28 = vld [vmem:[%s1293_s24 + $0x70] sm:$0xff]  ;;  %v1204_v32 = vld [vmem:[%s1293_s24 + $0x78] sm:$0xff] }
  0x18   : > { %1171 = vmatmul.msk.bf16.vlgmr.msra.gmra.mxu2 %vm427_vm0, %v1205_v5  ;;  %1179 = vmatmul.msk.bf16.vlgmr.msra.gmra.mxu3 %vm427_vm0, %v1213_v6  ;;  %v1211_v29 = vld [vmem:[%s1293_s24 + $0xb0] sm:$0xff]  ;;  %v1212_v33 = vld [vmem:[%s1293_s24 + $0xb8] sm:$0xff] }
  0x19   : > { %v1219_v30 = vld [vmem:[%s1293_s24 + $0xf0] sm:$0xff]  ;;  %v1220_v34 = vld [vmem:[%s1293_s24 + $0xf8] sm:$0xff] }
  0x27   : > { %1156 = vmatmul.msk.bf16.gmra.mxu0 %vm427_vm0, %v1190_v7  ;;  %1164 = vmatmul.msk.bf16.gmra.mxu1 %vm427_vm0, %v1198_v8 }
  0x28   : > { %1172 = vmatmul.msk.bf16.gmra.mxu2 %vm427_vm0, %v1206_v9  ;;  %1180 = vmatmul.msk.bf16.gmra.mxu3 %vm427_vm0, %v1214_v10 }
  0x37   : > { %1157 = vmatmul.msk.bf16.gmra.mxu0 %vm427_vm0, %v1191_v11  ;;  %1165 = vmatmul.msk.bf16.gmra.mxu1 %vm427_vm0, %v1199_v12 }
  0x38   : > { %1173 = vmatmul.msk.bf16.gmra.mxu2 %vm427_vm0, %v1207_v13  ;;  %1181 = vmatmul.msk.bf16.gmra.mxu3 %vm427_vm0, %v1215_v14 }
  0x47   : > { %1158 = vmatmul.msk.bf16.gmra.mxu0 %vm427_vm0, %v1192_v15  ;;  %1166 = vmatmul.msk.bf16.gmra.mxu1 %vm427_vm0, %v1200_v16 }
  0x48   : > { %1174 = vmatmul.msk.bf16.gmra.mxu2 %vm427_vm0, %v1208_v17  ;;  %1182 = vmatmul.msk.bf16.gmra.mxu3 %vm427_vm0, %v1216_v18 }
  0x57   : > { %1159 = vmatmul.msk.bf16.gmra.mxu0 %vm427_vm0, %v1193_v19  ;;  %1167 = vmatmul.msk.bf16.gmra.mxu1 %vm427_vm0, %v1201_v20 }
  0x58   : > { %1175 = vmatmul.msk.bf16.gmra.mxu2 %vm427_vm0, %v1209_v21  ;;  %1183 = vmatmul.msk.bf16.gmra.mxu3 %vm427_vm0, %v1217_v22 }
  0x67   : > { %1160 = vmatmul.msk.bf16.gmra.mxu0 %vm427_vm0, %v1194_v23  ;;  %1168 = vmatmul.msk.bf16.gmra.mxu1 %vm427_vm0, %v1202_v24 }
  0x68   : > { %1176 = vmatmul.msk.bf16.gmra.mxu2 %vm427_vm0, %v1210_v25  ;;  %1184 = vmatmul.msk.bf16.gmra.mxu3 %vm427_vm0, %v1218_v26 }
  0x77   : > { %1161 = vmatmul.msk.bf16.gmra.mxu0 %vm427_vm0, %v1195_v27  ;;  %1169 = vmatmul.msk.bf16.gmra.mxu1 %vm427_vm0, %v1203_v28 }
  0x78   : > { %1177 = vmatmul.msk.bf16.gmra.mxu2 %vm427_vm0, %v1211_v29  ;;  %1185 = vmatmul.msk.bf16.gmra.mxu3 %vm427_vm0, %v1219_v30 }
  0x87   : > { %1162 = vmatmul.msk.bf16.gmra.mxu0 %vm427_vm0, %v1196_v31  ;;  %1170 = vmatmul.msk.bf16.gmra.mxu1 %vm427_vm0, %v1204_v32 }
  0x88   : > { %1178 = vmatmul.msk.bf16.gmra.mxu2 %vm427_vm0, %v1212_v33  ;;  %1186 = vmatmul.msk.bf16.gmra.mxu3 %vm427_vm0, %v1220_v34 }
  0x94   : > { %v533_v36 = vpop.f32.mrf.mxu0  ;;  %v573_v37 = vpop.f32.mrf.mxu1 }
  0x95   : > { %v534_v38 = vadd.f32 %v1362_v35, %v533_v36  ;;  %v574_v39 = vadd.f32 %v1362_v35, %v573_v37 }
  0x97   : > { %vm693_vm2 = vcmp.gt.f32.partialorder %v534_v38, 0.0  ;;  %v757_v40 = vmul.f32 0.2, %v534_v38  ;;  %vm709_vm3 = vcmp.gt.f32.partialorder %v574_v39, 0.0  ;;  %v773_v41 = vmul.f32 0.2, %v574_v39 }
  0x99   : > { %v821_v42 = vsel %vm693_vm2, %v534_v38, %v757_v40  ;;  %v837_v43 = vsel %vm709_vm3, %v574_v39, %v773_v41 }
  0x9a   : > { %886 = vst.msk [vmem:[%s1370_s30] sm:$0xff] %vm885_vm1, %v821_v42 }
  0x9b   : > { %902 = vst.msk [vmem:[%s1370_s30 + $0x80] sm:$0xff] %vm885_vm1, %v837_v43  ;;  %v613_v44 = vpop.f32.mrf.mxu2  ;;  %v653_v45 = vpop.f32.mrf.mxu3 }
  0x9c   : > { %v614_v46 = vadd.f32 %v1362_v35, %v613_v44  ;;  %v654_v47 = vadd.f32 %v1362_v35, %v653_v45  ;;  %v535_v48 = vpop.f32.mrf.mxu0  ;;  %v575_v49 = vpop.f32.mrf.mxu1 }
  0x9d   : > { %v536_v50 = vadd.f32 %v1362_v35, %v535_v48  ;;  %v576_v51 = vadd.f32 %v1362_v35, %v575_v49 }
  0x9e   : > { %vm725_vm4 = vcmp.gt.f32.partialorder %v614_v46, 0.0  ;;  %v789_v52 = vmul.f32 0.2, %v614_v46  ;;  %vm741_vm5 = vcmp.gt.f32.partialorder %v654_v47, 0.0  ;;  %v805_v53 = vmul.f32 0.2, %v654_v47 }
  0x9f   : > { %vm694_vm6 = vcmp.gt.f32.partialorder %v536_v50, 0.0  ;;  %v758_v54 = vmul.f32 0.2, %v536_v50  ;;  %vm710_vm7 = vcmp.gt.f32.partialorder %v576_v51, 0.0  ;;  %v774_v55 = vmul.f32 0.2, %v576_v51 }
  0xa0   : > { %v853_v56 = vsel %vm725_vm4, %v614_v46, %v789_v52  ;;  %v869_v57 = vsel %vm741_vm5, %v654_v47, %v805_v53 }
  0xa1   : > { %918 = vst.msk [vmem:[%s1370_s30 + $0x100] sm:$0xff] %vm885_vm1, %v853_v56  ;;  %v822_v58 = vsel %vm694_vm6, %v536_v50, %v758_v54  ;;  %v838_v59 = vsel %vm710_vm7, %v576_v51, %v774_v55 }
  0xa2   : > { %934 = vst.msk [vmem:[%s1370_s30 + $0x180] sm:$0xff] %vm885_vm1, %v869_v57 }
  0xa3   : > { %887 = vst.msk [vmem:[%s1370_s30 + $0x8] sm:$0xff] %vm885_vm1, %v822_v58  ;;  %v615_v60 = vpop.f32.mrf.mxu2  ;;  %v655_v61 = vpop.f32.mrf.mxu3 }
  0xa4   : > { %903 = vst.msk [vmem:[%s1370_s30 + $0x88] sm:$0xff] %vm885_vm1, %v838_v59  ;;  %v616_v62 = vadd.f32 %v1362_v35, %v615_v60  ;;  %v656_v63 = vadd.f32 %v1362_v35, %v655_v61  ;;  %v538_v0 = vpop.f32.mrf.mxu0  ;;  %v578_v1 = vpop.f32.mrf.mxu1 }
  0xa5   : > { %v539_v2 = vadd.f32 %v1362_v35, %v538_v0  ;;  %v579_v3 = vadd.f32 %v1362_v35, %v578_v1 }
  0xa6   : > { %vm726_vm8 = vcmp.gt.f32.partialorder %v616_v62, 0.0  ;;  %v790_v4 = vmul.f32 0.2, %v616_v62  ;;  %vm742_vm9 = vcmp.gt.f32.partialorder %v656_v63, 0.0  ;;  %v806_v5 = vmul.f32 0.2, %v656_v63 }
  0xa7   : > { %vm695_vm10 = vcmp.gt.f32.partialorder %v539_v2, 0.0  ;;  %v759_v6 = vmul.f32 0.2, %v539_v2  ;;  %vm711_vm11 = vcmp.gt.f32.partialorder %v579_v3, 0.0  ;;  %v775_v7 = vmul.f32 0.2, %v579_v3 }
  0xa8   : > { %v854_v8 = vsel %vm726_vm8, %v616_v62, %v790_v4  ;;  %v870_v9 = vsel %vm742_vm9, %v656_v63, %v806_v5 }
  0xa9   : > { %919 = vst.msk [vmem:[%s1370_s30 + $0x108] sm:$0xff] %vm885_vm1, %v854_v8  ;;  %v823_v10 = vsel %vm695_vm10, %v539_v2, %v759_v6  ;;  %v839_v11 = vsel %vm711_vm11, %v579_v3, %v775_v7 }
  0xaa   : > { %935 = vst.msk [vmem:[%s1370_s30 + $0x188] sm:$0xff] %vm885_vm1, %v870_v9 }
  0xab   : > { %888 = vst.msk [vmem:[%s1370_s30 + $0x10] sm:$0xff] %vm885_vm1, %v823_v10  ;;  %v618_v12 = vpop.f32.mrf.mxu2  ;;  %v658_v13 = vpop.f32.mrf.mxu3 }
  0xac   : > { %904 = vst.msk [vmem:[%s1370_s30 + $0x90] sm:$0xff] %vm885_vm1, %v839_v11  ;;  %v619_v14 = vadd.f32 %v1362_v35, %v618_v12  ;;  %v659_v15 = vadd.f32 %v1362_v35, %v658_v13  ;;  %v540_v16 = vpop.f32.mrf.mxu0  ;;  %v580_v17 = vpop.f32.mrf.mxu1 }
  0xad   : > { %v541_v18 = vadd.f32 %v1362_v35, %v540_v16  ;;  %v581_v19 = vadd.f32 %v1362_v35, %v580_v17 }
  0xae   : > { %vm727_vm12 = vcmp.gt.f32.partialorder %v619_v14, 0.0  ;;  %v791_v20 = vmul.f32 0.2, %v619_v14  ;;  %vm743_vm13 = vcmp.gt.f32.partialorder %v659_v15, 0.0  ;;  %v807_v21 = vmul.f32 0.2, %v659_v15 }
  0xaf   : > { %vm696_vm14 = vcmp.gt.f32.partialorder %v541_v18, 0.0  ;;  %v760_v22 = vmul.f32 0.2, %v541_v18  ;;  %vm712_vm15 = vcmp.gt.f32.partialorder %v581_v19, 0.0  ;;  %v776_v23 = vmul.f32 0.2, %v581_v19 }
  0xb0   : > { %v855_v24 = vsel %vm727_vm12, %v619_v14, %v791_v20  ;;  %v871_v25 = vsel %vm743_vm13, %v659_v15, %v807_v21 }
  0xb1   : > { %920 = vst.msk [vmem:[%s1370_s30 + $0x110] sm:$0xff] %vm885_vm1, %v855_v24  ;;  %v824_v26 = vsel %vm696_vm14, %v541_v18, %v760_v22  ;;  %v840_v27 = vsel %vm712_vm15, %v581_v19, %v776_v23 }
  0xb2   : > { %936 = vst.msk [vmem:[%s1370_s30 + $0x190] sm:$0xff] %vm885_vm1, %v871_v25 }
  0xb3   : > { %889 = vst.msk [vmem:[%s1370_s30 + $0x18] sm:$0xff] %vm885_vm1, %v824_v26  ;;  %v620_v28 = vpop.f32.mrf.mxu2  ;;  %v660_v29 = vpop.f32.mrf.mxu3 }
  0xb4   : > { %905 = vst.msk [vmem:[%s1370_s30 + $0x98] sm:$0xff] %vm885_vm1, %v840_v27  ;;  %v621_v30 = vadd.f32 %v1362_v35, %v620_v28  ;;  %v661_v31 = vadd.f32 %v1362_v35, %v660_v29  ;;  %v543_v32 = vpop.f32.mrf.mxu0  ;;  %v583_v33 = vpop.f32.mrf.mxu1 }
  0xb5   : > { %v544_v34 = vadd.f32 %v1362_v35, %v543_v32  ;;  %v584_v36 = vadd.f32 %v1362_v35, %v583_v33 }
  0xb6   : > { %vm728_vm0 = vcmp.gt.f32.partialorder %v621_v30, 0.0  ;;  %v792_v37 = vmul.f32 0.2, %v621_v30  ;;  %vm744_vm2 = vcmp.gt.f32.partialorder %v661_v31, 0.0  ;;  %v808_v38 = vmul.f32 0.2, %v661_v31 }
  0xb7   : > { %vm697_vm3 = vcmp.gt.f32.partialorder %v544_v34, 0.0  ;;  %v761_v39 = vmul.f32 0.2, %v544_v34  ;;  %vm713_vm4 = vcmp.gt.f32.partialorder %v584_v36, 0.0  ;;  %v777_v40 = vmul.f32 0.2, %v584_v36 }
  0xb8   : > { %v856_v41 = vsel %vm728_vm0, %v621_v30, %v792_v37  ;;  %v872_v42 = vsel %vm744_vm2, %v661_v31, %v808_v38 }
  0xb9   : > { %921 = vst.msk [vmem:[%s1370_s30 + $0x118] sm:$0xff] %vm885_vm1, %v856_v41  ;;  %v825_v43 = vsel %vm697_vm3, %v544_v34, %v761_v39  ;;  %v841_v44 = vsel %vm713_vm4, %v584_v36, %v777_v40 }
  0xba   : > { %937 = vst.msk [vmem:[%s1370_s30 + $0x198] sm:$0xff] %vm885_vm1, %v872_v42 }
  0xbb   : > { %890 = vst.msk [vmem:[%s1370_s30 + $0x20] sm:$0xff] %vm885_vm1, %v825_v43  ;;  %v623_v45 = vpop.f32.mrf.mxu2  ;;  %v663_v46 = vpop.f32.mrf.mxu3 }
  0xbc   : > { %906 = vst.msk [vmem:[%s1370_s30 + $0xa0] sm:$0xff] %vm885_vm1, %v841_v44  ;;  %v624_v47 = vadd.f32 %v1362_v35, %v623_v45  ;;  %v664_v48 = vadd.f32 %v1362_v35, %v663_v46  ;;  %v545_v49 = vpop.f32.mrf.mxu0  ;;  %v585_v50 = vpop.f32.mrf.mxu1 }
  0xbd   : > { %v546_v51 = vadd.f32 %v1362_v35, %v545_v49  ;;  %v586_v52 = vadd.f32 %v1362_v35, %v585_v50 }
  0xbe   : > { %vm729_vm5 = vcmp.gt.f32.partialorder %v624_v47, 0.0  ;;  %v793_v53 = vmul.f32 0.2, %v624_v47  ;;  %vm745_vm6 = vcmp.gt.f32.partialorder %v664_v48, 0.0  ;;  %v809_v54 = vmul.f32 0.2, %v664_v48 }
  0xbf   : > { %vm698_vm7 = vcmp.gt.f32.partialorder %v546_v51, 0.0  ;;  %v762_v55 = vmul.f32 0.2, %v546_v51  ;;  %vm714_vm8 = vcmp.gt.f32.partialorder %v586_v52, 0.0  ;;  %v778_v56 = vmul.f32 0.2, %v586_v52 }
  0xc0   : > { %v857_v57 = vsel %vm729_vm5, %v624_v47, %v793_v53  ;;  %v873_v58 = vsel %vm745_vm6, %v664_v48, %v809_v54 }
  0xc1   : > { %922 = vst.msk [vmem:[%s1370_s30 + $0x120] sm:$0xff] %vm885_vm1, %v857_v57  ;;  %v826_v59 = vsel %vm698_vm7, %v546_v51, %v762_v55  ;;  %v842_v60 = vsel %vm714_vm8, %v586_v52, %v778_v56 }
  0xc2   : > { %938 = vst.msk [vmem:[%s1370_s30 + $0x1a0] sm:$0xff] %vm885_vm1, %v873_v58 }
  0xc3   : > { %891 = vst.msk [vmem:[%s1370_s30 + $0x28] sm:$0xff] %vm885_vm1, %v826_v59  ;;  %v625_v61 = vpop.f32.mrf.mxu2  ;;  %v665_v62 = vpop.f32.mrf.mxu3 }
  0xc4   : > { %907 = vst.msk [vmem:[%s1370_s30 + $0xa8] sm:$0xff] %vm885_vm1, %v842_v60  ;;  %v626_v63 = vadd.f32 %v1362_v35, %v625_v61  ;;  %v666_v0 = vadd.f32 %v1362_v35, %v665_v62  ;;  %v548_v1 = vpop.f32.mrf.mxu0  ;;  %v588_v2 = vpop.f32.mrf.mxu1 }
  0xc5   : > { %v549_v3 = vadd.f32 %v1362_v35, %v548_v1  ;;  %v589_v4 = vadd.f32 %v1362_v35, %v588_v2 }
  0xc6   : > { %vm730_vm9 = vcmp.gt.f32.partialorder %v626_v63, 0.0  ;;  %v794_v5 = vmul.f32 0.2, %v626_v63  ;;  %vm746_vm10 = vcmp.gt.f32.partialorder %v666_v0, 0.0  ;;  %v810_v6 = vmul.f32 0.2, %v666_v0 }
  0xc7   : > { %vm699_vm11 = vcmp.gt.f32.partialorder %v549_v3, 0.0  ;;  %v763_v7 = vmul.f32 0.2, %v549_v3  ;;  %vm715_vm12 = vcmp.gt.f32.partialorder %v589_v4, 0.0  ;;  %v779_v8 = vmul.f32 0.2, %v589_v4 }
  0xc8   : > { %v858_v9 = vsel %vm730_vm9, %v626_v63, %v794_v5  ;;  %v874_v10 = vsel %vm746_vm10, %v666_v0, %v810_v6 }
  0xc9   : > { %923 = vst.msk [vmem:[%s1370_s30 + $0x128] sm:$0xff] %vm885_vm1, %v858_v9  ;;  %v827_v11 = vsel %vm699_vm11, %v549_v3, %v763_v7  ;;  %v843_v12 = vsel %vm715_vm12, %v589_v4, %v779_v8 }
  0xca   : > { %939 = vst.msk [vmem:[%s1370_s30 + $0x1a8] sm:$0xff] %vm885_vm1, %v874_v10 }
  0xcb   : > { %892 = vst.msk [vmem:[%s1370_s30 + $0x30] sm:$0xff] %vm885_vm1, %v827_v11  ;;  %v628_v13 = vpop.f32.mrf.mxu2  ;;  %v668_v14 = vpop.f32.mrf.mxu3 }
  0xcc   : > { %908 = vst.msk [vmem:[%s1370_s30 + $0xb0] sm:$0xff] %vm885_vm1, %v843_v12  ;;  %v629_v15 = vadd.f32 %v1362_v35, %v628_v13  ;;  %v669_v16 = vadd.f32 %v1362_v35, %v668_v14  ;;  %v550_v17 = vpop.f32.mrf.mxu0  ;;  %v590_v18 = vpop.f32.mrf.mxu1 }
  0xcd   : > { %v551_v19 = vadd.f32 %v1362_v35, %v550_v17  ;;  %v591_v20 = vadd.f32 %v1362_v35, %v590_v18 }
  0xce   : > { %vm731_vm13 = vcmp.gt.f32.partialorder %v629_v15, 0.0  ;;  %v795_v21 = vmul.f32 0.2, %v629_v15  ;;  %vm747_vm14 = vcmp.gt.f32.partialorder %v669_v16, 0.0  ;;  %v811_v22 = vmul.f32 0.2, %v669_v16 }
  0xcf   : > { %vm700_vm15 = vcmp.gt.f32.partialorder %v551_v19, 0.0  ;;  %v764_v23 = vmul.f32 0.2, %v551_v19  ;;  %vm716_vm0 = vcmp.gt.f32.partialorder %v591_v20, 0.0  ;;  %v780_v24 = vmul.f32 0.2, %v591_v20 }
  0xd0   : > { %v859_v25 = vsel %vm731_vm13, %v629_v15, %v795_v21  ;;  %v875_v26 = vsel %vm747_vm14, %v669_v16, %v811_v22 }
  0xd1   : > { %924 = vst.msk [vmem:[%s1370_s30 + $0x130] sm:$0xff] %vm885_vm1, %v859_v25  ;;  %v828_v27 = vsel %vm700_vm15, %v551_v19, %v764_v23  ;;  %v844_v28 = vsel %vm716_vm0, %v591_v20, %v780_v24 }
  0xd2   : > { %940 = vst.msk [vmem:[%s1370_s30 + $0x1b0] sm:$0xff] %vm885_vm1, %v875_v26 }
  0xd3   : > { %893 = vst.msk [vmem:[%s1370_s30 + $0x38] sm:$0xff] %vm885_vm1, %v828_v27  ;;  %v630_v29 = vpop.f32.mrf.mxu2  ;;  %v670_v30 = vpop.f32.mrf.mxu3 }
  0xd4   : > { %909 = vst.msk [vmem:[%s1370_s30 + $0xb8] sm:$0xff] %vm885_vm1, %v844_v28  ;;  %v631_v31 = vadd.f32 %v1362_v35, %v630_v29  ;;  %v671_v32 = vadd.f32 %v1362_v35, %v670_v30  ;;  %v553_v33 = vpop.f32.mrf.mxu0  ;;  %v593_v34 = vpop.f32.mrf.mxu1 }
  0xd5   : > { %v554_v36 = vadd.f32 %v1362_v35, %v553_v33  ;;  %v594_v37 = vadd.f32 %v1362_v35, %v593_v34 }
  0xd6   : > { %vm732_vm2 = vcmp.gt.f32.partialorder %v631_v31, 0.0  ;;  %v796_v38 = vmul.f32 0.2, %v631_v31  ;;  %vm748_vm3 = vcmp.gt.f32.partialorder %v671_v32, 0.0  ;;  %v812_v39 = vmul.f32 0.2, %v671_v32 }
  0xd7   : > { %vm701_vm4 = vcmp.gt.f32.partialorder %v554_v36, 0.0  ;;  %v765_v40 = vmul.f32 0.2, %v554_v36  ;;  %vm717_vm5 = vcmp.gt.f32.partialorder %v594_v37, 0.0  ;;  %v781_v41 = vmul.f32 0.2, %v594_v37 }
  0xd8   : > { %v860_v42 = vsel %vm732_vm2, %v631_v31, %v796_v38  ;;  %v876_v43 = vsel %vm748_vm3, %v671_v32, %v812_v39 }
  0xd9   : > { %925 = vst.msk [vmem:[%s1370_s30 + $0x138] sm:$0xff] %vm885_vm1, %v860_v42  ;;  %v829_v44 = vsel %vm701_vm4, %v554_v36, %v765_v40  ;;  %v845_v45 = vsel %vm717_vm5, %v594_v37, %v781_v41 }
  0xda   : > { %941 = vst.msk [vmem:[%s1370_s30 + $0x1b8] sm:$0xff] %vm885_vm1, %v876_v43 }
  0xdb   : > { %894 = vst.msk [vmem:[%s1370_s30 + $0x40] sm:$0xff] %vm885_vm1, %v829_v44  ;;  %v633_v46 = vpop.f32.mrf.mxu2  ;;  %v673_v47 = vpop.f32.mrf.mxu3 }
  0xdc   : > { %910 = vst.msk [vmem:[%s1370_s30 + $0xc0] sm:$0xff] %vm885_vm1, %v845_v45  ;;  %v634_v48 = vadd.f32 %v1362_v35, %v633_v46  ;;  %v674_v49 = vadd.f32 %v1362_v35, %v673_v47  ;;  %v555_v50 = vpop.f32.mrf.mxu0  ;;  %v595_v51 = vpop.f32.mrf.mxu1 }
  0xdd   : > { %v556_v52 = vadd.f32 %v1362_v35, %v555_v50  ;;  %v596_v53 = vadd.f32 %v1362_v35, %v595_v51 }
  0xde   : > { %vm733_vm6 = vcmp.gt.f32.partialorder %v634_v48, 0.0  ;;  %v797_v54 = vmul.f32 0.2, %v634_v48  ;;  %vm749_vm7 = vcmp.gt.f32.partialorder %v674_v49, 0.0  ;;  %v813_v55 = vmul.f32 0.2, %v674_v49 }
  0xdf   : > { %vm702_vm8 = vcmp.gt.f32.partialorder %v556_v52, 0.0  ;;  %v766_v56 = vmul.f32 0.2, %v556_v52  ;;  %vm718_vm9 = vcmp.gt.f32.partialorder %v596_v53, 0.0  ;;  %v782_v57 = vmul.f32 0.2, %v596_v53 }
  0xe0   : > { %v861_v58 = vsel %vm733_vm6, %v634_v48, %v797_v54  ;;  %v877_v59 = vsel %vm749_vm7, %v674_v49, %v813_v55 }
  0xe1   : > { %926 = vst.msk [vmem:[%s1370_s30 + $0x140] sm:$0xff] %vm885_vm1, %v861_v58  ;;  %v830_v60 = vsel %vm702_vm8, %v556_v52, %v766_v56  ;;  %v846_v61 = vsel %vm718_vm9, %v596_v53, %v782_v57 }
  0xe2   : > { %942 = vst.msk [vmem:[%s1370_s30 + $0x1c0] sm:$0xff] %vm885_vm1, %v877_v59 }
  0xe3   : > { %895 = vst.msk [vmem:[%s1370_s30 + $0x48] sm:$0xff] %vm885_vm1, %v830_v60  ;;  %v635_v62 = vpop.f32.mrf.mxu2  ;;  %v675_v63 = vpop.f32.mrf.mxu3 }
  0xe4   : > { %911 = vst.msk [vmem:[%s1370_s30 + $0xc8] sm:$0xff] %vm885_vm1, %v846_v61  ;;  %v636_v0 = vadd.f32 %v1362_v35, %v635_v62  ;;  %v676_v1 = vadd.f32 %v1362_v35, %v675_v63  ;;  %v558_v2 = vpop.f32.mrf.mxu0  ;;  %v598_v3 = vpop.f32.mrf.mxu1 }
  0xe5   : > { %v559_v4 = vadd.f32 %v1362_v35, %v558_v2  ;;  %v599_v5 = vadd.f32 %v1362_v35, %v598_v3 }
  0xe6   : > { %vm734_vm10 = vcmp.gt.f32.partialorder %v636_v0, 0.0  ;;  %v798_v6 = vmul.f32 0.2, %v636_v0  ;;  %vm750_vm11 = vcmp.gt.f32.partialorder %v676_v1, 0.0  ;;  %v814_v7 = vmul.f32 0.2, %v676_v1 }
  0xe7   : > { %vm703_vm12 = vcmp.gt.f32.partialorder %v559_v4, 0.0  ;;  %v767_v8 = vmul.f32 0.2, %v559_v4  ;;  %vm719_vm13 = vcmp.gt.f32.partialorder %v599_v5, 0.0  ;;  %v783_v9 = vmul.f32 0.2, %v599_v5 }
  0xe8   : > { %v862_v10 = vsel %vm734_vm10, %v636_v0, %v798_v6  ;;  %v878_v11 = vsel %vm750_vm11, %v676_v1, %v814_v7 }
  0xe9   : > { %927 = vst.msk [vmem:[%s1370_s30 + $0x148] sm:$0xff] %vm885_vm1, %v862_v10  ;;  %v831_v12 = vsel %vm703_vm12, %v559_v4, %v767_v8  ;;  %v847_v13 = vsel %vm719_vm13, %v599_v5, %v783_v9 }
  0xea   : > { %943 = vst.msk [vmem:[%s1370_s30 + $0x1c8] sm:$0xff] %vm885_vm1, %v878_v11 }
  0xeb   : > { %896 = vst.msk [vmem:[%s1370_s30 + $0x50] sm:$0xff] %vm885_vm1, %v831_v12  ;;  %v638_v14 = vpop.f32.mrf.mxu2  ;;  %v678_v15 = vpop.f32.mrf.mxu3 }
  0xec   : > { %912 = vst.msk [vmem:[%s1370_s30 + $0xd0] sm:$0xff] %vm885_vm1, %v847_v13  ;;  %v639_v16 = vadd.f32 %v1362_v35, %v638_v14  ;;  %v679_v17 = vadd.f32 %v1362_v35, %v678_v15  ;;  %v560_v18 = vpop.f32.mrf.mxu0  ;;  %v600_v19 = vpop.f32.mrf.mxu1 }
  0xed   : > { %v561_v20 = vadd.f32 %v1362_v35, %v560_v18  ;;  %v601_v21 = vadd.f32 %v1362_v35, %v600_v19 }
  0xee   : > { %vm735_vm14 = vcmp.gt.f32.partialorder %v639_v16, 0.0  ;;  %v799_v22 = vmul.f32 0.2, %v639_v16  ;;  %vm751_vm15 = vcmp.gt.f32.partialorder %v679_v17, 0.0  ;;  %v815_v23 = vmul.f32 0.2, %v679_v17 }
  0xef   : > { %vm704_vm0 = vcmp.gt.f32.partialorder %v561_v20, 0.0  ;;  %v768_v24 = vmul.f32 0.2, %v561_v20  ;;  %vm720_vm2 = vcmp.gt.f32.partialorder %v601_v21, 0.0  ;;  %v784_v25 = vmul.f32 0.2, %v601_v21 }
  0xf0   : > { %v863_v26 = vsel %vm735_vm14, %v639_v16, %v799_v22  ;;  %v879_v27 = vsel %vm751_vm15, %v679_v17, %v815_v23 }
  0xf1   : > { %928 = vst.msk [vmem:[%s1370_s30 + $0x150] sm:$0xff] %vm885_vm1, %v863_v26  ;;  %v832_v28 = vsel %vm704_vm0, %v561_v20, %v768_v24  ;;  %v848_v29 = vsel %vm720_vm2, %v601_v21, %v784_v25 }
  0xf2   : > { %944 = vst.msk [vmem:[%s1370_s30 + $0x1d0] sm:$0xff] %vm885_vm1, %v879_v27 }
  0xf3   : > { %897 = vst.msk [vmem:[%s1370_s30 + $0x58] sm:$0xff] %vm885_vm1, %v832_v28  ;;  %v640_v30 = vpop.f32.mrf.mxu2  ;;  %v680_v31 = vpop.f32.mrf.mxu3 }
  0xf4   : > { %913 = vst.msk [vmem:[%s1370_s30 + $0xd8] sm:$0xff] %vm885_vm1, %v848_v29  ;;  %v641_v32 = vadd.f32 %v1362_v35, %v640_v30  ;;  %v681_v33 = vadd.f32 %v1362_v35, %v680_v31  ;;  %v563_v34 = vpop.f32.mrf.mxu0  ;;  %v603_v36 = vpop.f32.mrf.mxu1 }
  0xf5   : > { %v564_v37 = vadd.f32 %v1362_v35, %v563_v34  ;;  %v604_v38 = vadd.f32 %v1362_v35, %v603_v36 }
  0xf6   : > { %vm736_vm3 = vcmp.gt.f32.partialorder %v641_v32, 0.0  ;;  %v800_v39 = vmul.f32 0.2, %v641_v32  ;;  %vm752_vm4 = vcmp.gt.f32.partialorder %v681_v33, 0.0  ;;  %v816_v40 = vmul.f32 0.2, %v681_v33 }
  0xf7   : > { %vm705_vm5 = vcmp.gt.f32.partialorder %v564_v37, 0.0  ;;  %v769_v41 = vmul.f32 0.2, %v564_v37  ;;  %vm721_vm6 = vcmp.gt.f32.partialorder %v604_v38, 0.0  ;;  %v785_v42 = vmul.f32 0.2, %v604_v38 }
  0xf8   : > { %v864_v43 = vsel %vm736_vm3, %v641_v32, %v800_v39  ;;  %v880_v44 = vsel %vm752_vm4, %v681_v33, %v816_v40 }
  0xf9   : > { %929 = vst.msk [vmem:[%s1370_s30 + $0x158] sm:$0xff] %vm885_vm1, %v864_v43  ;;  %v833_v45 = vsel %vm705_vm5, %v564_v37, %v769_v41  ;;  %v849_v46 = vsel %vm721_vm6, %v604_v38, %v785_v42 }
  0xfa   : > { %945 = vst.msk [vmem:[%s1370_s30 + $0x1d8] sm:$0xff] %vm885_vm1, %v880_v44 }
  0xfb   : > { %898 = vst.msk [vmem:[%s1370_s30 + $0x60] sm:$0xff] %vm885_vm1, %v833_v45  ;;  %v643_v47 = vpop.f32.mrf.mxu2  ;;  %v683_v48 = vpop.f32.mrf.mxu3 }
  0xfc   : > { %914 = vst.msk [vmem:[%s1370_s30 + $0xe0] sm:$0xff] %vm885_vm1, %v849_v46  ;;  %v644_v49 = vadd.f32 %v1362_v35, %v643_v47  ;;  %v684_v50 = vadd.f32 %v1362_v35, %v683_v48  ;;  %v565_v51 = vpop.f32.mrf.mxu0  ;;  %v605_v52 = vpop.f32.mrf.mxu1 }
  0xfd   : > { %v566_v53 = vadd.f32 %v1362_v35, %v565_v51  ;;  %v606_v54 = vadd.f32 %v1362_v35, %v605_v52 }
  0xfe   : > { %vm737_vm7 = vcmp.gt.f32.partialorder %v644_v49, 0.0  ;;  %v801_v55 = vmul.f32 0.2, %v644_v49  ;;  %vm753_vm8 = vcmp.gt.f32.partialorder %v684_v50, 0.0  ;;  %v817_v56 = vmul.f32 0.2, %v684_v50 }
  0xff   : > { %vm706_vm9 = vcmp.gt.f32.partialorder %v566_v53, 0.0  ;;  %v770_v57 = vmul.f32 0.2, %v566_v53  ;;  %vm722_vm10 = vcmp.gt.f32.partialorder %v606_v54, 0.0  ;;  %v786_v58 = vmul.f32 0.2, %v606_v54 }
 0x100   : > { %v865_v59 = vsel %vm737_vm7, %v644_v49, %v801_v55  ;;  %v881_v60 = vsel %vm753_vm8, %v684_v50, %v817_v56 }
 0x101   : > { %930 = vst.msk [vmem:[%s1370_s30 + $0x160] sm:$0xff] %vm885_vm1, %v865_v59  ;;  %v834_v61 = vsel %vm706_vm9, %v566_v53, %v770_v57  ;;  %v850_v62 = vsel %vm722_vm10, %v606_v54, %v786_v58 }
 0x102   : > { %946 = vst.msk [vmem:[%s1370_s30 + $0x1e0] sm:$0xff] %vm885_vm1, %v881_v60 }
 0x103   : > { %899 = vst.msk [vmem:[%s1370_s30 + $0x68] sm:$0xff] %vm885_vm1, %v834_v61  ;;  %v645_v63 = vpop.f32.mrf.mxu2  ;;  %v685_v0 = vpop.f32.mrf.mxu3 }
 0x104   : > { %915 = vst.msk [vmem:[%s1370_s30 + $0xe8] sm:$0xff] %vm885_vm1, %v850_v62  ;;  %v646_v1 = vadd.f32 %v1362_v35, %v645_v63  ;;  %v686_v2 = vadd.f32 %v1362_v35, %v685_v0  ;;  %v568_v3 = vpop.f32.mrf.mxu0  ;;  %v608_v4 = vpop.f32.mrf.mxu1 }
 0x105   : > { %v569_v5 = vadd.f32 %v1362_v35, %v568_v3  ;;  %v609_v6 = vadd.f32 %v1362_v35, %v608_v4 }
 0x106   : > { %vm738_vm11 = vcmp.gt.f32.partialorder %v646_v1, 0.0  ;;  %v802_v7 = vmul.f32 0.2, %v646_v1  ;;  %vm754_vm12 = vcmp.gt.f32.partialorder %v686_v2, 0.0  ;;  %v818_v8 = vmul.f32 0.2, %v686_v2 }
 0x107   : > { %vm707_vm13 = vcmp.gt.f32.partialorder %v569_v5, 0.0  ;;  %v771_v9 = vmul.f32 0.2, %v569_v5  ;;  %vm723_vm14 = vcmp.gt.f32.partialorder %v609_v6, 0.0  ;;  %v787_v10 = vmul.f32 0.2, %v609_v6 }
 0x108   : > { %v866_v11 = vsel %vm738_vm11, %v646_v1, %v802_v7  ;;  %v882_v12 = vsel %vm754_vm12, %v686_v2, %v818_v8 }
 0x109   : > { %931 = vst.msk [vmem:[%s1370_s30 + $0x168] sm:$0xff] %vm885_vm1, %v866_v11  ;;  %v835_v13 = vsel %vm707_vm13, %v569_v5, %v771_v9  ;;  %v851_v14 = vsel %vm723_vm14, %v609_v6, %v787_v10 }
 0x10a   : > { %947 = vst.msk [vmem:[%s1370_s30 + $0x1e8] sm:$0xff] %vm885_vm1, %v882_v12 }
 0x10b   : > { %900 = vst.msk [vmem:[%s1370_s30 + $0x70] sm:$0xff] %vm885_vm1, %v835_v13  ;;  %v648_v15 = vpop.f32.mrf.mxu2  ;;  %v688_v16 = vpop.f32.mrf.mxu3 }
 0x10c   : > { %916 = vst.msk [vmem:[%s1370_s30 + $0xf0] sm:$0xff] %vm885_vm1, %v851_v14  ;;  %v649_v17 = vadd.f32 %v1362_v35, %v648_v15  ;;  %v689_v18 = vadd.f32 %v1362_v35, %v688_v16  ;;  %v570_v19 = vpop.f32.mrf.mxu0  ;;  %v610_v20 = vpop.f32.mrf.mxu1 }
 0x10d   : > { %v571_v21 = vadd.f32 %v1362_v35, %v570_v19  ;;  %v611_v22 = vadd.f32 %v1362_v35, %v610_v20 }
 0x10e   : > { %vm739_vm15 = vcmp.gt.f32.partialorder %v649_v17, 0.0  ;;  %v803_v23 = vmul.f32 0.2, %v649_v17  ;;  %vm755_vm0 = vcmp.gt.f32.partialorder %v689_v18, 0.0  ;;  %v819_v24 = vmul.f32 0.2, %v689_v18 }
 0x10f   : > { %vm708_vm2 = vcmp.gt.f32.partialorder %v571_v21, 0.0  ;;  %v772_v25 = vmul.f32 0.2, %v571_v21  ;;  %vm724_vm3 = vcmp.gt.f32.partialorder %v611_v22, 0.0  ;;  %v788_v26 = vmul.f32 0.2, %v611_v22 }
 0x110   : > { %v867_v27 = vsel %vm739_vm15, %v649_v17, %v803_v23  ;;  %v883_v28 = vsel %vm755_vm0, %v689_v18, %v819_v24 }
 0x111   : > { %932 = vst.msk [vmem:[%s1370_s30 + $0x170] sm:$0xff] %vm885_vm1, %v867_v27  ;;  %v836_v29 = vsel %vm708_vm2, %v571_v21, %v772_v25  ;;  %v852_v30 = vsel %vm724_vm3, %v611_v22, %v788_v26 }
 0x112   : > { %948 = vst.msk [vmem:[%s1370_s30 + $0x1f0] sm:$0xff] %vm885_vm1, %v883_v28 }
 0x113   : > { %901 = vst.msk [vmem:[%s1370_s30 + $0x78] sm:$0xff] %vm885_vm1, %v836_v29  ;;  %v650_v31 = vpop.f32.mrf.mxu2  ;;  %v690_v32 = vpop.f32.mrf.mxu3 }
 0x114   : > { %917 = vst.msk [vmem:[%s1370_s30 + $0xf8] sm:$0xff] %vm885_vm1, %v852_v30  ;;  %v651_v33 = vadd.f32 %v1362_v35, %v650_v31  ;;  %v691_v34 = vadd.f32 %v1362_v35, %v690_v32 }
 0x116   : > { %vm740_vm4 = vcmp.gt.f32.partialorder %v651_v33, 0.0  ;;  %v804_v36 = vmul.f32 0.2, %v651_v33  ;;  %vm756_vm5 = vcmp.gt.f32.partialorder %v691_v34, 0.0  ;;  %v820_v37 = vmul.f32 0.2, %v691_v34 }
 0x118   : > { %v868_v38 = vsel %vm740_vm4, %v651_v33, %v804_v36  ;;  %v884_v39 = vsel %vm756_vm5, %v691_v34, %v820_v37 }
 0x119   : > { %933 = vst.msk [vmem:[%s1370_s30 + $0x178] sm:$0xff] %vm885_vm1, %v868_v38 }
 0x11a   : > { %949 = vst.msk [vmem:[%s1370_s30 + $0x1f8] sm:$0xff] %vm885_vm1, %v884_v39 }
 0x11b PF: > { %s13_s12 = sadd.s32 1, %s1248_s12  }
 0x11c   : > { %p10_p4 = scmp.ge.s32.totalorder %s13_s12, 6  }
 0x11e   :  { %12 = sbr.rel (!%p10_p4) target bundleno = 1 (0x1), region = 62 }

// kernel: discriminator_forward.9
= control target key start
LH: loop header
LB: loop body
LE: loop exit
PB: predicated region body
PF: predicated region fallthrough
CT: control target
= control target key end

     0   :  { %vm510_vm0 = vcmask 130048   ;;  %vm18_vm1 = vcmask 122880   ;;  %s1995_s1 = inlined_call_operand.vmem [shape: bf16[128,16], index: 1, kind: input, shape index: {}]   ;;  %s1996_s0 = inlined_call_operand.vmem [shape: bf16[512,128], index: 0, kind: input, shape index: {}]   ;;  %s1997_s2 = inlined_call_operand.vmem [shape: f32[512,16], index: 2, kind: output, shape index: {0}]   ;;  %s1998_s3 = inlined_call_operand.vmem [shape: f32[1,16], index: 3, kind: output, shape index: {1}]   ;;  %s1999_s4 = inlined_call_operand.vmem [shape: f32[1,16], index: 4, kind: output, shape index: {2}]  }
   0x1   :  { %v1123_v0 = vld [vmem:[%s1995_s1 + $0x38] sm:$0xff]  ;;  %v1122_v1 = vld [vmem:[%s1995_s1 + $0x30] sm:$0xff]  ;;  %v1121_v2 = vld [vmem:[%s1995_s1 + $0x28] sm:$0xff] }
   0x2   :  { %341 = vmatpush.bf16.msra.mxu0 %v1123_v0  ;;  %1124 = vmatpush.bf16.msra.mxu1 %v1123_v0  ;;  %v1120_v3 = vld [vmem:[%s1995_s1 + $0x20] sm:$0xff]  ;;  %v1119_v4 = vld [vmem:[%s1995_s1 + $0x18] sm:$0xff]  ;;  %v1118_v5 = vld [vmem:[%s1995_s1 + $0x10] sm:$0xff] }
   0x3   :  { %1125 = vmatpush.bf16.msra.mxu2 %v1123_v0  ;;  %1126 = vmatpush.bf16.msra.mxu3 %v1123_v0  ;;  %v1117_v6 = vld [vmem:[%s1995_s1 + $0x8] sm:$0xff]  ;;  %v1116_v7 = vld [vmem:[%s1995_s1] sm:$0xff]  ;;  %v1086_v13 = vld [vmem:[%s1996_s0 + $0x10] sm:$0xff] }
   0x4   :  { %v1084_v8 = vld [vmem:[%s1996_s0] sm:$0xff]  ;;  %v1085_v10 = vld [vmem:[%s1996_s0 + $0x8] sm:$0xff]  ;;  %v1094_v14 = vld [vmem:[%s1996_s0 + $0x50] sm:$0xff] }
   0x5   :  { %v1092_v9 = vld [vmem:[%s1996_s0 + $0x40] sm:$0xff]  ;;  %v1093_v11 = vld [vmem:[%s1996_s0 + $0x48] sm:$0xff]  ;;  %v1087_v16 = vld [vmem:[%s1996_s0 + $0x18] sm:$0xff] }
   0x6   :  { %342 = vmatpush.bf16.msra.mxu0 %v1122_v1  ;;  %1127 = vmatpush.bf16.msra.mxu1 %v1122_v1  ;;  %v1100_v12 = vld [vmem:[%s1996_s0 + $0x80] sm:$0xff]  ;;  %v1101_v15 = vld [vmem:[%s1996_s0 + $0x88] sm:$0xff]  ;;  %v1095_v17 = vld [vmem:[%s1996_s0 + $0x58] sm:$0xff] }
   0x7   :  { %1128 = vmatpush.bf16.msra.mxu2 %v1122_v1  ;;  %1129 = vmatpush.bf16.msra.mxu3 %v1122_v1  ;;  %v1102_v18 = vld [vmem:[%s1996_s0 + $0x90] sm:$0xff]  ;;  %v1108_v19 = vld [vmem:[%s1996_s0 + $0xc0] sm:$0xff]  ;;  %v1103_v22 = vld [vmem:[%s1996_s0 + $0x98] sm:$0xff] }
   0x8   :  { %v1088_v20 = vld [vmem:[%s1996_s0 + $0x20] sm:$0xff]  ;;  %v1109_v23 = vld [vmem:[%s1996_s0 + $0xc8] sm:$0xff]  ;;  %v1110_v27 = vld [vmem:[%s1996_s0 + $0xd0] sm:$0xff] }
   0x9   :  { %v1096_v21 = vld [vmem:[%s1996_s0 + $0x60] sm:$0xff]  ;;  %v1089_v24 = vld [vmem:[%s1996_s0 + $0x28] sm:$0xff]  ;;  %v1090_v28 = vld [vmem:[%s1996_s0 + $0x30] sm:$0xff] }
   0xa   :  { %343 = vmatpush.bf16.msra.mxu0 %v1121_v2  ;;  %1130 = vmatpush.bf16.msra.mxu1 %v1121_v2  ;;  %v1097_v25 = vld [vmem:[%s1996_s0 + $0x68] sm:$0xff]  ;;  %v1104_v26 = vld [vmem:[%s1996_s0 + $0xa0] sm:$0xff]  ;;  %v1098_v29 = vld [vmem:[%s1996_s0 + $0x70] sm:$0xff] }
   0xb   :  { %1131 = vmatpush.bf16.msra.mxu2 %v1121_v2  ;;  %1132 = vmatpush.bf16.msra.mxu3 %v1121_v2  ;;  %v1105_v30 = vld [vmem:[%s1996_s0 + $0xa8] sm:$0xff]  ;;  %v1111_v31 = vld [vmem:[%s1996_s0 + $0xd8] sm:$0xff]  ;;  %v1106_v34 = vld [vmem:[%s1996_s0 + $0xb0] sm:$0xff] }
   0xc   :  { %v1091_v32 = vld [vmem:[%s1996_s0 + $0x38] sm:$0xff]  ;;  %v1112_v35 = vld [vmem:[%s1996_s0 + $0xe0] sm:$0xff]  ;;  %v1113_v39 = vld [vmem:[%s1996_s0 + $0xe8] sm:$0xff] }
   0xd   :  { %v1099_v33 = vld [vmem:[%s1996_s0 + $0x78] sm:$0xff]  ;;  %v1114_v56 = vld [vmem:[%s1996_s0 + $0xf0] sm:$0xff] }
   0xe   :  { %344 = vmatpush.bf16.msra.mxu0 %v1120_v3  ;;  %1133 = vmatpush.bf16.msra.mxu1 %v1120_v3  ;;  %v1107_v38 = vld [vmem:[%s1996_s0 + $0xb8] sm:$0xff] }
   0xf   :  { %1134 = vmatpush.bf16.msra.mxu2 %v1120_v3  ;;  %1135 = vmatpush.bf16.msra.mxu3 %v1120_v3 }
  0x12   :  { %345 = vmatpush.bf16.msra.mxu0 %v1119_v4  ;;  %1136 = vmatpush.bf16.msra.mxu1 %v1119_v4 }
  0x13   :  { %1137 = vmatpush.bf16.msra.mxu2 %v1119_v4  ;;  %1138 = vmatpush.bf16.msra.mxu3 %v1119_v4 }
  0x16   :  { %346 = vmatpush.bf16.msra.mxu0 %v1118_v5  ;;  %1139 = vmatpush.bf16.msra.mxu1 %v1118_v5 }
  0x17   :  { %1140 = vmatpush.bf16.msra.mxu2 %v1118_v5  ;;  %1141 = vmatpush.bf16.msra.mxu3 %v1118_v5 }
  0x1a   :  { %347 = vmatpush.bf16.msra.mxu0 %v1117_v6  ;;  %1142 = vmatpush.bf16.msra.mxu1 %v1117_v6 }
  0x1b   :  { %1143 = vmatpush.bf16.msra.mxu2 %v1117_v6  ;;  %1144 = vmatpush.bf16.msra.mxu3 %v1117_v6 }
  0x1e   :  { %348 = vmatpush.bf16.msra.mxu0 %v1116_v7  ;;  %1145 = vmatpush.bf16.msra.mxu1 %v1116_v7 }
  0x1f   :  { %1146 = vmatpush.bf16.msra.mxu2 %v1116_v7  ;;  %1147 = vmatpush.bf16.msra.mxu3 %v1116_v7 }
  0x21   :  { %349 = vmatmul.bf16.vlgmr.msra.gmra.mxu0 %v1084_v8  ;;  %389 = vmatmul.bf16.vlgmr.msra.gmra.mxu1 %v1092_v9  ;;  %v1115_v9 = vld [vmem:[%s1996_s0 + $0xf8] sm:$0xff] }
  0x22   :  { %429 = vmatmul.bf16.vlgmr.msra.gmra.mxu2 %v1100_v12  ;;  %469 = vmatmul.bf16.vlgmr.msra.gmra.mxu3 %v1108_v19 }
  0x31   :  { %354 = vmatmul.bf16.gmra.mxu0 %v1085_v10  ;;  %394 = vmatmul.bf16.gmra.mxu1 %v1093_v11 }
  0x32   :  { %434 = vmatmul.bf16.gmra.mxu2 %v1101_v15  ;;  %474 = vmatmul.bf16.gmra.mxu3 %v1109_v23 }
  0x41   :  { %359 = vmatmul.bf16.gmra.mxu0 %v1086_v13  ;;  %399 = vmatmul.bf16.gmra.mxu1 %v1094_v14 }
  0x42   :  { %439 = vmatmul.bf16.gmra.mxu2 %v1102_v18  ;;  %479 = vmatmul.bf16.gmra.mxu3 %v1110_v27 }
  0x51   :  { %364 = vmatmul.bf16.gmra.mxu0 %v1087_v16  ;;  %404 = vmatmul.bf16.gmra.mxu1 %v1095_v17 }
  0x52   :  { %444 = vmatmul.bf16.gmra.mxu2 %v1103_v22  ;;  %484 = vmatmul.bf16.gmra.mxu3 %v1111_v31 }
  0x61   :  { %369 = vmatmul.bf16.gmra.mxu0 %v1088_v20  ;;  %409 = vmatmul.bf16.gmra.mxu1 %v1096_v21 }
  0x62   :  { %449 = vmatmul.bf16.gmra.mxu2 %v1104_v26  ;;  %489 = vmatmul.bf16.gmra.mxu3 %v1112_v35 }
  0x71   :  { %374 = vmatmul.bf16.gmra.mxu0 %v1089_v24  ;;  %414 = vmatmul.bf16.gmra.mxu1 %v1097_v25 }
  0x72   :  { %454 = vmatmul.bf16.gmra.mxu2 %v1105_v30  ;;  %494 = vmatmul.bf16.gmra.mxu3 %v1113_v39 }
  0x81   :  { %379 = vmatmul.bf16.gmra.mxu0 %v1090_v28  ;;  %419 = vmatmul.bf16.gmra.mxu1 %v1098_v29 }
  0x82   :  { %459 = vmatmul.bf16.gmra.mxu2 %v1106_v34  ;;  %499 = vmatmul.bf16.gmra.mxu3 %v1114_v56 }
  0x91   :  { %384 = vmatmul.bf16.gmra.mxu0 %v1091_v32  ;;  %424 = vmatmul.bf16.gmra.mxu1 %v1099_v33 }
  0x92   :  { %464 = vmatmul.bf16.gmra.mxu2 %v1107_v38  ;;  %504 = vmatmul.bf16.gmra.mxu3 %v1115_v9 }
  0x9e   :  { %v350_v36 = vpop.f32.mrf.mxu0  ;;  %v1283_v37 = vpop.f32.mrf.mxu1 }
  0x9f   :  { %511 = vst.msk [vmem:[%s1997_s2] sm:$0xff] %vm510_vm0, %v350_v36  ;;  %v713_v40 = vmul.f32 %v350_v36, %v350_v36  ;;  %v576_v43 = vsel %vm510_vm0, %v350_v36, 0.0 }
  0xa0   :  { %527 = vst.msk [vmem:[%s1997_s2 + $0x80] sm:$0xff] %vm510_vm0, %v1283_v37 }
  0xa1   :  { %v777_v47 = vsel %vm510_vm0, %v713_v40, 0.0 }
  0xa5   :  { %v1338_v62 = vpop.f32.mrf.mxu2  ;;  %v1422_v20 = vpop.f32.mrf.mxu3 }
  0xa6   :  { %v352_v41 = vpop.f32.mrf.mxu0  ;;  %v1300_v42 = vpop.f32.mrf.mxu1  ;;  %543 = vst.msk [vmem:[%s1997_s2 + $0x100] sm:$0xff] %vm510_vm0, %v1338_v62 }
  0xa7   :  { %512 = vst.msk [vmem:[%s1997_s2 + $0x8] sm:$0xff] %vm510_vm0, %v352_v41  ;;  %v577_v44 = vsel %vm510_vm0, %v352_v41, 0.0  ;;  %v714_v45 = vmul.f32 %v352_v41, %v352_v41 }
  0xa8   :  { %v578_v46 = vadd.f32 %v577_v44, %v576_v43  ;;  %528 = vst.msk [vmem:[%s1997_s2 + $0x88] sm:$0xff] %vm510_vm0, %v1300_v42 }
  0xa9   :  { %v778_v48 = vsel %vm510_vm0, %v714_v45, 0.0  ;;  %559 = vst.msk [vmem:[%s1997_s2 + $0x180] sm:$0xff] %vm510_vm0, %v1422_v20 }
  0xaa   :  { %v779_v49 = vadd.f32 %v778_v48, %v777_v47 }
  0xad   :  { %v1358_v6 = vpop.f32.mrf.mxu2  ;;  %v1447_v24 = vpop.f32.mrf.mxu3 }
  0xae   :  { %v355_v50 = vpop.f32.mrf.mxu0  ;;  %v1315_v51 = vpop.f32.mrf.mxu1  ;;  %544 = vst.msk [vmem:[%s1997_s2 + $0x108] sm:$0xff] %vm510_vm0, %v1358_v6 }
  0xaf   :  { %513 = vst.msk [vmem:[%s1997_s2 + $0x10] sm:$0xff] %vm510_vm0, %v355_v50  ;;  %v579_v52 = vsel %vm510_vm0, %v355_v50, 0.0  ;;  %v715_v53 = vmul.f32 %v355_v50, %v355_v50 }
  0xb0   :  { %v580_v54 = vadd.f32 %v579_v52, %v578_v46  ;;  %529 = vst.msk [vmem:[%s1997_s2 + $0x90] sm:$0xff] %vm510_vm0, %v1315_v51 }
  0xb1   :  { %v780_v55 = vsel %vm510_vm0, %v715_v53, 0.0  ;;  %560 = vst.msk [vmem:[%s1997_s2 + $0x188] sm:$0xff] %vm510_vm0, %v1447_v24 }
  0xb2   :  { %v781_v57 = vadd.f32 %v780_v55, %v779_v49 }
  0xb5   :  { %v1384_v13 = vpop.f32.mrf.mxu2  ;;  %v1472_v28 = vpop.f32.mrf.mxu3 }
  0xb6   :  { %v357_v58 = vpop.f32.mrf.mxu0  ;;  %v1331_v59 = vpop.f32.mrf.mxu1  ;;  %545 = vst.msk [vmem:[%s1997_s2 + $0x110] sm:$0xff] %vm510_vm0, %v1384_v13 }
  0xb7   :  { %514 = vst.msk [vmem:[%s1997_s2 + $0x18] sm:$0xff] %vm510_vm0, %v357_v58  ;;  %v581_v60 = vsel %vm510_vm0, %v357_v58, 0.0  ;;  %v716_v61 = vmul.f32 %v357_v58, %v357_v58 }
  0xb8   :  { %v582_v63 = vadd.f32 %v581_v60, %v580_v54  ;;  %530 = vst.msk [vmem:[%s1997_s2 + $0x98] sm:$0xff] %vm510_vm0, %v1331_v59 }
  0xb9   :  { %v782_v0 = vsel %vm510_vm0, %v716_v61, 0.0  ;;  %561 = vst.msk [vmem:[%s1997_s2 + $0x190] sm:$0xff] %vm510_vm0, %v1472_v28 }
  0xba   :  { %v783_v1 = vadd.f32 %v782_v0, %v781_v57 }
  0xbd   :  { %v1402_v16 = vpop.f32.mrf.mxu2  ;;  %v1497_v32 = vpop.f32.mrf.mxu3 }
  0xbe   :  { %v360_v2 = vpop.f32.mrf.mxu0  ;;  %v1351_v3 = vpop.f32.mrf.mxu1  ;;  %546 = vst.msk [vmem:[%s1997_s2 + $0x118] sm:$0xff] %vm510_vm0, %v1402_v16 }
  0xbf   :  { %515 = vst.msk [vmem:[%s1997_s2 + $0x20] sm:$0xff] %vm510_vm0, %v360_v2  ;;  %v583_v4 = vsel %vm510_vm0, %v360_v2, 0.0  ;;  %v717_v5 = vmul.f32 %v360_v2, %v360_v2 }
  0xc0   :  { %v1360_v7 = vadd.f32 %v583_v4, %v582_v63  ;;  %531 = vst.msk [vmem:[%s1997_s2 + $0xa0] sm:$0xff] %vm510_vm0, %v1351_v3 }
  0xc1   :  { %v784_v8 = vsel %vm510_vm0, %v717_v5, 0.0  ;;  %562 = vst.msk [vmem:[%s1997_s2 + $0x198] sm:$0xff] %vm510_vm0, %v1497_v32 }
  0xc2   :  { %v1376_v10 = vadd.f32 %v784_v8, %v783_v1 }
  0xc5   :  { %v1420_v19 = vpop.f32.mrf.mxu2  ;;  %v1522_v36 = vpop.f32.mrf.mxu3 }
  0xc6   :  { %v362_v11 = vpop.f32.mrf.mxu0  ;;  %v1378_v12 = vpop.f32.mrf.mxu1  ;;  %547 = vst.msk [vmem:[%s1997_s2 + $0x120] sm:$0xff] %vm510_vm0, %v1420_v19 }
  0xc7   :  { %516 = vst.msk [vmem:[%s1997_s2 + $0x28] sm:$0xff] %vm510_vm0, %v362_v11  ;;  %v718_v40 = vmul.f32 %v362_v11, %v362_v11  ;;  %v585_v44 = vsel %vm510_vm0, %v362_v11, 0.0 }
  0xc8   :  { %532 = vst.msk [vmem:[%s1997_s2 + $0xa8] sm:$0xff] %vm510_vm0, %v1378_v12  ;;  %v586_v49 = vadd.f32 %v585_v44, %v1360_v7 }
  0xc9   :  { %563 = vst.msk [vmem:[%s1997_s2 + $0x1a0] sm:$0xff] %vm510_vm0, %v1522_v36  ;;  %v786_v46 = vsel %vm510_vm0, %v718_v40, 0.0 }
  0xca   :  { %v787_v54 = vadd.f32 %v786_v46, %v1376_v10 }
  0xcd   :  { %v1445_v23 = vpop.f32.mrf.mxu2  ;;  %v1547_v43 = vpop.f32.mrf.mxu3 }
  0xce   :  { %v365_v14 = vpop.f32.mrf.mxu0  ;;  %v1396_v15 = vpop.f32.mrf.mxu1  ;;  %548 = vst.msk [vmem:[%s1997_s2 + $0x128] sm:$0xff] %vm510_vm0, %v1445_v23 }
  0xcf   :  { %517 = vst.msk [vmem:[%s1997_s2 + $0x30] sm:$0xff] %vm510_vm0, %v365_v14  ;;  %v719_v45 = vmul.f32 %v365_v14, %v365_v14  ;;  %v587_v47 = vsel %vm510_vm0, %v365_v14, 0.0 }
  0xd0   :  { %533 = vst.msk [vmem:[%s1997_s2 + $0xb0] sm:$0xff] %vm510_vm0, %v1396_v15  ;;  %v588_v55 = vadd.f32 %v587_v47, %v586_v49 }
  0xd1   :  { %564 = vst.msk [vmem:[%s1997_s2 + $0x1a8] sm:$0xff] %vm510_vm0, %v1547_v43  ;;  %v788_v50 = vsel %vm510_vm0, %v719_v45, 0.0 }
  0xd2   :  { %v789_v1 = vadd.f32 %v788_v50, %v787_v54 }
  0xd5   :  { %v1470_v27 = vpop.f32.mrf.mxu2  ;;  %v1581_v0 = vpop.f32.mrf.mxu3 }
  0xd6   :  { %v367_v17 = vpop.f32.mrf.mxu0  ;;  %v1414_v18 = vpop.f32.mrf.mxu1  ;;  %549 = vst.msk [vmem:[%s1997_s2 + $0x130] sm:$0xff] %vm510_vm0, %v1470_v27 }
  0xd7   :  { %518 = vst.msk [vmem:[%s1997_s2 + $0x38] sm:$0xff] %vm510_vm0, %v367_v17  ;;  %v720_v48 = vmul.f32 %v367_v17, %v367_v17  ;;  %v589_v52 = vsel %vm510_vm0, %v367_v17, 0.0 }
  0xd8   :  { %534 = vst.msk [vmem:[%s1997_s2 + $0xb8] sm:$0xff] %vm510_vm0, %v1414_v18  ;;  %v590_v2 = vadd.f32 %v589_v52, %v588_v55 }
  0xd9   :  { %v790_v58 = vsel %vm510_vm0, %v720_v48, 0.0  ;;  %565 = vst.msk [vmem:[%s1997_s2 + $0x1b0] sm:$0xff] %vm510_vm0, %v1581_v0 }
  0xda   :  { %v791_v8 = vadd.f32 %v790_v58, %v789_v1 }
  0xdd   :  { %v1495_v31 = vpop.f32.mrf.mxu2 }
  0xde   :  { %v370_v21 = vpop.f32.mrf.mxu0  ;;  %v1439_v22 = vpop.f32.mrf.mxu1  ;;  %550 = vst.msk [vmem:[%s1997_s2 + $0x138] sm:$0xff] %vm510_vm0, %v1495_v31 }
  0xdf   :  { %519 = vst.msk [vmem:[%s1997_s2 + $0x40] sm:$0xff] %vm510_vm0, %v370_v21  ;;  %v721_v53 = vmul.f32 %v370_v21, %v370_v21  ;;  %v591_v60 = vsel %vm510_vm0, %v370_v21, 0.0 }
  0xe0   :  { %535 = vst.msk [vmem:[%s1997_s2 + $0xc0] sm:$0xff] %vm510_vm0, %v1439_v22  ;;  %v592_v9 = vadd.f32 %v591_v60, %v590_v2 }
  0xe1   :  { %v792_v4 = vsel %vm510_vm0, %v721_v53, 0.0  ;;  %v1614_v53 = vpop.f32.mrf.mxu3 }
  0xe2   :  { %v793_v17 = vadd.f32 %v792_v4, %v791_v8  ;;  %566 = vst.msk [vmem:[%s1997_s2 + $0x1b8] sm:$0xff] %vm510_vm0, %v1614_v53 }
  0xe5   :  { %v1520_v35 = vpop.f32.mrf.mxu2 }
  0xe6   :  { %v372_v25 = vpop.f32.mrf.mxu0  ;;  %v1464_v26 = vpop.f32.mrf.mxu1  ;;  %551 = vst.msk [vmem:[%s1997_s2 + $0x140] sm:$0xff] %vm510_vm0, %v1520_v35 }
  0xe7   :  { %520 = vst.msk [vmem:[%s1997_s2 + $0x48] sm:$0xff] %vm510_vm0, %v372_v25  ;;  %v722_v61 = vmul.f32 %v372_v25, %v372_v25  ;;  %v593_v5 = vsel %vm510_vm0, %v372_v25, 0.0 }
  0xe8   :  { %536 = vst.msk [vmem:[%s1997_s2 + $0xc8] sm:$0xff] %vm510_vm0, %v1464_v26  ;;  %v594_v21 = vadd.f32 %v593_v5, %v592_v9 }
  0xe9   :  { %v794_v10 = vsel %vm510_vm0, %v722_v61, 0.0 }
  0xea   :  { %v795_v45 = vadd.f32 %v794_v10, %v793_v17 }
  0xed   :  { %v1545_v41 = vpop.f32.mrf.mxu2 }
  0xee   :  { %v375_v29 = vpop.f32.mrf.mxu0  ;;  %v1489_v30 = vpop.f32.mrf.mxu1  ;;  %552 = vst.msk [vmem:[%s1997_s2 + $0x148] sm:$0xff] %vm510_vm0, %v1545_v41 }
  0xef   :  { %521 = vst.msk [vmem:[%s1997_s2 + $0x50] sm:$0xff] %vm510_vm0, %v375_v29  ;;  %v723_v7 = vmul.f32 %v375_v29, %v375_v29  ;;  %v595_v11 = vsel %vm510_vm0, %v375_v29, 0.0 }
  0xf0   :  { %537 = vst.msk [vmem:[%s1997_s2 + $0xd0] sm:$0xff] %vm510_vm0, %v1489_v30  ;;  %v596_v46 = vadd.f32 %v595_v11, %v594_v21  ;;  %v729_v11 = vmul.f32 %v1283_v37, %v1283_v37 }
  0xf1   :  { %v796_v25 = vsel %vm510_vm0, %v723_v7, 0.0 }
  0xf5   :  { %v1579_v63 = vpop.f32.mrf.mxu2 }
  0xf6   :  { %v377_v33 = vpop.f32.mrf.mxu0  ;;  %v1514_v34 = vpop.f32.mrf.mxu1  ;;  %553 = vst.msk [vmem:[%s1997_s2 + $0x150] sm:$0xff] %vm510_vm0, %v1579_v63 }
  0xf7   :  { %522 = vst.msk [vmem:[%s1997_s2 + $0x58] sm:$0xff] %vm510_vm0, %v377_v33  ;;  %v724_v14 = vmul.f32 %v377_v33, %v377_v33  ;;  %v597_v40 = vsel %vm510_vm0, %v377_v33, 0.0  ;;  %v797_v33 = vadd.f32 %v796_v25, %v795_v45  ;;  %v1647_v25 = vpop.f32.mrf.mxu3  ;;  %v607_v45 = vsel %vm510_vm0, %v1283_v37, 0.0 }
  0xf8   :  { %538 = vst.msk [vmem:[%s1997_s2 + $0xd8] sm:$0xff] %vm510_vm0, %v1514_v34  ;;  %v598_v54 = vadd.f32 %v597_v40, %v596_v46  ;;  %v730_v46 = vmul.f32 %v1300_v42, %v1300_v42  ;;  %v808_v37 = vsel %vm510_vm0, %v729_v11, 0.0 }
  0xf9   :  { %v798_v49 = vsel %vm510_vm0, %v724_v14, 0.0  ;;  %567 = vst.msk [vmem:[%s1997_s2 + $0x1c0] sm:$0xff] %vm510_vm0, %v1647_v25 }
  0xfa   :  { %v799_v60 = vadd.f32 %v798_v49, %v797_v33  ;;  %v731_v33 = vmul.f32 %v1315_v51, %v1315_v51 }
  0xfd   :  { %v1612_v29 = vpop.f32.mrf.mxu2 }
  0xfe   :  { %v380_v38 = vpop.f32.mrf.mxu0  ;;  %v1539_v39 = vpop.f32.mrf.mxu1  ;;  %554 = vst.msk [vmem:[%s1997_s2 + $0x158] sm:$0xff] %vm510_vm0, %v1612_v29 }
  0xff   :  { %523 = vst.msk [vmem:[%s1997_s2 + $0x60] sm:$0xff] %vm510_vm0, %v380_v38  ;;  %v725_v44 = vmul.f32 %v380_v38, %v380_v38  ;;  %v599_v50 = vsel %vm510_vm0, %v380_v38, 0.0 }
 0x100   :  { %539 = vst.msk [vmem:[%s1997_s2 + $0xe0] sm:$0xff] %vm510_vm0, %v1539_v39  ;;  %v600_v61 = vadd.f32 %v599_v50, %v598_v54 }
 0x101   :  { %v800_v38 = vsel %vm510_vm0, %v725_v44, 0.0 }
 0x105   :  { %v1645_v21 = vpop.f32.mrf.mxu2 }
 0x106   :  { %v382_v56 = vpop.f32.mrf.mxu0  ;;  %v1571_v57 = vpop.f32.mrf.mxu1  ;;  %555 = vst.msk [vmem:[%s1997_s2 + $0x160] sm:$0xff] %vm510_vm0, %v1645_v21 }
 0x107   :  { %524 = vst.msk [vmem:[%s1997_s2 + $0x68] sm:$0xff] %vm510_vm0, %v382_v56  ;;  %v726_v52 = vmul.f32 %v382_v56, %v382_v56  ;;  %v601_v55 = vsel %vm510_vm0, %v382_v56, 0.0  ;;  %v801_v56 = vadd.f32 %v800_v38, %v799_v60  ;;  %v732_v60 = vmul.f32 %v1331_v59, %v1331_v59 }
 0x108   :  { %540 = vst.msk [vmem:[%s1997_s2 + $0xe8] sm:$0xff] %vm510_vm0, %v1571_v57  ;;  %v602_v4 = vadd.f32 %v601_v55, %v600_v61  ;;  %v810_v55 = vsel %vm510_vm0, %v730_v46, 0.0 }
 0x109   :  { %v802_v1 = vsel %vm510_vm0, %v726_v52, 0.0  ;;  %v609_v52 = vsel %vm510_vm0, %v1300_v42, 0.0  ;;  %v613_v42 = vsel %vm510_vm0, %v1331_v59, 0.0  ;;  %v615_v59 = vsel %vm510_vm0, %v1351_v3, 0.0 }
 0x10a   :  { %v803_v7 = vadd.f32 %v802_v1, %v801_v56  ;;  %v733_v56 = vmul.f32 %v1351_v3, %v1351_v3 }
 0x10e   :  { %v385_v47 = vpop.f32.mrf.mxu0  ;;  %v1604_v48 = vpop.f32.mrf.mxu1 }
 0x10f   :  { %525 = vst.msk [vmem:[%s1997_s2 + $0x70] sm:$0xff] %vm510_vm0, %v385_v47  ;;  %v727_v58 = vmul.f32 %v385_v47, %v385_v47  ;;  %v603_v2 = vsel %vm510_vm0, %v385_v47, 0.0 }
 0x110   :  { %541 = vst.msk [vmem:[%s1997_s2 + $0xf0] sm:$0xff] %vm510_vm0, %v1604_v48  ;;  %v604_v8 = vadd.f32 %v603_v2, %v602_v4  ;;  %v812_v2 = vsel %vm510_vm0, %v731_v33, 0.0  ;;  %v1684_v4 = vpop.f32.mrf.mxu2  ;;  %v737_v33 = vmul.f32 %v1439_v22, %v1439_v22 }
 0x111   :  { %v804_v5 = vsel %vm510_vm0, %v727_v58, 0.0  ;;  %v611_v58 = vsel %vm510_vm0, %v1315_v51, 0.0  ;;  %556 = vst.msk [vmem:[%s1997_s2 + $0x168] sm:$0xff] %vm510_vm0, %v1684_v4  ;;  %v814_v51 = vsel %vm510_vm0, %v732_v60, 0.0  ;;  %v738_v60 = vmul.f32 %v1464_v26, %v1464_v26 }
 0x112   :  { %v805_v40 = vadd.f32 %v804_v5, %v803_v7  ;;  %v1686_v5 = vpop.f32.mrf.mxu3 }
 0x113   :  { %568 = vst.msk [vmem:[%s1997_s2 + $0x1c8] sm:$0xff] %vm510_vm0, %v1686_v5 }
 0x116   :  { %v387_v9 = vpop.f32.mrf.mxu0  ;;  %v1636_v10 = vpop.f32.mrf.mxu1 }
 0x117   :  { %526 = vst.msk [vmem:[%s1997_s2 + $0x78] sm:$0xff] %vm510_vm0, %v387_v9  ;;  %v605_v14 = vsel %vm510_vm0, %v387_v9, 0.0  ;;  %v728_v17 = vmul.f32 %v387_v9, %v387_v9  ;;  %v734_v9 = vmul.f32 %v1378_v12, %v1378_v12 }
 0x118   :  { %v606_v44 = vadd.f32 %v605_v14, %v604_v8  ;;  %542 = vst.msk [vmem:[%s1997_s2 + $0xf8] sm:$0xff] %vm510_vm0, %v1636_v10 }
 0x119   :  { %v806_v47 = vsel %vm510_vm0, %v728_v17, 0.0  ;;  %v816_v17 = vsel %vm510_vm0, %v733_v56, 0.0  ;;  %v818_v46 = vsel %vm510_vm0, %v734_v9, 0.0  ;;  %v739_v56 = vmul.f32 %v1489_v30, %v1489_v30 }
 0x11a   :  { %v608_v49 = vadd.f32 %v607_v45, %v606_v44  ;;  %v807_v50 = vadd.f32 %v806_v47, %v805_v40  ;;  %v617_v40 = vsel %vm510_vm0, %v1378_v12, 0.0  ;;  %v735_v44 = vmul.f32 %v1396_v15, %v1396_v15 }
 0x11b   :  { %v619_v47 = vsel %vm510_vm0, %v1396_v15, 0.0  ;;  %v621_v12 = vsel %vm510_vm0, %v1414_v18, 0.0 }
 0x11c   :  { %v610_v54 = vadd.f32 %v609_v52, %v608_v49  ;;  %v809_v38 = vadd.f32 %v808_v37, %v807_v50  ;;  %v736_v49 = vmul.f32 %v1414_v18, %v1414_v18  ;;  %v820_v52 = vsel %vm510_vm0, %v735_v44, 0.0 }
 0x11d   :  { %v623_v18 = vsel %vm510_vm0, %v1439_v22, 0.0 }
 0x11e   :  { %v612_v61 = vadd.f32 %v611_v58, %v610_v54  ;;  %v811_v1 = vadd.f32 %v810_v55, %v809_v38  ;;  %v1718_v54 = vpop.f32.mrf.mxu2  ;;  %v1720_v38 = vpop.f32.mrf.mxu3  ;;  %v822_v15 = vsel %vm510_vm0, %v736_v49, 0.0 }
 0x11f   :  { %557 = vst.msk [vmem:[%s1997_s2 + $0x170] sm:$0xff] %vm510_vm0, %v1718_v54 }
 0x120   :  { %v614_v7 = vadd.f32 %v613_v42, %v612_v61  ;;  %v813_v8 = vadd.f32 %v812_v2, %v811_v1  ;;  %569 = vst.msk [vmem:[%s1997_s2 + $0x1d0] sm:$0xff] %vm510_vm0, %v1720_v38  ;;  %v824_v2 = vsel %vm510_vm0, %v737_v33, 0.0  ;;  %v625_v42 = vsel %vm510_vm0, %v1464_v26, 0.0 }
 0x121   :  { %v629_v26 = vsel %vm510_vm0, %v1514_v34, 0.0 }
 0x122   :  { %v616_v11 = vadd.f32 %v615_v59, %v614_v7  ;;  %v815_v14 = vadd.f32 %v814_v51, %v813_v8  ;;  %v826_v8 = vsel %vm510_vm0, %v738_v60, 0.0  ;;  %v627_v51 = vsel %vm510_vm0, %v1489_v30, 0.0 }
 0x123   :  { %v740_v59 = vmul.f32 %v1514_v34, %v1514_v34  ;;  %v631_v34 = vsel %vm510_vm0, %v1539_v39, 0.0  ;;  %v745_v60 = vmul.f32 %v1338_v62, %v1338_v62 }
 0x124   :  { %v618_v3 = vadd.f32 %v617_v40, %v616_v11  ;;  %v817_v45 = vadd.f32 %v816_v17, %v815_v14  ;;  %v828_v14 = vsel %vm510_vm0, %v739_v56, 0.0  ;;  %v741_v17 = vmul.f32 %v1539_v39, %v1539_v39 }
 0x125   :  { %v830_v30 = vsel %vm510_vm0, %v740_v59, 0.0  ;;  %v746_v56 = vmul.f32 %v1358_v6, %v1358_v6  ;;  %v747_v59 = vmul.f32 %v1384_v13, %v1384_v13 }
 0x126   :  { %v819_v50 = vadd.f32 %v818_v46, %v817_v45  ;;  %v620_v37 = vadd.f32 %v619_v47, %v618_v3  ;;  %v1752_v40 = vpop.f32.mrf.mxu2  ;;  %v1754_v44 = vpop.f32.mrf.mxu3  ;;  %v742_v46 = vmul.f32 %v1571_v57, %v1571_v57 }
 0x127   :  { %558 = vst.msk [vmem:[%s1997_s2 + $0x178] sm:$0xff] %vm510_vm0, %v1752_v40 }
 0x128   :  { %v622_v55 = vadd.f32 %v621_v12, %v620_v37  ;;  %v821_v58 = vadd.f32 %v820_v52, %v819_v50  ;;  %570 = vst.msk [vmem:[%s1997_s2 + $0x1d8] sm:$0xff] %vm510_vm0, %v1754_v44  ;;  %v832_v50 = vsel %vm510_vm0, %v741_v17, 0.0  ;;  %v633_v37 = vsel %vm510_vm0, %v1571_v57, 0.0 }
 0x129   :  { %v743_v52 = vmul.f32 %v1604_v48, %v1604_v48  ;;  %v834_v33 = vsel %vm510_vm0, %v742_v46, 0.0 }
 0x12a   :  { %v624_v61 = vadd.f32 %v623_v18, %v622_v55  ;;  %v823_v1 = vadd.f32 %v822_v15, %v821_v58  ;;  %v635_v55 = vsel %vm510_vm0, %v1604_v48, 0.0  ;;  %v744_v58 = vmul.f32 %v1636_v10, %v1636_v10 }
 0x12b   :  { %v836_v57 = vsel %vm510_vm0, %v743_v52, 0.0  ;;  %v639_v48 = vsel %vm510_vm0, %v1338_v62, 0.0  ;;  %v643_v62 = vsel %vm510_vm0, %v1384_v13, 0.0 }
 0x12c   :  { %v626_v22 = vadd.f32 %v625_v42, %v624_v61  ;;  %v825_v7 = vadd.f32 %v824_v2, %v823_v1  ;;  %v637_v61 = vsel %vm510_vm0, %v1636_v10, 0.0 }
 0x12e   :  { %v628_v9 = vadd.f32 %v627_v51, %v626_v22  ;;  %v827_v11 = vadd.f32 %v826_v8, %v825_v7  ;;  %v1786_v1 = vpop.f32.mrf.mxu3  ;;  %v838_v22 = vsel %vm510_vm0, %v744_v58, 0.0  ;;  %v840_v8 = vsel %vm510_vm0, %v745_v60, 0.0 }
 0x12f   :  { %571 = vst.msk [vmem:[%s1997_s2 + $0x1e0] sm:$0xff] %vm510_vm0, %v1786_v1  ;;  %v641_v51 = vsel %vm510_vm0, %v1358_v6, 0.0  ;;  %v645_v6 = vsel %vm510_vm0, %v1402_v16, 0.0 }
 0x130   :  { %v630_v3 = vadd.f32 %v629_v26, %v628_v9  ;;  %v829_v45 = vadd.f32 %v828_v14, %v827_v11  ;;  %v842_v14 = vsel %vm510_vm0, %v746_v56, 0.0  ;;  %v748_v26 = vmul.f32 %v1402_v16, %v1402_v16 }
 0x131   :  { %v750_v16 = vmul.f32 %v1445_v23, %v1445_v23  ;;  %v655_v56 = vsel %vm510_vm0, %v1520_v35, 0.0 }
 0x132   :  { %v632_v47 = vadd.f32 %v631_v34, %v630_v3  ;;  %v831_v49 = vadd.f32 %v830_v30, %v829_v45  ;;  %v844_v45 = vsel %vm510_vm0, %v747_v59, 0.0  ;;  %v749_v30 = vmul.f32 %v1420_v19, %v1420_v19 }
 0x133   :  { %v846_v13 = vsel %vm510_vm0, %v748_v26, 0.0  ;;  %v850_v58 = vsel %vm510_vm0, %v750_v16, 0.0  ;;  %v665_v16 = vsel %vm510_vm0, %v1684_v4, 0.0 }
 0x134   :  { %v833_v39 = vadd.f32 %v832_v50, %v831_v49  ;;  %v634_v12 = vadd.f32 %v633_v37, %v632_v47  ;;  %v647_v49 = vsel %vm510_vm0, %v1420_v19, 0.0  ;;  %v848_v52 = vsel %vm510_vm0, %v749_v30, 0.0 }
 0x135   :  { %v651_v19 = vsel %vm510_vm0, %v1470_v27, 0.0 }
 0x136   :  { %v835_v15 = vadd.f32 %v834_v33, %v833_v39  ;;  %v636_v18 = vadd.f32 %v635_v55, %v634_v12  ;;  %v1813_v34 = vpop.f32.mrf.mxu3  ;;  %v649_v39 = vsel %vm510_vm0, %v1445_v23, 0.0  ;;  %v751_v12 = vmul.f32 %v1470_v27, %v1470_v27 }
 0x137   :  { %572 = vst.msk [vmem:[%s1997_s2 + $0x1e8] sm:$0xff] %vm510_vm0, %v1813_v34  ;;  %v653_v23 = vsel %vm510_vm0, %v1495_v31, 0.0 }
 0x138   :  { %v837_v2 = vadd.f32 %v836_v57, %v835_v15  ;;  %v638_v42 = vadd.f32 %v637_v61, %v636_v18  ;;  %v752_v15 = vmul.f32 %v1495_v31, %v1495_v31  ;;  %v852_v57 = vsel %vm510_vm0, %v751_v12, 0.0 }
 0x139   :  { %v753_v61 = vmul.f32 %v1520_v35, %v1520_v35  ;;  %v754_v31 = vmul.f32 %v1545_v41, %v1545_v41  ;;  %v659_v35 = vsel %vm510_vm0, %v1579_v63, 0.0  ;;  %v760_v12 = vmul.f32 %v1752_v40, %v1752_v40 }
 0x13a   :  { %v640_v7 = vadd.f32 %v639_v48, %v638_v42  ;;  %v839_v10 = vadd.f32 %v838_v22, %v837_v2  ;;  %v854_v27 = vsel %vm510_vm0, %v752_v15, 0.0 }
 0x13c   :  { %v642_v9 = vadd.f32 %v641_v51, %v640_v7  ;;  %v841_v11 = vadd.f32 %v840_v8, %v839_v10  ;;  %v856_v10 = vsel %vm510_vm0, %v753_v61, 0.0  ;;  %v657_v8 = vsel %vm510_vm0, %v1545_v41, 0.0 }
 0x13d   :  { %v755_v51 = vmul.f32 %v1579_v63, %v1579_v63  ;;  %v661_v41 = vsel %vm510_vm0, %v1612_v29, 0.0 }
 0x13e   :  { %v644_v17 = vadd.f32 %v643_v62, %v642_v9  ;;  %v843_v3 = vadd.f32 %v842_v14, %v841_v11  ;;  %v1840_v2 = vpop.f32.mrf.mxu3  ;;  %v858_v11 = vsel %vm510_vm0, %v754_v31, 0.0  ;;  %v756_v14 = vmul.f32 %v1612_v29, %v1612_v29 }
 0x13f   :  { %573 = vst.msk [vmem:[%s1997_s2 + $0x1f0] sm:$0xff] %vm510_vm0, %v1840_v2  ;;  %v758_v29 = vmul.f32 %v1684_v4, %v1684_v4 }
 0x140   :  { %v646_v46 = vadd.f32 %v645_v6, %v644_v17  ;;  %v845_v47 = vadd.f32 %v844_v45, %v843_v3  ;;  %v860_v17 = vsel %vm510_vm0, %v755_v51, 0.0  ;;  %v757_v3 = vmul.f32 %v1645_v21, %v1645_v21 }
 0x141   :  { %v862_v63 = vsel %vm510_vm0, %v756_v14, 0.0  ;;  %v766_v14 = vmul.f32 %v1547_v43, %v1547_v43 }
 0x142   :  { %v648_v50 = vadd.f32 %v647_v49, %v646_v46  ;;  %v847_v37 = vadd.f32 %v846_v13, %v845_v47  ;;  %v663_v46 = vsel %vm510_vm0, %v1645_v21, 0.0  ;;  %v864_v49 = vsel %vm510_vm0, %v757_v3, 0.0 }
 0x143   :  { %v667_v21 = vsel %vm510_vm0, %v1718_v54, 0.0 }
 0x144   :  { %v650_v33 = vadd.f32 %v649_v39, %v648_v50  ;;  %v849_v55 = vadd.f32 %v848_v52, %v847_v37  ;;  %v759_v50 = vmul.f32 %v1718_v54, %v1718_v54  ;;  %v866_v39 = vsel %vm510_vm0, %v758_v29, 0.0 }
 0x145   :  { %v762_v54 = vmul.f32 %v1447_v24, %v1447_v24 }
 0x146   :  { %v851_v18 = vadd.f32 %v850_v58, %v849_v55  ;;  %v652_v60 = vadd.f32 %v651_v19, %v650_v33  ;;  %v1867_v45 = vpop.f32.mrf.mxu3  ;;  %v761_v58 = vmul.f32 %v1422_v20, %v1422_v20  ;;  %v868_v4 = vsel %vm510_vm0, %v759_v50, 0.0 }
 0x147   :  { %574 = vst.msk [vmem:[%s1997_s2 + $0x1f8] sm:$0xff] %vm510_vm0, %v1867_v45  ;;  %v669_v19 = vsel %vm510_vm0, %v1752_v40, 0.0  ;;  %v673_v40 = vsel %vm510_vm0, %v1447_v24, 0.0  ;;  %v874_v31 = vsel %vm510_vm0, %v762_v54, 0.0  ;;  %v677_v24 = vsel %vm510_vm0, %v1497_v32, 0.0 }
 0x148   :  { %v654_v42 = vadd.f32 %v653_v23, %v652_v60  ;;  %v853_v48 = vadd.f32 %v852_v57, %v851_v18  ;;  %v671_v60 = vsel %vm510_vm0, %v1422_v20, 0.0  ;;  %v870_v57 = vsel %vm510_vm0, %v760_v12, 0.0 }
 0x149   :  { %v1149_v23 = vmov 0.0   ;;  %v872_v20 = vsel %vm510_vm0, %v761_v58, 0.0  ;;  %v771_v12 = vmul.f32 %v1720_v38, %v1720_v38 }
 0x14a   :  { %v656_v22 = vadd.f32 %v655_v56, %v654_v42  ;;  %v855_v7 = vadd.f32 %v854_v27, %v853_v48  ;;  %19 = vst.msk [vmem:[%s1998_s3] sm:$0x1] %vm18_vm1, %v1149_v23  ;;  %v763_v48 = vmul.f32 %v1472_v28, %v1472_v28 }
 0x14b   :  { %20 = vst.msk [vmem:[%s1999_s4] sm:$0x1] %vm18_vm1, %v1149_v23 }
 0x14c   :  { %v658_v59 = vadd.f32 %v657_v8, %v656_v22  ;;  %v857_v9 = vadd.f32 %v856_v10, %v855_v7  ;;  %v675_v22 = vsel %vm510_vm0, %v1472_v28, 0.0  ;;  %v764_v7 = vmul.f32 %v1497_v32, %v1497_v32 }
 0x14d   :  { %v876_v51 = vsel %vm510_vm0, %v763_v48, 0.0  ;;  %v679_v28 = vsel %vm510_vm0, %v1522_v36, 0.0  ;;  %v681_v32 = vsel %vm510_vm0, %v1547_v43, 0.0  ;;  %v685_v43 = vsel %vm510_vm0, %v1614_v53, 0.0 }
 0x14e   :  { %v660_v62 = vadd.f32 %v659_v35, %v658_v59  ;;  %v859_v26 = vadd.f32 %v858_v11, %v857_v9  ;;  %v765_v59 = vmul.f32 %v1522_v36, %v1522_v36  ;;  %v878_v35 = vsel %vm510_vm0, %v764_v7, 0.0 }
 0x14f   :  { %v683_v36 = vsel %vm510_vm0, %v1581_v0, 0.0  ;;  %v775_v48 = vmul.f32 %v1840_v2, %v1840_v2 }
 0x150   :  { %v662_v6 = vadd.f32 %v661_v41, %v660_v62  ;;  %v861_v30 = vadd.f32 %v860_v17, %v859_v26  ;;  %v880_v17 = vsel %vm510_vm0, %v765_v59, 0.0  ;;  %v767_v41 = vmul.f32 %v1581_v0, %v1581_v0 }
 0x151   :  { %v687_v0 = vsel %vm510_vm0, %v1647_v25, 0.0 }
 0x152   :  { %v863_v47 = vadd.f32 %v862_v63, %v861_v30  ;;  %v664_v13 = vadd.f32 %v663_v46, %v662_v6  ;;  %v882_v30 = vsel %vm510_vm0, %v766_v14, 0.0  ;;  %v768_v63 = vmul.f32 %v1614_v53, %v1614_v53 }
 0x153   :  { %v689_v53 = vsel %vm510_vm0, %v1686_v5, 0.0 }
 0x154   :  { %v865_v37 = vadd.f32 %v864_v49, %v863_v47  ;;  %v666_v52 = vadd.f32 %v665_v16, %v664_v13  ;;  %v884_v47 = vsel %vm510_vm0, %v767_v41, 0.0  ;;  %v769_v13 = vmul.f32 %v1647_v25, %v1647_v25  ;;  %v575_v41 = vld [vmem:[%s1998_s3] sm:$0x1] }
 0x155   :  { %v886_v50 = vsel %vm510_vm0, %v768_v63, 0.0  ;;  %v691_v25 = vsel %vm510_vm0, %v1720_v38, 0.0  ;;  %v695_v38 = vsel %vm510_vm0, %v1786_v1, 0.0 }
 0x156   :  { %v867_v33 = vadd.f32 %v866_v39, %v865_v37  ;;  %v668_v55 = vadd.f32 %v667_v21, %v666_v52  ;;  %v770_v37 = vmul.f32 %v1686_v5, %v1686_v5  ;;  %v888_v21 = vsel %vm510_vm0, %v769_v13, 0.0 }
 0x157   :  { %v693_v5 = vsel %vm510_vm0, %v1754_v44, 0.0 }
 0x158   :  { %v869_v15 = vadd.f32 %v868_v4, %v867_v33  ;;  %v670_v18 = vadd.f32 %v669_v19, %v668_v55  ;;  %v890_v58 = vsel %vm510_vm0, %v770_v37, 0.0  ;;  %v772_v4 = vmul.f32 %v1754_v44, %v1754_v44 }
 0x159   :  { %v697_v44 = vsel %vm510_vm0, %v1813_v34, 0.0 }
 0x15a   :  { %v672_v61 = vadd.f32 %v671_v60, %v670_v18  ;;  %v871_v42 = vadd.f32 %v870_v57, %v869_v15  ;;  %v892_v18 = vsel %vm510_vm0, %v771_v12, 0.0  ;;  %v773_v60 = vmul.f32 %v1786_v1, %v1786_v1 }
 0x15b   :  { %v894_v23 = vsel %vm510_vm0, %v772_v4, 0.0  ;;  %v699_v1 = vsel %vm510_vm0, %v1840_v2, 0.0 }
 0x15c   :  { %v674_v27 = vadd.f32 %v673_v40, %v672_v61  ;;  %v873_v56 = vadd.f32 %v872_v20, %v871_v42  ;;  %v774_v61 = vmul.f32 %v1813_v34, %v1813_v34  ;;  %v896_v40 = vsel %vm510_vm0, %v773_v60, 0.0 }
 0x15d   :  { %v701_v34 = vsel %vm510_vm0, %v1867_v45, 0.0 }
 0x15e   :  { %v676_v10 = vadd.f32 %v675_v22, %v674_v27  ;;  %v875_v8 = vadd.f32 %v874_v31, %v873_v56  ;;  %v898_v31 = vsel %vm510_vm0, %v774_v61, 0.0  ;;  %v776_v22 = vmul.f32 %v1867_v45, %v1867_v45 }
 0x160   :  { %v678_v9 = vadd.f32 %v677_v24, %v676_v10  ;;  %v877_v11 = vadd.f32 %v876_v51, %v875_v8  ;;  %v900_v8 = vsel %vm510_vm0, %v775_v48, 0.0  ;;  %v902_v59 = vsel %vm510_vm0, %v776_v22, 0.0 }
 0x162   :  { %v680_v62 = vadd.f32 %v679_v28, %v678_v9  ;;  %v879_v26 = vadd.f32 %v878_v35, %v877_v11 }
 0x164   :  { %v682_v3 = vadd.f32 %v681_v32, %v680_v62  ;;  %v881_v6 = vadd.f32 %v880_v17, %v879_v26 }
 0x166   :  { %v883_v46 = vadd.f32 %v882_v30, %v881_v6  ;;  %v684_v29 = vadd.f32 %v683_v36, %v682_v3  ;;  %v712_v6 = vld [vmem:[%s1999_s4] sm:$0x1] }
 0x168   :  { %v686_v49 = vadd.f32 %v685_v43, %v684_v29  ;;  %v885_v16 = vadd.f32 %v884_v47, %v883_v46 }
 0x16a   :  { %v688_v52 = vadd.f32 %v687_v0, %v686_v49  ;;  %v887_v39 = vadd.f32 %v886_v50, %v885_v16 }
 0x16c   :  { %v690_v33 = vadd.f32 %v689_v53, %v688_v52  ;;  %v889_v55 = vadd.f32 %v888_v21, %v887_v39 }
 0x16e   :  { %v692_v19 = vadd.f32 %v691_v25, %v690_v33  ;;  %v891_v15 = vadd.f32 %v890_v58, %v889_v55 }
 0x170   :  { %v694_v54 = vadd.f32 %v693_v5, %v692_v19  ;;  %v893_v57 = vadd.f32 %v892_v18, %v891_v15 }
 0x172   :  { %v895_v42 = vadd.f32 %v894_v23, %v893_v57  ;;  %v696_v20 = vadd.f32 %v695_v38, %v694_v54 }
 0x174   :  { %v897_v27 = vadd.f32 %v896_v40, %v895_v42  ;;  %v698_v56 = vadd.f32 %v697_v44, %v696_v20 }
 0x176   :  { %v899_v7 = vadd.f32 %v898_v31, %v897_v27  ;;  %v700_v10 = vadd.f32 %v699_v1, %v698_v56 }
 0x178   :  { %v901_v51 = vadd.f32 %v900_v8, %v899_v7  ;;  %v702_v24 = vadd.f32 %v701_v34, %v700_v10 }
 0x17a   :  { %v703_v9 = vrot.slane %v702_v24, 4  ;;  %v903_v11 = vadd.f32 %v902_v59, %v901_v51 }
 0x17c   :  { %v704_v35 = vadd.f32 %v703_v9, %v702_v24  ;;  %v904_v28 = vrot.slane %v903_v11, 4 }
 0x17e   :  { %v705_v14 = vrot.slane %v704_v35, 2  ;;  %v905_v2 = vadd.f32 %v904_v28, %v903_v11 }
 0x180   :  { %v706_v62 = vadd.f32 %v705_v14, %v704_v35  ;;  %v906_v26 = vrot.slane %v905_v2, 2 }
 0x182   :  { %v707_v17 = vrot.slane %v706_v62, 1  ;;  %v907_v32 = vadd.f32 %v906_v26, %v905_v2 }
 0x184   :  { %v708_v3 = vadd.f32 %v707_v17, %v706_v62  ;;  %v908_v45 = vrot.slane %v907_v32, 1 }
 0x186   :  { %v709_v30 = vadd.f32 %v708_v3, %v575_v41  ;;  %v909_v36 = vadd.f32 %v908_v45, %v907_v32 }
 0x188   :  { %711 = vst.msk [vmem:[%s1998_s3] sm:$0x1] %vm18_vm1, %v709_v30  ;;  %v910_v63 = vadd.f32 %v909_v36, %v712_v6 }
 0x18a   :  { %911 = vst.msk [vmem:[%s1999_s4] sm:$0x1] %vm18_vm1, %v910_v63 }

// kernel: tile.33
= control target key start
LH: loop header
LB: loop body
LE: loop exit
PB: predicated region body
PF: predicated region fallthrough
CT: control target
= control target key end

     0   :  { %s22_s0 = inlined_call_operand.vmem [shape: f32[16], index: 0, kind: input, shape index: {}]   ;;  %s23_s1 = inlined_call_operand.vmem [shape: f32[8,16], index: 1, kind: output, shape index: {}]  }
   0x1   :  { %v4_v0 = vld [vmem:[%s22_s0] ss:$0 sm:$0xff] }
   0x2   :  { %5 = vst [vmem:[%s23_s1] sm:$0xff] %v4_v0 }

// kernel: tile.34
= control target key start
LH: loop header
LB: loop body
LE: loop exit
PB: predicated region body
PF: predicated region fallthrough
CT: control target
= control target key end

     0   :  { %s67_s10 = smov 112   ;;  %s68_s11 = smov 80   ;;  %vm3_vm0 = vcmask 130048   ;;  %vm9_vm1 = vcmask 1048448   ;;  %vm15_vm2 = vcmask 917248   ;;  %vm21_vm3 = vcmask 786048   ;;  %s111_s0 = inlined_call_operand.vmem [shape: f32[8,16], index: 0, kind: input, shape index: {}]   ;;  %s112_s1 = inlined_call_operand.vmem [shape: f32[1,128], index: 1, kind: output, shape index: {}]  }
   0x1   :  { %v53_v0 = vld [vmem:[%s111_s0 + $0x7] sm:$0x1]   ;;  %v55_v1 = vld [vmem:[%s111_s0 + $0x5] sm:$0x1]   ;;  %v57_v2 = vld [vmem:[%s111_s0 + $0x3] sm:$0x1]  }
   0x2   :  { %7 = vrot.lane.b32.xlu0 %v53_v0, %s67_s10  ;;  %19 = vrot.lane.b32.xlu1 %v55_v1, %s68_s11  ;;  %s69_s14 = smov 48   ;;  %v54_v3 = vld [vmem:[%s111_s0 + $0x6] sm:$0x1]   ;;  %v56_v4 = vld [vmem:[%s111_s0 + $0x4] sm:$0x1]   ;;  %s70_s21 = smov 96  }
   0x3   :  { %31 = vrot.lane.b32.xlu2 %v57_v2, %s69_s14  ;;  %v58_v5 = vld [vmem:[%s111_s0 + $0x2] sm:$0x1]   ;;  %s71_s22 = smov 64   ;;  %s72_s23 = smov 32   ;;  %v59_v6 = vld [vmem:[%s111_s0 + $0x1] sm:$0x1]  }
   0x4   :  { %s73_s26 = smov 16   ;;  %v2_v7 = vld [vmem:[%s111_s0] sm:$0x1]   ;;  %vm27_vm4 = vcmask 654848   ;;  %vm33_vm5 = vcmask 523648   ;;  %vm39_vm6 = vcmask 392448  }
   0x5   :  { %4 = vst.msk [vmem:[#allocation0] sm:$0x1] %vm3_vm0, %v2_v7   ;;  %vm45_vm7 = vcmask 261248  }
   0xa   :  { %13 = vrot.lane.b32.xlu0 %v54_v3, %s70_s21  ;;  %25 = vrot.lane.b32.xlu1 %v56_v4, %s71_s22 }
   0xb   :  { %37 = vrot.lane.b32.xlu2 %v58_v5, %s72_s23 }
  0x12   :  { %43 = vrot.lane.b32.xlu0 %v59_v6, %s73_s26 }
  0x5d   :  { %v32_v8 = vpop.permute.xlu2 %31  }
  0x65   :  { %v38_v9 = vpop.permute.xlu2 %37  }
  0x74   :  { %v8_v10 = vpop.permute.xlu0 %7   ;;  %v20_v11 = vpop.permute.xlu1 %19  }
  0x75   :  { %10 = vst.msk [vmem:[#allocation0] sm:$0x1] %vm9_vm1, %v8_v10  }
  0x7c   :  { %v14_v12 = vpop.permute.xlu0 %13   ;;  %v26_v13 = vpop.permute.xlu1 %25  }
  0x7d   :  { %16 = vst.msk [vmem:[#allocation0] sm:$0x1] %vm15_vm2, %v14_v12  }
  0x7e   :  { %22 = vst.msk [vmem:[#allocation0] sm:$0x1] %vm21_vm3, %v20_v11  }
  0x7f   :  { %28 = vst.msk [vmem:[#allocation0] sm:$0x1] %vm27_vm4, %v26_v13  }
  0x80   :  { %34 = vst.msk [vmem:[#allocation0] sm:$0x1] %vm33_vm5, %v32_v8  }
  0x81   :  { %40 = vst.msk [vmem:[#allocation0] sm:$0x1] %vm39_vm6, %v38_v9  }
  0x84   :  { %v44_v14 = vpop.permute.xlu0 %43  }
  0x85   :  { %46 = vst.msk [vmem:[#allocation0] sm:$0x1] %vm45_vm7, %v44_v14  }
  0x8c   :  { %v49_v15 = vld [vmem:[#allocation0] sm:$0x1] }
  0x8d   :  { %52 = vst [vmem:[%s112_s1] sm:$0x1] %v49_v15 }

// kernel: discriminator_forward.10
= control target key start
LH: loop header
LB: loop body
LE: loop exit
PB: predicated region body
PF: predicated region fallthrough
CT: control target
= control target key end

     0   :  { %s158_s0 = inlined_call_operand.vmem [shape: f32[64,128], index: 0, kind: input, shape index: {}]   ;;  %s159_s1 = inlined_call_operand.vmem [shape: f32[1,128], index: 1, kind: input, shape index: {}]   ;;  %s160_s2 = inlined_call_operand.vmem [shape: f32[1,128], index: 2, kind: input, shape index: {}]   ;;  %s161_s3 = inlined_call_operand.vmem [shape: f32[64,128], index: 3, kind: output, shape index: {}]  }
   0x1   :  { %v14_v0 = vld [vmem:[%s158_s0] sm:$0xff]  ;;  %v15_v3 = vld [vmem:[%s158_s0 + $0x8] sm:$0xff]  ;;  %v16_v6 = vld [vmem:[%s158_s0 + $0x10] sm:$0xff] }
   0x2   :  { %v82_v1 = vld [vmem:[%s159_s1] ss:$0 sm:$0xff]  ;;  %v17_v7 = vld [vmem:[%s158_s0 + $0x18] sm:$0xff]  ;;  %v19_v12 = vld [vmem:[%s158_s0 + $0x28] sm:$0xff] }
   0x3   :  { %v83_v2 = vld [vmem:[%s160_s2] ss:$0 sm:$0xff]  ;;  %v26_v4 = vmul.f32 %v82_v1, %v14_v0  ;;  %v27_v5 = vmul.f32 %v82_v1, %v15_v3  ;;  %v28_v9 = vmul.f32 %v82_v1, %v16_v6  ;;  %v29_v10 = vmul.f32 %v82_v1, %v17_v7  ;;  %v20_v13 = vld [vmem:[%s158_s0 + $0x30] sm:$0xff]  ;;  %v21_v14 = vld [vmem:[%s158_s0 + $0x38] sm:$0xff] }
   0x4   :  { %v18_v8 = vld [vmem:[%s158_s0 + $0x20] sm:$0xff]  ;;  %v31_v17 = vmul.f32 %v82_v1, %v19_v12  ;;  %v32_v18 = vmul.f32 %v82_v1, %v20_v13  ;;  %v33_v22 = vmul.f32 %v82_v1, %v21_v14 }
   0x5   :  { %v30_v11 = vmul.f32 %v82_v1, %v18_v8  ;;  %v38_v15 = vadd.f32 %v83_v2, %v26_v4  ;;  %v39_v16 = vadd.f32 %v83_v2, %v27_v5  ;;  %v40_v19 = vadd.f32 %v83_v2, %v28_v9 }
   0x6   :  { %v41_v20 = vadd.f32 %v83_v2, %v29_v10  ;;  %v43_v32 = vadd.f32 %v83_v2, %v31_v17  ;;  %v44_v33 = vadd.f32 %v83_v2, %v32_v18  ;;  %v45_v35 = vadd.f32 %v83_v2, %v33_v22 }
   0x7   :  { %v42_v21 = vadd.f32 %v83_v2, %v30_v11  ;;  %vm46_vm0 = vcmp.gt.f32.partialorder %v38_v15, 0.0  ;;  %v54_v23 = vmul.f32 0.2, %v38_v15  ;;  %vm47_vm1 = vcmp.gt.f32.partialorder %v39_v16, 0.0 }
   0x8   :  { %v55_v24 = vmul.f32 0.2, %v39_v16  ;;  %vm48_vm2 = vcmp.gt.f32.partialorder %v40_v19, 0.0  ;;  %v56_v25 = vmul.f32 0.2, %v40_v19  ;;  %vm49_vm3 = vcmp.gt.f32.partialorder %v41_v20, 0.0 }
   0x9   :  { %v57_v26 = vmul.f32 0.2, %v41_v20  ;;  %v62_v27 = vsel %vm46_vm0, %v38_v15, %v54_v23  ;;  %vm50_vm4 = vcmp.gt.f32.partialorder %v42_v21, 0.0  ;;  %v58_v29 = vmul.f32 0.2, %v42_v21 }
   0xa   :  { %v63_v28 = vsel %vm47_vm1, %v39_v16, %v55_v24  ;;  %70 = vst [vmem:[%s161_s3] sm:$0xff] %v62_v27  ;;  %v64_v30 = vsel %vm48_vm2, %v40_v19, %v56_v25  ;;  %vm51_vm5 = vcmp.gt.f32.partialorder %v43_v32, 0.0  ;;  %v59_v36 = vmul.f32 0.2, %v43_v32 }
   0xb   :  { %v65_v31 = vsel %vm49_vm3, %v41_v20, %v57_v26  ;;  %71 = vst [vmem:[%s161_s3 + $0x8] sm:$0xff] %v63_v28  ;;  %v66_v34 = vsel %vm50_vm4, %v42_v21, %v58_v29  ;;  %vm52_vm6 = vcmp.gt.f32.partialorder %v44_v33, 0.0  ;;  %v60_v37 = vmul.f32 0.2, %v44_v33 }
   0xc   :  { %72 = vst [vmem:[%s161_s3 + $0x10] sm:$0xff] %v64_v30  ;;  %vm53_vm7 = vcmp.gt.f32.partialorder %v45_v35, 0.0  ;;  %v61_v38 = vmul.f32 0.2, %v45_v35  ;;  %v67_v39 = vsel %vm51_vm5, %v43_v32, %v59_v36 }
   0xd   :  { %73 = vst [vmem:[%s161_s3 + $0x18] sm:$0xff] %v65_v31  ;;  %v68_v40 = vsel %vm52_vm6, %v44_v33, %v60_v37 }
   0xe   :  { %74 = vst [vmem:[%s161_s3 + $0x20] sm:$0xff] %v66_v34  ;;  %v69_v41 = vsel %vm53_vm7, %v45_v35, %v61_v38 }
   0xf   :  { %75 = vst [vmem:[%s161_s3 + $0x28] sm:$0xff] %v67_v39 }
  0x10   :  { %76 = vst [vmem:[%s161_s3 + $0x30] sm:$0xff] %v68_v40 }
  0x11   :  { %77 = vst [vmem:[%s161_s3 + $0x38] sm:$0xff] %v69_v41 }

// kernel: discriminator_forward.11
= control target key start
LH: loop header
LB: loop body
LE: loop exit
PB: predicated region body
PF: predicated region fallthrough
CT: control target
= control target key end

     0   :  { %vm343_vm0 = vcmask 261120   ;;  %vm18_vm1 = vcmask 253952   ;;  %s970_s1 = inlined_call_operand.vmem [shape: bf16[256,32], index: 1, kind: input, shape index: {}]   ;;  %s971_s0 = inlined_call_operand.vmem [shape: bf16[128,256], index: 0, kind: input, shape index: {}]   ;;  %s972_s2 = inlined_call_operand.vmem [shape: f32[128,32], index: 2, kind: output, shape index: {0}]   ;;  %s973_s3 = inlined_call_operand.vmem [shape: f32[1,32], index: 3, kind: output, shape index: {1}]   ;;  %s974_s4 = inlined_call_operand.vmem [shape: f32[1,32], index: 4, kind: output, shape index: {2}]  }
   0x1   :  { %v620_v0 = vld [vmem:[%s970_s1 + $0x38] sm:$0xff]  ;;  %v619_v2 = vld [vmem:[%s970_s1 + $0x30] sm:$0xff]  ;;  %v618_v4 = vld [vmem:[%s970_s1 + $0x28] sm:$0xff] }
   0x2   :  { %v628_v1 = vld [vmem:[%s970_s1 + $0x78] sm:$0xff]  ;;  %245 = vmatpush.bf16.msra.mxu0 %v620_v0  ;;  %v627_v3 = vld [vmem:[%s970_s1 + $0x70] sm:$0xff]  ;;  %629 = vmatpush.bf16.msra.mxu2 %v620_v0  ;;  %v626_v5 = vld [vmem:[%s970_s1 + $0x68] sm:$0xff] }
   0x3   :  { %294 = vmatpush.bf16.msra.mxu1 %v628_v1  ;;  %637 = vmatpush.bf16.msra.mxu3 %v628_v1  ;;  %v617_v6 = vld [vmem:[%s970_s1 + $0x20] sm:$0xff]  ;;  %v616_v8 = vld [vmem:[%s970_s1 + $0x18] sm:$0xff]  ;;  %v615_v10 = vld [vmem:[%s970_s1 + $0x10] sm:$0xff] }
   0x4   :  { %v625_v7 = vld [vmem:[%s970_s1 + $0x60] sm:$0xff]  ;;  %v624_v9 = vld [vmem:[%s970_s1 + $0x58] sm:$0xff]  ;;  %v623_v11 = vld [vmem:[%s970_s1 + $0x50] sm:$0xff] }
   0x5   :  { %v614_v12 = vld [vmem:[%s970_s1 + $0x8] sm:$0xff]  ;;  %v613_v14 = vld [vmem:[%s970_s1] sm:$0xff]  ;;  %v479_v28 = vld [vmem:[%s971_s0 + $0x10] sm:$0xf] }
   0x6   :  { %246 = vmatpush.bf16.msra.mxu0 %v619_v2  ;;  %630 = vmatpush.bf16.msra.mxu2 %v619_v2  ;;  %v622_v13 = vld [vmem:[%s970_s1 + $0x48] sm:$0xff]  ;;  %v621_v15 = vld [vmem:[%s970_s1 + $0x40] sm:$0xff]  ;;  %v600_v29 = vld [vmem:[%s971_s0 + $0x14] sm:$0xf0] }
   0x7   :  { %295 = vmatpush.bf16.msra.mxu1 %v627_v3  ;;  %638 = vmatpush.bf16.msra.mxu3 %v627_v3  ;;  %v471_v16 = vld [vmem:[%s971_s0] sm:$0xf]  ;;  %v598_v17 = vld [vmem:[%s971_s0 + $0x4] sm:$0xf0]  ;;  %v597_v18 = vld [vmem:[%s971_s0 + $0x4] sm:$0xf]  ;;  %v480_v36 = vor.u32 %v600_v29, %v479_v28 }
   0x8   :  { %v473_v19 = vld [vmem:[%s971_s0 + $0x8] sm:$0xf0]  ;;  %v503_v20 = vld [vmem:[%s971_s0 + $0x40] sm:$0xf]  ;;  %v606_v21 = vld [vmem:[%s971_s0 + $0x44] sm:$0xf0]  ;;  %v472_v24 = vor.u32 %v598_v17, %v471_v16 }
   0x9   :  { %v605_v22 = vld [vmem:[%s971_s0 + $0x44] sm:$0xf]  ;;  %v505_v23 = vld [vmem:[%s971_s0 + $0x48] sm:$0xf0]  ;;  %v476_v25 = vor.u32 %v597_v18, %v473_v19  ;;  %v504_v26 = vor.u32 %v606_v21, %v503_v20  ;;  %v599_v30 = vld [vmem:[%s971_s0 + $0x14] sm:$0xf] }
   0xa   :  { %247 = vmatpush.bf16.msra.mxu0 %v618_v4  ;;  %631 = vmatpush.bf16.msra.mxu2 %v618_v4  ;;  %v508_v27 = vor.u32 %v605_v22, %v505_v23  ;;  %v481_v31 = vld [vmem:[%s971_s0 + $0x18] sm:$0xf0]  ;;  %v511_v32 = vld [vmem:[%s971_s0 + $0x50] sm:$0xf]  ;;  %v608_v33 = vld [vmem:[%s971_s0 + $0x54] sm:$0xf0] }
   0xb   :  { %296 = vmatpush.bf16.msra.mxu1 %v626_v5  ;;  %639 = vmatpush.bf16.msra.mxu3 %v626_v5  ;;  %v607_v34 = vld [vmem:[%s971_s0 + $0x54] sm:$0xf]  ;;  %v513_v35 = vld [vmem:[%s971_s0 + $0x58] sm:$0xf0]  ;;  %v484_v37 = vor.u32 %v599_v30, %v481_v31  ;;  %v512_v38 = vor.u32 %v608_v33, %v511_v32  ;;  %v487_v40 = vld [vmem:[%s971_s0 + $0x20] sm:$0xf] }
   0xc   :  { %v516_v39 = vor.u32 %v607_v34, %v513_v35  ;;  %v602_v41 = vld [vmem:[%s971_s0 + $0x24] sm:$0xf0]  ;;  %v601_v42 = vld [vmem:[%s971_s0 + $0x24] sm:$0xf]  ;;  %v489_v43 = vld [vmem:[%s971_s0 + $0x28] sm:$0xf0] }
   0xd   :  { %v519_v44 = vld [vmem:[%s971_s0 + $0x60] sm:$0xf]  ;;  %v610_v45 = vld [vmem:[%s971_s0 + $0x64] sm:$0xf0]  ;;  %v609_v46 = vld [vmem:[%s971_s0 + $0x64] sm:$0xf]  ;;  %v488_v48 = vor.u32 %v602_v41, %v487_v40  ;;  %v492_v49 = vor.u32 %v601_v42, %v489_v43 }
   0xe   :  { %248 = vmatpush.bf16.msra.mxu0 %v617_v6  ;;  %632 = vmatpush.bf16.msra.mxu2 %v617_v6  ;;  %v521_v47 = vld [vmem:[%s971_s0 + $0x68] sm:$0xf0]  ;;  %v520_v50 = vor.u32 %v610_v45, %v519_v44  ;;  %v495_v52 = vld [vmem:[%s971_s0 + $0x30] sm:$0xf]  ;;  %v604_v53 = vld [vmem:[%s971_s0 + $0x34] sm:$0xf0] }
   0xf   :  { %297 = vmatpush.bf16.msra.mxu1 %v625_v7  ;;  %640 = vmatpush.bf16.msra.mxu3 %v625_v7  ;;  %v524_v51 = vor.u32 %v609_v46, %v521_v47  ;;  %v603_v54 = vld [vmem:[%s971_s0 + $0x34] sm:$0xf]  ;;  %v497_v55 = vld [vmem:[%s971_s0 + $0x38] sm:$0xf0]  ;;  %v527_v56 = vld [vmem:[%s971_s0 + $0x70] sm:$0xf]  ;;  %v496_v60 = vor.u32 %v604_v53, %v495_v52 }
  0x10   :  { %v612_v57 = vld [vmem:[%s971_s0 + $0x74] sm:$0xf0]  ;;  %v611_v58 = vld [vmem:[%s971_s0 + $0x74] sm:$0xf]  ;;  %v529_v59 = vld [vmem:[%s971_s0 + $0x78] sm:$0xf0]  ;;  %v500_v61 = vor.u32 %v603_v54, %v497_v55 }
  0x11   :  { %v528_v62 = vor.u32 %v612_v57, %v527_v56  ;;  %v532_v63 = vor.u32 %v611_v58, %v529_v59 }
  0x12   :  { %249 = vmatpush.bf16.msra.mxu0 %v616_v8  ;;  %633 = vmatpush.bf16.msra.mxu2 %v616_v8 }
  0x13   :  { %298 = vmatpush.bf16.msra.mxu1 %v624_v9  ;;  %641 = vmatpush.bf16.msra.mxu3 %v624_v9 }
  0x16   :  { %250 = vmatpush.bf16.msra.mxu0 %v615_v10  ;;  %634 = vmatpush.bf16.msra.mxu2 %v615_v10 }
  0x17   :  { %299 = vmatpush.bf16.msra.mxu1 %v623_v11  ;;  %642 = vmatpush.bf16.msra.mxu3 %v623_v11 }
  0x1a   :  { %251 = vmatpush.bf16.msra.mxu0 %v614_v12  ;;  %635 = vmatpush.bf16.msra.mxu2 %v614_v12 }
  0x1b   :  { %300 = vmatpush.bf16.msra.mxu1 %v622_v13  ;;  %643 = vmatpush.bf16.msra.mxu3 %v622_v13 }
  0x1e   :  { %252 = vmatpush.bf16.msra.mxu0 %v613_v14  ;;  %636 = vmatpush.bf16.msra.mxu2 %v613_v14 }
  0x1f   :  { %301 = vmatpush.bf16.msra.mxu1 %v621_v15  ;;  %644 = vmatpush.bf16.msra.mxu3 %v621_v15 }
  0x21   :  { %253 = vmatmul.bf16.vlgmr.msra.gmra.mxu0 %v472_v24  ;;  %273 = vmatmul.bf16.vlgmr.msra.gmra.mxu2 %v504_v26 }
  0x22   :  { %302 = vmatmul.bf16.vlgmr.msra.gmra.mxu1 %v476_v25  ;;  %322 = vmatmul.bf16.vlgmr.msra.gmra.mxu3 %v508_v27 }
  0x31   :  { %258 = vmatmul.bf16.gmra.mxu0 %v480_v36  ;;  %278 = vmatmul.bf16.gmra.mxu2 %v512_v38 }
  0x32   :  { %307 = vmatmul.bf16.gmra.mxu1 %v484_v37  ;;  %327 = vmatmul.bf16.gmra.mxu3 %v516_v39  ;;  %v646_v37 = vmov 0.0  }
  0x33   :  { %19 = vst.msk [vmem:[%s973_s3] sm:$0x1] %vm18_vm1, %v646_v37 }
  0x34   :  { %20 = vst.msk [vmem:[%s974_s4] sm:$0x1] %vm18_vm1, %v646_v37 }
  0x41   :  { %263 = vmatmul.bf16.gmra.mxu0 %v488_v48  ;;  %283 = vmatmul.bf16.gmra.mxu2 %v520_v50 }
  0x42   :  { %312 = vmatmul.bf16.gmra.mxu1 %v492_v49  ;;  %332 = vmatmul.bf16.gmra.mxu3 %v524_v51 }
  0x51   :  { %268 = vmatmul.bf16.gmra.mxu0 %v496_v60  ;;  %288 = vmatmul.bf16.gmra.mxu2 %v528_v62 }
  0x52   :  { %317 = vmatmul.bf16.gmra.mxu1 %v500_v61  ;;  %337 = vmatmul.bf16.gmra.mxu3 %v532_v63 }
  0x9e   :  { %v254_v0 = vpop.f32.mrf.mxu0 }
  0x9f   :  { %v303_v1 = vpop.f32.mrf.mxu1 }
  0xa0   :  { %v304_v2 = vadd.f32 %v303_v1, %v254_v0 }
  0xa2   :  { %344 = vst.msk [vmem:[%s972_s2] sm:$0xff] %vm343_vm0, %v304_v2  ;;  %v402_v34 = vmul.f32 %v304_v2, %v304_v2  ;;  %v361_v38 = vsel %vm343_vm0, %v304_v2, 0.0 }
  0xa4   :  { %v274_v3 = vpop.f32.mrf.mxu2  ;;  %v418_v44 = vsel %vm343_vm0, %v402_v34, 0.0 }
  0xa5   :  { %v323_v4 = vpop.f32.mrf.mxu3 }
  0xa6   :  { %v256_v5 = vpop.f32.mrf.mxu0  ;;  %v820_v7 = vadd.f32 %v323_v4, %v274_v3 }
  0xa7   :  { %v305_v6 = vpop.f32.mrf.mxu1 }
  0xa8   :  { %v306_v8 = vadd.f32 %v305_v6, %v256_v5  ;;  %352 = vst.msk [vmem:[%s972_s2 + $0x40] sm:$0xff] %vm343_vm0, %v820_v7 }
  0xaa   :  { %345 = vst.msk [vmem:[%s972_s2 + $0x8] sm:$0xff] %vm343_vm0, %v306_v8  ;;  %v403_v33 = vmul.f32 %v306_v8, %v306_v8  ;;  %v362_v35 = vsel %vm343_vm0, %v306_v8, 0.0 }
  0xab   :  { %v363_v45 = vadd.f32 %v362_v35, %v361_v38 }
  0xac   :  { %v276_v9 = vpop.f32.mrf.mxu2  ;;  %v419_v39 = vsel %vm343_vm0, %v403_v33, 0.0 }
  0xad   :  { %v325_v10 = vpop.f32.mrf.mxu3  ;;  %v420_v53 = vadd.f32 %v419_v39, %v418_v44 }
  0xae   :  { %v259_v11 = vpop.f32.mrf.mxu0  ;;  %v831_v13 = vadd.f32 %v325_v10, %v276_v9 }
  0xaf   :  { %v308_v12 = vpop.f32.mrf.mxu1 }
  0xb0   :  { %v309_v14 = vadd.f32 %v308_v12, %v259_v11  ;;  %353 = vst.msk [vmem:[%s972_s2 + $0x48] sm:$0xff] %vm343_vm0, %v831_v13 }
  0xb2   :  { %346 = vst.msk [vmem:[%s972_s2 + $0x10] sm:$0xff] %vm343_vm0, %v309_v14  ;;  %v404_v36 = vmul.f32 %v309_v14, %v309_v14  ;;  %v364_v40 = vsel %vm343_vm0, %v309_v14, 0.0 }
  0xb3   :  { %v365_v54 = vadd.f32 %v364_v40, %v363_v45 }
  0xb4   :  { %v279_v15 = vpop.f32.mrf.mxu2  ;;  %v421_v49 = vsel %vm343_vm0, %v404_v36, 0.0 }
  0xb5   :  { %v328_v16 = vpop.f32.mrf.mxu3  ;;  %v422_v58 = vadd.f32 %v421_v49, %v420_v53 }
  0xb6   :  { %v261_v17 = vpop.f32.mrf.mxu0  ;;  %v842_v19 = vadd.f32 %v328_v16, %v279_v15  ;;  %v410_v16 = vmul.f32 %v820_v7, %v820_v7 }
  0xb7   :  { %v310_v18 = vpop.f32.mrf.mxu1 }
  0xb8   :  { %v311_v20 = vadd.f32 %v310_v18, %v261_v17  ;;  %354 = vst.msk [vmem:[%s972_s2 + $0x50] sm:$0xff] %vm343_vm0, %v842_v19  ;;  %v380_v37 = vsel %vm343_vm0, %v842_v19, 0.0 }
  0xba   :  { %347 = vst.msk [vmem:[%s972_s2 + $0x18] sm:$0xff] %vm343_vm0, %v311_v20  ;;  %v405_v41 = vmul.f32 %v311_v20, %v311_v20  ;;  %v366_v50 = vsel %vm343_vm0, %v311_v20, 0.0 }
  0xbb   :  { %v367_v59 = vadd.f32 %v366_v50, %v365_v54 }
  0xbc   :  { %v281_v21 = vpop.f32.mrf.mxu2  ;;  %v423_v55 = vsel %vm343_vm0, %v405_v41, 0.0 }
  0xbd   :  { %v330_v22 = vpop.f32.mrf.mxu3  ;;  %v424_v63 = vadd.f32 %v423_v55, %v422_v58 }
  0xbe   :  { %v264_v23 = vpop.f32.mrf.mxu0  ;;  %v853_v25 = vadd.f32 %v330_v22, %v281_v21  ;;  %v376_v22 = vsel %vm343_vm0, %v820_v7, 0.0 }
  0xbf   :  { %v313_v24 = vpop.f32.mrf.mxu1 }
  0xc0   :  { %v314_v26 = vadd.f32 %v313_v24, %v264_v23  ;;  %355 = vst.msk [vmem:[%s972_s2 + $0x58] sm:$0xff] %vm343_vm0, %v853_v25  ;;  %v411_v23 = vmul.f32 %v831_v13, %v831_v13  ;;  %v413_v38 = vmul.f32 %v853_v25, %v853_v25  ;;  %v382_v41 = vsel %vm343_vm0, %v853_v25, 0.0 }
  0xc2   :  { %348 = vst.msk [vmem:[%s972_s2 + $0x20] sm:$0xff] %vm343_vm0, %v314_v26  ;;  %v406_v51 = vmul.f32 %v314_v26, %v314_v26  ;;  %v368_v56 = vsel %vm343_vm0, %v314_v26, 0.0  ;;  %v435_v36 = vsel %vm343_vm0, %v411_v23, 0.0  ;;  %v439_v44 = vsel %vm343_vm0, %v413_v38, 0.0 }
  0xc3   :  { %v369_v0 = vadd.f32 %v368_v56, %v367_v59 }
  0xc4   :  { %v284_v27 = vpop.f32.mrf.mxu2  ;;  %v425_v60 = vsel %vm343_vm0, %v406_v51, 0.0 }
  0xc5   :  { %v333_v28 = vpop.f32.mrf.mxu3  ;;  %v426_v5 = vadd.f32 %v425_v60, %v424_v63 }
  0xc6   :  { %v266_v29 = vpop.f32.mrf.mxu0  ;;  %v864_v31 = vadd.f32 %v333_v28, %v284_v27  ;;  %v433_v28 = vsel %vm343_vm0, %v410_v16, 0.0 }
  0xc7   :  { %v315_v30 = vpop.f32.mrf.mxu1 }
  0xc8   :  { %v316_v32 = vadd.f32 %v315_v30, %v266_v29  ;;  %356 = vst.msk [vmem:[%s972_s2 + $0x60] sm:$0xff] %vm343_vm0, %v864_v31  ;;  %v378_v29 = vsel %vm343_vm0, %v831_v13, 0.0  ;;  %v412_v30 = vmul.f32 %v842_v19, %v842_v19  ;;  %v384_v45 = vsel %vm343_vm0, %v864_v31, 0.0 }
  0xca   :  { %349 = vst.msk [vmem:[%s972_s2 + $0x28] sm:$0xff] %vm343_vm0, %v316_v32  ;;  %v407_v57 = vmul.f32 %v316_v32, %v316_v32  ;;  %v370_v61 = vsel %vm343_vm0, %v316_v32, 0.0  ;;  %v437_v13 = vsel %vm343_vm0, %v412_v30, 0.0 }
  0xcb   :  { %v371_v6 = vadd.f32 %v370_v61, %v369_v0 }
  0xcc   :  { %v286_v42 = vpop.f32.mrf.mxu2  ;;  %v427_v1 = vsel %vm343_vm0, %v407_v57, 0.0 }
  0xcd   :  { %v335_v43 = vpop.f32.mrf.mxu3  ;;  %v428_v14 = vadd.f32 %v427_v1, %v426_v5 }
  0xce   :  { %v269_v46 = vpop.f32.mrf.mxu0  ;;  %v888_v48 = vadd.f32 %v335_v43, %v286_v42  ;;  %v414_v42 = vmul.f32 %v864_v31, %v864_v31 }
  0xcf   :  { %v318_v47 = vpop.f32.mrf.mxu1 }
  0xd0   :  { %v319_v52 = vadd.f32 %v318_v47, %v269_v46  ;;  %357 = vst.msk [vmem:[%s972_s2 + $0x68] sm:$0xff] %vm343_vm0, %v888_v48  ;;  %v415_v46 = vmul.f32 %v888_v48, %v888_v48  ;;  %v441_v50 = vsel %vm343_vm0, %v414_v42, 0.0  ;;  %v386_v25 = vsel %vm343_vm0, %v888_v48, 0.0 }
  0xd2   :  { %350 = vst.msk [vmem:[%s972_s2 + $0x30] sm:$0xff] %vm343_vm0, %v319_v52  ;;  %v408_v62 = vmul.f32 %v319_v52, %v319_v52  ;;  %v372_v2 = vsel %vm343_vm0, %v319_v52, 0.0  ;;  %v443_v54 = vsel %vm343_vm0, %v415_v46, 0.0 }
  0xd3   :  { %v373_v15 = vadd.f32 %v372_v2, %v371_v6 }
  0xd4   :  { %v289_v3 = vpop.f32.mrf.mxu2  ;;  %v429_v11 = vsel %vm343_vm0, %v408_v62, 0.0 }
  0xd5   :  { %v338_v4 = vpop.f32.mrf.mxu3  ;;  %v430_v20 = vadd.f32 %v429_v11, %v428_v14 }
  0xd6   :  { %v271_v8 = vpop.f32.mrf.mxu0  ;;  %v339_v10 = vadd.f32 %v338_v4, %v289_v3 }
  0xd7   :  { %v320_v9 = vpop.f32.mrf.mxu1 }
  0xd8   :  { %v321_v12 = vadd.f32 %v320_v9, %v271_v8  ;;  %358 = vst.msk [vmem:[%s972_s2 + $0x70] sm:$0xff] %vm343_vm0, %v339_v10  ;;  %v416_v51 = vmul.f32 %v339_v10, %v339_v10  ;;  %v388_v55 = vsel %vm343_vm0, %v339_v10, 0.0  ;;  %v360_v9 = vld [vmem:[%s973_s3] sm:$0x1] }
  0xda   :  { %351 = vst.msk [vmem:[%s972_s2 + $0x38] sm:$0xff] %vm343_vm0, %v321_v12  ;;  %v374_v17 = vsel %vm343_vm0, %v321_v12, 0.0  ;;  %v409_v18 = vmul.f32 %v321_v12, %v321_v12  ;;  %v445_v58 = vsel %vm343_vm0, %v416_v51, 0.0  ;;  %v401_v12 = vld [vmem:[%s974_s4] sm:$0x1] }
  0xdb   :  { %v375_v21 = vadd.f32 %v374_v17, %v373_v15 }
  0xdc   :  { %v431_v24 = vsel %vm343_vm0, %v409_v18, 0.0  ;;  %v291_v32 = vpop.f32.mrf.mxu2 }
  0xdd   :  { %v377_v26 = vadd.f32 %v376_v22, %v375_v21  ;;  %v432_v27 = vadd.f32 %v431_v24, %v430_v20  ;;  %v340_v33 = vpop.f32.mrf.mxu3 }
  0xde   :  { %v341_v7 = vadd.f32 %v340_v33, %v291_v32 }
  0xdf   :  { %v379_v34 = vadd.f32 %v378_v29, %v377_v26  ;;  %v434_v35 = vadd.f32 %v433_v28, %v432_v27 }
  0xe0   :  { %359 = vst.msk [vmem:[%s972_s2 + $0x78] sm:$0xff] %vm343_vm0, %v341_v7  ;;  %v417_v56 = vmul.f32 %v341_v7, %v341_v7  ;;  %v390_v59 = vsel %vm343_vm0, %v341_v7, 0.0 }
  0xe1   :  { %v381_v39 = vadd.f32 %v380_v37, %v379_v34  ;;  %v436_v40 = vadd.f32 %v435_v36, %v434_v35 }
  0xe2   :  { %v447_v62 = vsel %vm343_vm0, %v417_v56, 0.0 }
  0xe3   :  { %v438_v43 = vadd.f32 %v437_v13, %v436_v40  ;;  %v383_v19 = vadd.f32 %v382_v41, %v381_v39 }
  0xe5   :  { %v385_v47 = vadd.f32 %v384_v45, %v383_v19  ;;  %v440_v49 = vadd.f32 %v439_v44, %v438_v43 }
  0xe7   :  { %v387_v52 = vadd.f32 %v386_v25, %v385_v47  ;;  %v442_v53 = vadd.f32 %v441_v50, %v440_v49 }
  0xe9   :  { %v389_v57 = vadd.f32 %v388_v55, %v387_v52  ;;  %v444_v31 = vadd.f32 %v443_v54, %v442_v53 }
  0xeb   :  { %v446_v60 = vadd.f32 %v445_v58, %v444_v31  ;;  %v391_v61 = vadd.f32 %v390_v59, %v389_v57 }
  0xed   :  { %v392_v63 = vrot.slane %v391_v61, 4  ;;  %v448_v48 = vadd.f32 %v447_v62, %v446_v60 }
  0xef   :  { %v393_v0 = vadd.f32 %v392_v63, %v391_v61  ;;  %v449_v1 = vrot.slane %v448_v48, 4 }
  0xf1   :  { %v394_v2 = vrot.slane %v393_v0, 2  ;;  %v450_v3 = vadd.f32 %v449_v1, %v448_v48 }
  0xf3   :  { %v395_v4 = vadd.f32 %v394_v2, %v393_v0  ;;  %v451_v5 = vrot.slane %v450_v3, 2 }
  0xf5   :  { %v396_v6 = vrot.slane %v395_v4, 1  ;;  %v452_v8 = vadd.f32 %v451_v5, %v450_v3 }
  0xf7   :  { %v397_v10 = vadd.f32 %v396_v6, %v395_v4  ;;  %v453_v11 = vrot.slane %v452_v8, 1 }
  0xf9   :  { %v398_v14 = vadd.f32 %v397_v10, %v360_v9  ;;  %v454_v15 = vadd.f32 %v453_v11, %v452_v8 }
  0xfb   :  { %400 = vst.msk [vmem:[%s973_s3] sm:$0x1] %vm18_vm1, %v398_v14  ;;  %v455_v16 = vadd.f32 %v454_v15, %v401_v12 }
  0xfd   :  { %456 = vst.msk [vmem:[%s974_s4] sm:$0x1] %vm18_vm1, %v455_v16 }

// kernel: tile.43
= control target key start
LH: loop header
LB: loop body
LE: loop exit
PB: predicated region body
PF: predicated region fallthrough
CT: control target
= control target key end

     0   :  { %s22_s0 = inlined_call_operand.vmem [shape: f32[32], index: 0, kind: input, shape index: {}]   ;;  %s23_s1 = inlined_call_operand.vmem [shape: f32[4,32], index: 1, kind: output, shape index: {}]  }
   0x1   :  { %v4_v0 = vld [vmem:[%s22_s0] ss:$0 sm:$0xff] }
   0x2   :  { %5 = vst [vmem:[%s23_s1] sm:$0xf] %v4_v0 }

// kernel: tile.44
= control target key start
LH: loop header
LB: loop body
LE: loop exit
PB: predicated region body
PF: predicated region fallthrough
CT: control target
= control target key end

     0   :  { %s37_s8 = smov 32   ;;  %s38_s9 = smov 64   ;;  %vm7_vm0 = vcmask 261120   ;;  %vm13_vm1 = vcmask 1048320   ;;  %vm19_vm2 = vcmask 785920   ;;  %vm25_vm3 = vcmask 523520   ;;  %s55_s0 = inlined_call_operand.vmem [shape: f32[4,32], index: 0, kind: input, shape index: {}]   ;;  %s56_s1 = inlined_call_operand.vmem [shape: f32[1,128], index: 1, kind: output, shape index: {}]  }
   0x1   :  { %v4_v0 = vld [vmem:[%s55_s0] sm:$0xf]  ;;  %s36_s0 = smov 96  }
   0x2   :  { %5 = vst [vmem:[#allocation1] sm:$0xf] %v4_v0 }
   0x9   :  { %v10_v1 = vld [vmem:[#allocation1 + $0x3] sm:$0x1]   ;;  %v22_v2 = vld [vmem:[#allocation1 + $0x1] sm:$0x1]   ;;  %v16_v3 = vld [vmem:[#allocation1 + $0x2] sm:$0x1]  }
   0xa   :  { %11 = vrot.lane.b32.xlu0 %v10_v1, %s36_s0  ;;  %23 = vrot.lane.b32.xlu1 %v22_v2, %s37_s8  ;;  %v6_v4 = vld [vmem:[#allocation1] sm:$0x1]  }
   0xb   :  { %8 = vst.msk [vmem:[#allocation0] sm:$0x1] %vm7_vm0, %v6_v4  }
  0x12   :  { %17 = vrot.lane.b32.xlu0 %v16_v3, %s38_s9 }
  0x7c   :  { %v12_v5 = vpop.permute.xlu0 %11   ;;  %v24_v6 = vpop.permute.xlu1 %23  }
  0x7d   :  { %14 = vst.msk [vmem:[#allocation0] sm:$0x1] %vm13_vm1, %v12_v5  }
  0x84   :  { %v18_v7 = vpop.permute.xlu0 %17  }
  0x85   :  { %20 = vst.msk [vmem:[#allocation0] sm:$0x1] %vm19_vm2, %v18_v7  }
  0x86   :  { %26 = vst.msk [vmem:[#allocation0] sm:$0x1] %vm25_vm3, %v24_v6  }
  0x8d   :  { %v29_v8 = vld [vmem:[#allocation0] sm:$0x1] }
  0x8e   :  { %32 = vst [vmem:[%s56_s1] sm:$0x1] %v29_v8 }

// kernel: discriminator_forward.12
= control target key start
LH: loop header
LB: loop body
LE: loop exit
PB: predicated region body
PF: predicated region fallthrough
CT: control target
= control target key end

     0   :  { %s106_s0 = inlined_call_operand.vmem [shape: f32[32,128], index: 0, kind: input, shape index: {}]   ;;  %s107_s1 = inlined_call_operand.vmem [shape: f32[1,128], index: 1, kind: input, shape index: {}]   ;;  %s108_s2 = inlined_call_operand.vmem [shape: f32[1,128], index: 2, kind: input, shape index: {}]   ;;  %s109_s3 = inlined_call_operand.vmem [shape: f32[32,128], index: 3, kind: output, shape index: {}]  }
   0x1   :  { %v14_v0 = vld [vmem:[%s106_s0] sm:$0xff]  ;;  %v15_v3 = vld [vmem:[%s106_s0 + $0x8] sm:$0xff]  ;;  %v16_v6 = vld [vmem:[%s106_s0 + $0x10] sm:$0xff] }
   0x2   :  { %v54_v1 = vld [vmem:[%s107_s1] ss:$0 sm:$0xff]  ;;  %v17_v7 = vld [vmem:[%s106_s0 + $0x18] sm:$0xff] }
   0x3   :  { %v55_v2 = vld [vmem:[%s108_s2] ss:$0 sm:$0xff]  ;;  %v22_v4 = vmul.f32 %v54_v1, %v14_v0  ;;  %v23_v5 = vmul.f32 %v54_v1, %v15_v3  ;;  %v24_v8 = vmul.f32 %v54_v1, %v16_v6  ;;  %v25_v9 = vmul.f32 %v54_v1, %v17_v7 }
   0x5   :  { %v30_v10 = vadd.f32 %v55_v2, %v22_v4  ;;  %v31_v11 = vadd.f32 %v55_v2, %v23_v5  ;;  %v32_v12 = vadd.f32 %v55_v2, %v24_v8  ;;  %v33_v13 = vadd.f32 %v55_v2, %v25_v9 }
   0x7   :  { %vm34_vm0 = vcmp.gt.f32.partialorder %v30_v10, 0.0  ;;  %v38_v14 = vmul.f32 0.2, %v30_v10  ;;  %vm35_vm1 = vcmp.gt.f32.partialorder %v31_v11, 0.0  ;;  %v39_v15 = vmul.f32 0.2, %v31_v11 }
   0x8   :  { %vm36_vm2 = vcmp.gt.f32.partialorder %v32_v12, 0.0  ;;  %v40_v16 = vmul.f32 0.2, %v32_v12  ;;  %vm37_vm3 = vcmp.gt.f32.partialorder %v33_v13, 0.0  ;;  %v41_v17 = vmul.f32 0.2, %v33_v13 }
   0x9   :  { %v42_v18 = vsel %vm34_vm0, %v30_v10, %v38_v14  ;;  %v43_v19 = vsel %vm35_vm1, %v31_v11, %v39_v15 }
   0xa   :  { %46 = vst [vmem:[%s109_s3] sm:$0xff] %v42_v18  ;;  %v44_v20 = vsel %vm36_vm2, %v32_v12, %v40_v16  ;;  %v45_v21 = vsel %vm37_vm3, %v33_v13, %v41_v17 }
   0xb   :  { %47 = vst [vmem:[%s109_s3 + $0x8] sm:$0xff] %v43_v19 }
   0xc   :  { %48 = vst [vmem:[%s109_s3 + $0x10] sm:$0xff] %v44_v20 }
   0xd   :  { %49 = vst [vmem:[%s109_s3 + $0x18] sm:$0xff] %v45_v21 }

// kernel: tile.53
= control target key start
LH: loop header
LB: loop body
LE: loop exit
PB: predicated region body
PF: predicated region fallthrough
CT: control target
= control target key end

     0   :  { %s22_s0 = inlined_call_operand.vmem [shape: f32[64], index: 0, kind: input, shape index: {}]   ;;  %s23_s1 = inlined_call_operand.vmem [shape: f32[2,64], index: 1, kind: output, shape index: {}]  }
   0x1   :  { %v4_v0 = vld [vmem:[%s22_s0] ss:$0 sm:$0xff] }
   0x2   :  { %5 = vst [vmem:[%s23_s1] sm:$0x3] %v4_v0 }

// kernel: tile.54
= control target key start
LH: loop header
LB: loop body
LE: loop exit
PB: predicated region body
PF: predicated region fallthrough
CT: control target
= control target key end

     0   :  { %vm7_vm0 = vcmask 523264   ;;  %vm13_vm1 = vcmask 1048064   ;;  %s39_s0 = inlined_call_operand.vmem [shape: f32[2,64], index: 0, kind: input, shape index: {}]   ;;  %s40_s1 = inlined_call_operand.vmem [shape: f32[1,128], index: 1, kind: output, shape index: {}]  }
   0x1   :  { %v4_v0 = vld [vmem:[%s39_s0] sm:$0x3]  ;;  %s22_s0 = smov 64  }
   0x2   :  { %5 = vst [vmem:[#allocation1] sm:$0x3] %v4_v0 }
   0x9   :  { %v10_v1 = vld [vmem:[#allocation1 + $0x1] sm:$0x1]   ;;  %v6_v2 = vld [vmem:[#allocation1] sm:$0x1]  }
   0xa   :  { %11 = vrot.lane.b32.xlu0 %v10_v1, %s22_s0  ;;  %8 = vst.msk [vmem:[#allocation0] sm:$0x1] %vm7_vm0, %v6_v2  }
  0x7c   :  { %v12_v3 = vpop.permute.xlu0 %11  }
  0x7d   :  { %14 = vst.msk [vmem:[#allocation0] sm:$0x1] %vm13_vm1, %v12_v3  }
  0x84   :  { %v17_v4 = vld [vmem:[#allocation0] sm:$0x1] }
  0x85   :  { %20 = vst [vmem:[%s40_s1] sm:$0x1] %v17_v4 }

// kernel: discriminator_forward.14
= control target key start
LH: loop header
LB: loop body
LE: loop exit
PB: predicated region body
PF: predicated region fallthrough
CT: control target
= control target key end

     0   :  { %s80_s0 = inlined_call_operand.vmem [shape: f32[16,128], index: 0, kind: input, shape index: {}]   ;;  %s81_s1 = inlined_call_operand.vmem [shape: f32[1,128], index: 1, kind: input, shape index: {}]   ;;  %s82_s2 = inlined_call_operand.vmem [shape: f32[1,128], index: 2, kind: input, shape index: {}]   ;;  %s83_s3 = inlined_call_operand.vmem [shape: f32[16,128], index: 3, kind: output, shape index: {}]  }
   0x1   :  { %v14_v0 = vld [vmem:[%s80_s0] sm:$0xff]  ;;  %v15_v3 = vld [vmem:[%s80_s0 + $0x8] sm:$0xff] }
   0x2   :  { %v40_v1 = vld [vmem:[%s81_s1] ss:$0 sm:$0xff] }
   0x3   :  { %v41_v2 = vld [vmem:[%s82_s2] ss:$0 sm:$0xff]  ;;  %v20_v4 = vmul.f32 %v40_v1, %v14_v0  ;;  %v21_v5 = vmul.f32 %v40_v1, %v15_v3 }
   0x5   :  { %v26_v6 = vadd.f32 %v41_v2, %v20_v4  ;;  %v27_v7 = vadd.f32 %v41_v2, %v21_v5 }
   0x7   :  { %vm28_vm0 = vcmp.gt.f32.partialorder %v26_v6, 0.0  ;;  %v30_v8 = vmul.f32 0.2, %v26_v6  ;;  %vm29_vm1 = vcmp.gt.f32.partialorder %v27_v7, 0.0  ;;  %v31_v9 = vmul.f32 0.2, %v27_v7 }
   0x9   :  { %v32_v10 = vsel %vm28_vm0, %v26_v6, %v30_v8  ;;  %v33_v11 = vsel %vm29_vm1, %v27_v7, %v31_v9 }
   0xa   :  { %34 = vst [vmem:[%s83_s3] sm:$0xff] %v32_v10 }
   0xb   :  { %35 = vst [vmem:[%s83_s3 + $0x8] sm:$0xff] %v33_v11 }

// kernel: discriminator_forward.13
= control target key start
LH: loop header
LB: loop body
LE: loop exit
PB: predicated region body
PF: predicated region fallthrough
CT: control target
= control target key end

     0   :  { %vm18_vm0 = vcmask 516096   ;;  %v656_v58 = vmov 0.0   ;;  %vm401_vm1 = vcmask 523264   ;;  %s872_s1 = inlined_call_operand.vmem [shape: bf16[512,64], index: 1, kind: input, shape index: {}]   ;;  %s873_s0 = inlined_call_operand.vmem [shape: bf16[32,512], index: 0, kind: input, shape index: {}]   ;;  %s874_s3 = inlined_call_operand.vmem [shape: f32[1,64], index: 3, kind: output, shape index: {1}]   ;;  %s875_s4 = inlined_call_operand.vmem [shape: f32[1,64], index: 4, kind: output, shape index: {2}]   ;;  %s876_s2 = inlined_call_operand.vmem [shape: f32[32,64], index: 2, kind: output, shape index: {0}]  }
   0x1   :  { %v630_v0 = vld [vmem:[%s872_s1 + $0x38] sm:$0xff]  ;;  %v629_v4 = vld [vmem:[%s872_s1 + $0x30] sm:$0xff]  ;;  %v628_v8 = vld [vmem:[%s872_s1 + $0x28] sm:$0xff]  ;;  %19 = vst.msk [vmem:[%s874_s3] sm:$0x1] %vm18_vm0, %v656_v58 }
   0x2   :  { %v638_v1 = vld [vmem:[%s872_s1 + $0x78] sm:$0xff]  ;;  %325 = vmatpush.bf16.msra.mxu0 %v630_v0  ;;  %v637_v5 = vld [vmem:[%s872_s1 + $0x70] sm:$0xff]  ;;  %v636_v9 = vld [vmem:[%s872_s1 + $0x68] sm:$0xff]  ;;  %20 = vst.msk [vmem:[%s875_s4] sm:$0x1] %vm18_vm0, %v656_v58 }
   0x3   :  { %v646_v2 = vld [vmem:[%s872_s1 + $0xb8] sm:$0xff]  ;;  %344 = vmatpush.bf16.msra.mxu1 %v638_v1  ;;  %v645_v6 = vld [vmem:[%s872_s1 + $0xb0] sm:$0xff]  ;;  %v644_v10 = vld [vmem:[%s872_s1 + $0xa8] sm:$0xff] }
   0x4   :  { %v654_v3 = vld [vmem:[%s872_s1 + $0xf8] sm:$0xff]  ;;  %363 = vmatpush.bf16.msra.mxu2 %v646_v2  ;;  %v653_v7 = vld [vmem:[%s872_s1 + $0xf0] sm:$0xff]  ;;  %v652_v11 = vld [vmem:[%s872_s1 + $0xe8] sm:$0xff] }
   0x5   :  { %382 = vmatpush.bf16.msra.mxu3 %v654_v3  ;;  %v627_v12 = vld [vmem:[%s872_s1 + $0x20] sm:$0xff]  ;;  %v626_v16 = vld [vmem:[%s872_s1 + $0x18] sm:$0xff]  ;;  %v625_v20 = vld [vmem:[%s872_s1 + $0x10] sm:$0xff] }
   0x6   :  { %326 = vmatpush.bf16.msra.mxu0 %v629_v4  ;;  %v635_v13 = vld [vmem:[%s872_s1 + $0x60] sm:$0xff]  ;;  %v634_v17 = vld [vmem:[%s872_s1 + $0x58] sm:$0xff]  ;;  %v633_v21 = vld [vmem:[%s872_s1 + $0x50] sm:$0xff] }
   0x7   :  { %345 = vmatpush.bf16.msra.mxu1 %v637_v5  ;;  %v643_v14 = vld [vmem:[%s872_s1 + $0xa0] sm:$0xff]  ;;  %v642_v18 = vld [vmem:[%s872_s1 + $0x98] sm:$0xff]  ;;  %v641_v22 = vld [vmem:[%s872_s1 + $0x90] sm:$0xff] }
   0x8   :  { %364 = vmatpush.bf16.msra.mxu2 %v645_v6  ;;  %v651_v15 = vld [vmem:[%s872_s1 + $0xe0] sm:$0xff]  ;;  %v650_v19 = vld [vmem:[%s872_s1 + $0xd8] sm:$0xff]  ;;  %v649_v23 = vld [vmem:[%s872_s1 + $0xd0] sm:$0xff] }
   0x9   :  { %383 = vmatpush.bf16.msra.mxu3 %v653_v7  ;;  %v624_v24 = vld [vmem:[%s872_s1 + $0x8] sm:$0xff]  ;;  %v623_v28 = vld [vmem:[%s872_s1] sm:$0xff]  ;;  %v617_v33 = vld [vmem:[%s873_s0 + $0xc] sm:$0xf0] }
   0xa   :  { %327 = vmatpush.bf16.msra.mxu0 %v628_v8  ;;  %v632_v25 = vld [vmem:[%s872_s1 + $0x48] sm:$0xff]  ;;  %v631_v29 = vld [vmem:[%s872_s1 + $0x40] sm:$0xff]  ;;  %v459_v35 = vld [vmem:[%s873_s0 + $0x10] sm:$0xf0] }
   0xb   :  { %346 = vmatpush.bf16.msra.mxu1 %v636_v9  ;;  %v640_v26 = vld [vmem:[%s872_s1 + $0x88] sm:$0xff]  ;;  %v639_v30 = vld [vmem:[%s872_s1 + $0x80] sm:$0xff]  ;;  %v618_v37 = vld [vmem:[%s873_s0 + $0x14] sm:$0xf0] }
   0xc   :  { %365 = vmatpush.bf16.msra.mxu2 %v644_v10  ;;  %v648_v27 = vld [vmem:[%s872_s1 + $0xc8] sm:$0xff]  ;;  %v647_v31 = vld [vmem:[%s872_s1 + $0xc0] sm:$0xff]  ;;  %v467_v39 = vld [vmem:[%s873_s0 + $0x18] sm:$0xf0] }
   0xd   :  { %384 = vmatpush.bf16.msra.mxu3 %v652_v11  ;;  %v457_v32 = vld [vmem:[%s873_s0] sm:$0xf]  ;;  %v615_v34 = vld [vmem:[%s873_s0 + $0x4] sm:$0xf]  ;;  %v465_v36 = vld [vmem:[%s873_s0 + $0x8] sm:$0xf] }
   0xe   :  { %328 = vmatpush.bf16.msra.mxu0 %v627_v12  ;;  %v616_v38 = vld [vmem:[%s873_s0 + $0xc] sm:$0xf]  ;;  %v458_v40 = vor.u32 %v617_v33, %v457_v32  ;;  %v462_v41 = vor.u32 %v615_v34, %v459_v35  ;;  %v466_v42 = vor.u32 %v618_v37, %v465_v36  ;;  %v473_v44 = vld [vmem:[%s873_s0 + $0x20] sm:$0xf]  ;;  %v621_v45 = vld [vmem:[%s873_s0 + $0x2c] sm:$0xf0] }
   0xf   :  { %347 = vmatpush.bf16.msra.mxu1 %v635_v13  ;;  %v470_v43 = vor.u32 %v616_v38, %v467_v39  ;;  %v619_v46 = vld [vmem:[%s873_s0 + $0x24] sm:$0xf]  ;;  %v475_v47 = vld [vmem:[%s873_s0 + $0x30] sm:$0xf0]  ;;  %v481_v48 = vld [vmem:[%s873_s0 + $0x28] sm:$0xf]  ;;  %v474_v52 = vor.u32 %v621_v45, %v473_v44 }
  0x10   :  { %366 = vmatpush.bf16.msra.mxu2 %v643_v14  ;;  %v622_v49 = vld [vmem:[%s873_s0 + $0x34] sm:$0xf0]  ;;  %v620_v50 = vld [vmem:[%s873_s0 + $0x2c] sm:$0xf]  ;;  %v483_v51 = vld [vmem:[%s873_s0 + $0x38] sm:$0xf0]  ;;  %v478_v53 = vor.u32 %v619_v46, %v475_v47 }
  0x11   :  { %385 = vmatpush.bf16.msra.mxu3 %v651_v15  ;;  %v482_v54 = vor.u32 %v622_v49, %v481_v48  ;;  %v486_v55 = vor.u32 %v620_v50, %v483_v51  ;;  %v406_v48 = vld [vmem:[%s874_s3] sm:$0x1] }
  0x12   :  { %329 = vmatpush.bf16.msra.mxu0 %v626_v16  ;;  %v423_v51 = vld [vmem:[%s875_s4] sm:$0x1] }
  0x13   :  { %348 = vmatpush.bf16.msra.mxu1 %v634_v17 }
  0x14   :  { %367 = vmatpush.bf16.msra.mxu2 %v642_v18 }
  0x15   :  { %386 = vmatpush.bf16.msra.mxu3 %v650_v19 }
  0x16   :  { %330 = vmatpush.bf16.msra.mxu0 %v625_v20 }
  0x17   :  { %349 = vmatpush.bf16.msra.mxu1 %v633_v21 }
  0x18   :  { %368 = vmatpush.bf16.msra.mxu2 %v641_v22 }
  0x19   :  { %387 = vmatpush.bf16.msra.mxu3 %v649_v23 }
  0x1a   :  { %331 = vmatpush.bf16.msra.mxu0 %v624_v24 }
  0x1b   :  { %350 = vmatpush.bf16.msra.mxu1 %v632_v25 }
  0x1c   :  { %369 = vmatpush.bf16.msra.mxu2 %v640_v26 }
  0x1d   :  { %388 = vmatpush.bf16.msra.mxu3 %v648_v27 }
  0x1e   :  { %332 = vmatpush.bf16.msra.mxu0 %v623_v28 }
  0x1f   :  { %351 = vmatpush.bf16.msra.mxu1 %v631_v29 }
  0x20   :  { %370 = vmatpush.bf16.msra.mxu2 %v639_v30 }
  0x21   :  { %389 = vmatpush.bf16.msra.mxu3 %v647_v31  ;;  %333 = vmatmul.bf16.vlgmr.msra.gmra.mxu0 %v458_v40 }
  0x22   :  { %352 = vmatmul.bf16.vlgmr.msra.gmra.mxu1 %v462_v41 }
  0x23   :  { %371 = vmatmul.bf16.vlgmr.msra.gmra.mxu2 %v466_v42 }
  0x24   :  { %390 = vmatmul.bf16.vlgmr.msra.gmra.mxu3 %v470_v43 }
  0x31   :  { %338 = vmatmul.bf16.gmra.mxu0 %v474_v52 }
  0x32   :  { %357 = vmatmul.bf16.gmra.mxu1 %v478_v53 }
  0x33   :  { %376 = vmatmul.bf16.gmra.mxu2 %v482_v54 }
  0x34   :  { %395 = vmatmul.bf16.gmra.mxu3 %v486_v55 }
  0x9e   :  { %v334_v56 = vpop.f32.mrf.mxu0 }
  0x9f   :  { %v353_v57 = vpop.f32.mrf.mxu1 }
  0xa0   :  { %v354_v59 = vadd.f32 %v353_v57, %v334_v56 }
  0xa6   :  { %v372_v60 = vpop.f32.mrf.mxu2  ;;  %v336_v63 = vpop.f32.mrf.mxu0 }
  0xa7   :  { %v391_v61 = vpop.f32.mrf.mxu3  ;;  %v373_v62 = vadd.f32 %v372_v60, %v354_v59  ;;  %v355_v0 = vpop.f32.mrf.mxu1 }
  0xa8   :  { %v356_v2 = vadd.f32 %v355_v0, %v336_v63 }
  0xa9   :  { %v392_v1 = vadd.f32 %v391_v61, %v373_v62 }
  0xab   :  { %402 = vst.msk [vmem:[%s876_s2] sm:$0xff] %vm401_vm1, %v392_v1  ;;  %v424_v17 = vmul.f32 %v392_v1, %v392_v1  ;;  %v407_v22 = vsel %vm401_vm1, %v392_v1, 0.0 }
  0xad   :  { %v428_v28 = vsel %vm401_vm1, %v424_v17, 0.0 }
  0xae   :  { %v374_v3 = vpop.f32.mrf.mxu2  ;;  %v339_v6 = vpop.f32.mrf.mxu0 }
  0xaf   :  { %v393_v4 = vpop.f32.mrf.mxu3  ;;  %v375_v5 = vadd.f32 %v374_v3, %v356_v2  ;;  %v358_v7 = vpop.f32.mrf.mxu1 }
  0xb0   :  { %v359_v9 = vadd.f32 %v358_v7, %v339_v6 }
  0xb1   :  { %v394_v8 = vadd.f32 %v393_v4, %v375_v5 }
  0xb3   :  { %403 = vst.msk [vmem:[%s876_s2 + $0x8] sm:$0xff] %vm401_vm1, %v394_v8  ;;  %v425_v16 = vmul.f32 %v394_v8, %v394_v8  ;;  %v408_v18 = vsel %vm401_vm1, %v394_v8, 0.0 }
  0xb4   :  { %v409_v26 = vadd.f32 %v408_v18, %v407_v22 }
  0xb5   :  { %v429_v23 = vsel %vm401_vm1, %v425_v16, 0.0 }
  0xb6   :  { %v377_v10 = vpop.f32.mrf.mxu2  ;;  %v341_v14 = vpop.f32.mrf.mxu0  ;;  %v430_v31 = vadd.f32 %v429_v23, %v428_v28 }
  0xb7   :  { %v396_v11 = vpop.f32.mrf.mxu3  ;;  %v378_v12 = vadd.f32 %v377_v10, %v359_v9  ;;  %v360_v15 = vpop.f32.mrf.mxu1 }
  0xb8   :  { %v361_v20 = vadd.f32 %v360_v15, %v341_v14 }
  0xb9   :  { %v397_v13 = vadd.f32 %v396_v11, %v378_v12 }
  0xbb   :  { %404 = vst.msk [vmem:[%s876_s2 + $0x10] sm:$0xff] %vm401_vm1, %v397_v13  ;;  %v426_v19 = vmul.f32 %v397_v13, %v397_v13  ;;  %v410_v24 = vsel %vm401_vm1, %v397_v13, 0.0 }
  0xbc   :  { %v411_v32 = vadd.f32 %v410_v24, %v409_v26 }
  0xbd   :  { %v431_v29 = vsel %vm401_vm1, %v426_v19, 0.0 }
  0xbe   :  { %v379_v21 = vpop.f32.mrf.mxu2  ;;  %v432_v35 = vadd.f32 %v431_v29, %v430_v31 }
  0xbf   :  { %v380_v25 = vadd.f32 %v379_v21, %v361_v20  ;;  %v398_v27 = vpop.f32.mrf.mxu3 }
  0xc1   :  { %v399_v30 = vadd.f32 %v398_v27, %v380_v25 }
  0xc3   :  { %405 = vst.msk [vmem:[%s876_s2 + $0x18] sm:$0xff] %vm401_vm1, %v399_v30  ;;  %v412_v33 = vsel %vm401_vm1, %v399_v30, 0.0  ;;  %v427_v34 = vmul.f32 %v399_v30, %v399_v30 }
  0xc4   :  { %v413_v36 = vadd.f32 %v412_v33, %v411_v32 }
  0xc5   :  { %v433_v37 = vsel %vm401_vm1, %v427_v34, 0.0 }
  0xc6   :  { %v414_v38 = vrot.slane %v413_v36, 4  ;;  %v434_v39 = vadd.f32 %v433_v37, %v432_v35 }
  0xc8   :  { %v415_v40 = vadd.f32 %v414_v38, %v413_v36  ;;  %v435_v41 = vrot.slane %v434_v39, 4 }
  0xca   :  { %v416_v42 = vrot.slane %v415_v40, 2  ;;  %v436_v43 = vadd.f32 %v435_v41, %v434_v39 }
  0xcc   :  { %v417_v44 = vadd.f32 %v416_v42, %v415_v40  ;;  %v437_v45 = vrot.slane %v436_v43, 2 }
  0xce   :  { %v418_v46 = vrot.slane %v417_v44, 1  ;;  %v438_v47 = vadd.f32 %v437_v45, %v436_v43 }
  0xd0   :  { %v419_v49 = vadd.f32 %v418_v46, %v417_v44  ;;  %v439_v50 = vrot.slane %v438_v47, 1 }
  0xd2   :  { %v420_v52 = vadd.f32 %v419_v49, %v406_v48  ;;  %v440_v53 = vadd.f32 %v439_v50, %v438_v47 }
  0xd4   :  { %422 = vst.msk [vmem:[%s874_s3] sm:$0x1] %vm18_vm0, %v420_v52  ;;  %v441_v54 = vadd.f32 %v440_v53, %v423_v51 }
  0xd6   :  { %442 = vst.msk [vmem:[%s875_s4] sm:$0x1] %vm18_vm0, %v441_v54 }

// kernel: discriminator_forward.15
= control target key start
LH: loop header
LB: loop body
LE: loop exit
PB: predicated region body
PF: predicated region fallthrough
CT: control target
= control target key end

     0   :  { %vm34_vm0 = vcmask 1041408   ;;  %vm36_vm1 = vcmask 1045508   ;;  %vm38_vm2 = vcmask 1043456   ;;  %vm90_vm3 = vcmask 1024   ;;  %s146_s1 = inlined_call_operand.vmem [shape: f32[1,1024], index: 1, kind: input, shape index: {}]   ;;  %s147_s2 = inlined_call_operand.<no memory space> [shape: f32[1,1], index: 2, kind: input, shape index: {}]   ;;  %s148_s0 = inlined_call_operand.vmem [shape: f32[2,1024], index: 0, kind: input, shape index: {}]   ;;  %s149_s3 = inlined_call_operand.vmem [shape: f32[2,1], index: 3, kind: output, shape index: {}]  }
   0x1   :  { %v18_v0 = vld [vmem:[%s146_s1] sm:$0xff]  ;;  %v8_v12 = vstv %s147_s2  ;;  %v17_v17 = vld [vmem:[%s148_s0 + $0x8] sm:$0xff] }
   0x2   :  { %v20_v1 = vperm.slane %v18_v0, 0  ;;  %v21_v2 = vperm.slane %v18_v0, 1  ;;  %v22_v3 = vperm.slane %v18_v0, 2  ;;  %v23_v4 = vperm.slane %v18_v0, 3  ;;  %v16_v13 = vld [vmem:[%s148_s0] sm:$0xff] }
   0x3   :  { %v24_v5 = vperm.slane %v18_v0, 4  ;;  %v25_v6 = vperm.slane %v18_v0, 5  ;;  %v26_v7 = vperm.slane %v18_v0, 6  ;;  %v27_v8 = vperm.slane %v18_v0, 7  ;;  %9 = vst [vmem:[#allocation2] sm:$0x1] %v8_v12 }
   0x4   :  { %v28_v9 = vrot.slane %v21_v2, 6  ;;  %v29_v10 = vrot.slane %v22_v3, 4  ;;  %v30_v11 = vrot.slane %v23_v4, 2 }
   0x5   :  { %v31_v14 = vrot.slane %v25_v6, 6  ;;  %v32_v15 = vrot.slane %v26_v7, 4  ;;  %v33_v16 = vrot.slane %v27_v8, 2 }
   0x6   :  { %v35_v18 = vsel %vm34_vm0, %v20_v1, %v28_v9  ;;  %v37_v19 = vsel %vm36_vm1, %v29_v10, %v30_v11 }
   0x7   :  { %v39_v20 = vsel %vm38_vm2, %v35_v18, %v37_v19  ;;  %v40_v21 = vsel %vm34_vm0, %v24_v5, %v31_v14  ;;  %v41_v22 = vsel %vm36_vm1, %v32_v15, %v33_v16 }
   0x8   :  { %v42_v23 = vsel %vm38_vm2, %v40_v21, %v41_v22  ;;  %v45_v24 = vmul.f32 %v39_v20, %v16_v13 }
   0x9   :  { %v46_v25 = vmul.f32 %v42_v23, %v17_v17 }
   0xa   :  { %49 = vst [vmem:[#allocation1] ss:$4 sm:$0xff] %v45_v24  ;;  %v96_v49 = vld [vmem:[#allocation2] ss:$0 sm:$0xff] }
   0xb   :  { %51 = vst [vmem:[#allocation1 + $0x20] ss:$4 sm:$0xff] %v46_v25 }
  0x11   :  { %v52_v26 = vld.sshfl [vmem:[#allocation1] sm:$0xff pattern:$0x73625140]  ;;  %v53_v27 = vld.sshfl [vmem:[#allocation1 + $0x8] sm:$0xff pattern:$0x73625140] }
  0x12   :  { %v54_v28 = vld.sshfl [vmem:[#allocation1 + $0x10] sm:$0xff pattern:$0x73625140]  ;;  %v55_v29 = vld.sshfl [vmem:[#allocation1 + $0x18] sm:$0xff pattern:$0x73625140] }
  0x13   :  { %v68_v30 = vsel %vm34_vm0, %v52_v26, 0.0  ;;  %v69_v31 = vsel %vm34_vm0, %v53_v27, 0.0  ;;  %v71_v32 = vsel %vm34_vm0, %v54_v28, 0.0  ;;  %v56_v33 = vld.sshfl [vmem:[#allocation1 + $0x20] sm:$0xff pattern:$0x73625140] }
  0x14   :  { %v70_v34 = vadd.f32 %v69_v31, %v68_v30  ;;  %v73_v35 = vsel %vm34_vm0, %v55_v29, 0.0  ;;  %v57_v36 = vld.sshfl [vmem:[#allocation1 + $0x28] sm:$0xff pattern:$0x73625140]  ;;  %v75_v38 = vsel %vm34_vm0, %v56_v33, 0.0 }
  0x15   :  { %v58_v39 = vld.sshfl [vmem:[#allocation1 + $0x30] sm:$0xff pattern:$0x73625140]  ;;  %v77_v41 = vsel %vm34_vm0, %v57_v36, 0.0 }
  0x16   :  { %v72_v37 = vadd.f32 %v71_v32, %v70_v34  ;;  %v59_v42 = vld.sshfl [vmem:[#allocation1 + $0x38] sm:$0xff pattern:$0x73625140]  ;;  %v79_v44 = vsel %vm34_vm0, %v58_v39, 0.0 }
  0x17   :  { %v81_v46 = vsel %vm34_vm0, %v59_v42, 0.0 }
  0x18   :  { %v74_v40 = vadd.f32 %v73_v35, %v72_v37 }
  0x1a   :  { %v76_v43 = vadd.f32 %v75_v38, %v74_v40 }
  0x1c   :  { %v78_v45 = vadd.f32 %v77_v41, %v76_v43 }
  0x1e   :  { %v80_v47 = vadd.f32 %v79_v44, %v78_v45 }
  0x20   :  { %v82_v48 = vadd.f32 %v81_v46, %v80_v47 }
  0x22   :  { %83 = vadd.xlane.f32.xlu0 %v82_v48 }
  0x95   :  { %v84_v50 = vpop.xlane.xlu0 %83 }
  0x96   :  { %v89_v51 = vadd.f32 %v96_v49, %v84_v50 }
  0x98   :  { %91 = vst.msk [vmem:[%s149_s3] sm:$0x3] %vm90_vm3, %v89_v51 }

</bundles_post_ra>
